<compile_context>
chip_gen: v6e
topology: v6e:2x2x1
jax: 0.10.0
libtpu: 0.0.40
codegen_flags: <defaults>
</compile_context>

<pallas_src>
import jax
import jax.numpy as jnp
import numpy as np
from jax.experimental import pallas as pl
from jax.experimental.pallas import tpu as pltpu

BN_EPS = 1e-5
LANES = 128


def _round_up(x, m):
    return ((x + m - 1) // m) * m


def _vmem_limit_bytes(H, W, Cp):
    """Footprint-based scoped-VMEM limit, safe across v5e/v6e/v7x."""
    act = H * W * Cp * 2                      # bf16 activation block
    pad = (H + 2) * (W + 2) * Cp * 2          # in-VMEM haloed slab
    cols = (H + 2) * W * 3 * Cp * 2           # dw-merged operand
    acc = H * W * Cp * 4                      # f32 accumulator (+ affine temp)
    wts = 3 * 3 * Cp * Cp * 2                 # bf16 packed weights
    need = 2 * (2 * act + 2 * wts) + pad + cols + 2 * acc + act
    try:
        cap = pltpu.get_tpu_info().vmem_capacity_bytes
    except Exception:
        cap = 64 * 1024 * 1024                # conservative: v7x physical VMEM
    budget = int(cap * 3 // 4)
    return int(min(max(2 * need, 16 * 1024 * 1024), budget))


# ---------------------------------------------------------------------------
# Conv kernels: 3x3 conv (stride 1, pad 1) on a whole-image block as three
# K = 3*Cp MXU matmuls (dw taps merged along K), plus per-batch BatchNorm
# partial statistics (sum, sum of squares) taken from the f32 accumulator.
# The fused variant applies relu(scale*x + shift) (previous BN+ReLU) to the
# loaded block *before* the in-VMEM halo pad, so border zeros stay zero.
# ---------------------------------------------------------------------------
def _conv3x3_mxu(xb, w_ref, h_ref, stats_ref):
    H, W, Cp = xb.shape
    zw = jnp.zeros((H, 1, Cp), xb.dtype)
    x1 = jnp.concatenate([zw, xb, zw], axis=1)                 # (H, W+2, Cp)
    zh = jnp.zeros((1, W + 2, Cp), xb.dtype)
    xp = jnp.concatenate([zh, x1, zh], axis=0)                 # (H+2, W+2, Cp)
    # Merge the 3 dw taps along K once (3 strided slices), so each matmul
    # operand below is a contiguous leading-dim slice + contiguous reshape.
    cols = jnp.concatenate(
        [xp[:, 0:W, :], xp[:, 1:W + 1, :], xp[:, 2:W + 2, :]], axis=2)  # (H+2, W, 3Cp)
    acc = jnp.zeros((H * W, Cp), jnp.float32)
    for dh in range(3):                                        # 3 K=3*Cp MXU matmuls
        patch = cols[dh:dh + H].reshape(H * W, 3 * Cp)
        acc = acc + jnp.dot(patch, w_ref[dh], preferred_element_type=jnp.float32)
    h_ref[...] = acc.reshape(H, W, Cp).astype(h_ref.dtype)     # bf16 writeback
    s = jnp.sum(acc, axis=0, keepdims=True)                    # (1, Cp) f32
    ss = jnp.sum(acc * acc, axis=0, keepdims=True)             # (1, Cp) f32
    stats_ref[...] = jnp.concatenate([s, ss], axis=0)          # (2, Cp)


def conv3x3_stats_kernel(x_ref, w_ref, h_ref, stats_ref):
    _conv3x3_mxu(x_ref[...], w_ref, h_ref, stats_ref)


def bnrelu_conv3x3_stats_kernel(x_ref, sc_ref, sh_ref, w_ref, h_ref, stats_ref):
    Cp = x_ref.shape[-1]
    sc = sc_ref[...].reshape(1, 1, Cp)
    sh = sh_ref[...].reshape(1, 1, Cp)
    a = jnp.maximum(x_ref[...].astype(jnp.float32) * sc + sh, 0.0)
    _conv3x3_mxu(a.astype(jnp.bfloat16), w_ref, h_ref, stats_ref)


# ---------------------------------------------------------------------------
# Final streaming kernel: bn2 (folded per-channel affine) -> ReLU -> +residual
# -> ReLU, whole-image lane-dense blocks.
# ---------------------------------------------------------------------------
def bn_relu_add_relu_kernel(h_ref, sc_ref, sh_ref, r_ref, o_ref):
    Cp = o_ref.shape[-1]
    sc = sc_ref[...].reshape(1, 1, Cp)
    sh = sh_ref[...].reshape(1, 1, Cp)
    y = jnp.maximum(h_ref[...].astype(jnp.float32) * sc + sh, 0.0)
    o_ref[...] = jnp.maximum(y + r_ref[...].astype(jnp.float32), 0.0)


# ---------------------------------------------------------------------------
# pallas_call wrappers
# ---------------------------------------------------------------------------
def conv3x3_pass(x, w_mat, scale=None, shift=None, *, vmem_limit):
    N, H, W, Cp = x.shape
    blk = pl.BlockSpec((None, H, W, Cp), lambda n: (n, 0, 0, 0))
    wspec = pl.BlockSpec((3, 3 * Cp, Cp), lambda n: (0, 0, 0))
    vec = pl.BlockSpec((1, Cp), lambda n: (0, 0))
    st_spec = pl.BlockSpec((None, 2, Cp), lambda n: (n, 0, 0))

    if scale is None:
        kernel, in_specs, args = conv3x3_stats_kernel, [blk, wspec], (x, w_mat)
    else:
        kernel = bnrelu_conv3x3_stats_kernel
        in_specs = [blk, vec, vec, wspec]
        args = (x, scale, shift, w_mat)

    flops = 2 * N * H * W * 9 * Cp * Cp
    bytes_accessed = (x.size * 2 + w_mat.size * 2
                      + N * H * W * Cp * 2 + N * 2 * Cp * 4)
    return pl.pallas_call(
        kernel,
        out_shape=(jax.ShapeDtypeStruct((N, H, W, Cp), jnp.bfloat16),
                   jax.ShapeDtypeStruct((N, 2, Cp), jnp.float32)),
        grid=(N,),
        in_specs=in_specs,
        out_specs=(blk, st_spec),
        compiler_params=pltpu.CompilerParams(
            dimension_semantics=("parallel",),
            vmem_limit_bytes=vmem_limit),
        cost_estimate=pl.CostEstimate(flops=flops, transcendentals=0,
                                      bytes_accessed=bytes_accessed),
    )(*args)


def bn_relu_add_relu(h, scale, shift, residual, *, vmem_limit):
    N, H, W, Cp = h.shape
    blk = pl.BlockSpec((None, H, W, Cp), lambda n: (n, 0, 0, 0))
    vec = pl.BlockSpec((1, Cp), lambda n: (0, 0))
    return pl.pallas_call(
        bn_relu_add_relu_kernel,
        out_shape=jax.ShapeDtypeStruct((N, H, W, Cp), jnp.float32),
        grid=(N,),
        in_specs=[blk, vec, vec, blk],
        out_specs=blk,
        compiler_params=pltpu.CompilerParams(
            dimension_semantics=("parallel",),
            vmem_limit_bytes=vmem_limit),
    )(h, scale, shift, residual)


# ---------------------------------------------------------------------------
# Plain-JAX glue: weight packing, channel padding, tiny per-channel BN finalize
# (folds batch mean/var and gamma/beta into one FMA: scale*h + shift).
# ---------------------------------------------------------------------------
def _pack_weight(w_oihw, cp):
    cout, cin, kh, kw = w_oihw.shape
    w = jnp.transpose(w_oihw, (2, 3, 1, 0))                       # (kh, kw, cin, cout)
    w = jnp.pad(w, ((0, 0), (0, 0), (0, cp - cin), (0, cp - cout)))
    return w.reshape(kh, kw * cp, cp).astype(jnp.bfloat16)        # rows = dw*Cp + cin


def _pad_vec(v, cp):
    return jnp.pad(v.astype(jnp.float32), (0, cp - v.shape[0])).reshape(1, cp)


def _finalize_stats(stats, gamma_p, beta_p, m):
    s = jnp.sum(stats, axis=0)                            # (2, Cp), tiny
    mean = s[0] / m
    var = jnp.maximum(s[1] / m - mean * mean, 0.0)        # biased var (training-mode BN)
    scale = gamma_p[0] * jax.lax.rsqrt(var + BN_EPS)
    shift = beta_p[0] - mean * scale
    return scale.reshape(1, -1), shift.reshape(1, -1)


@jax.jit
def basic_block_forward(x_nchw, w1, g1, b1, w2, g2, b2):
    # stride=1, downsample=None path of BasicBlock (planes == inplanes).
    N, C, H, W = x_nchw.shape
    Cp = _round_up(max(C, LANES), LANES)
    M = N * H * W
    vlim = _vmem_limit_bytes(H, W, Cp)

    # NCHW -> NHWC (channels-last, lane-dense Cp) in bf16; this array doubles as
    # the residual.  TODO(synk): in a chained ResNet keep activations in this
    # layout/dtype across blocks so the transposes below happen only once.
    x_nhwc = jnp.transpose(x_nchw, (0, 2, 3, 1))
    x_p = jnp.pad(x_nhwc, ((0, 0), (0, 0), (0, 0), (0, Cp - C))).astype(jnp.bfloat16)

    w1m, w2m = _pack_weight(w1, Cp), _pack_weight(w2, Cp)
    g1p, b1p = _pad_vec(g1, Cp), _pad_vec(b1, Cp)
    g2p, b2p = _pad_vec(g2, Cp), _pad_vec(b2, Cp)

    # conv1 (+ BN1 partial stats)
    h1, st1 = conv3x3_pass(x_p, w1m, vmem_limit=vlim)
    sc1, sh1 = _finalize_stats(st1, g1p, b1p, M)

    # [bn1 + relu fused into the conv input path] conv2 (+ BN2 partial stats)
    h2, st2 = conv3x3_pass(h1, w2m, scale=sc1, shift=sh1, vmem_limit=vlim)
    sc2, sh2 = _finalize_stats(st2, g2p, b2p, M)

    # bn2 -> relu -> +residual -> relu
    out_p = bn_relu_add_relu(h2, sc2, sh2, x_p, vmem_limit=vlim)

    # TODO(synk): very large feature maps (e.g. 112x112 stems) would need a
    # row-tiled halo path (pl.ANY + manual make_async_copy of haloed windows);
    # whole-image blocks used here cover standard ResNet block sizes.
    return jnp.transpose(out_p[..., :C], (0, 3, 1, 2))   # back to NCHW


# ---------------------------------------------------------------------------
# Pure-JAX reference (mirrors the given PyTorch forward: ReLU after bn2 AND
# after the residual add; BN in training mode with biased variance).
# ---------------------------------------------------------------------------
def _ref_bn_relu(h, g, b):
    mean = jnp.mean(h, axis=(0, 2, 3), keepdims=True)
    var = jnp.mean((h - mean) ** 2, axis=(0, 2, 3), keepdims=True)
    hn = (h - mean) * jax.lax.rsqrt(var + BN_EPS) * g.reshape(1, -1, 1, 1) + b.reshape(1, -1, 1, 1)
    return jnp.maximum(hn, 0.0)


def ref_forward(x, w1, g1, b1, w2, g2, b2):
    conv = lambda a, w: jax.lax.conv_general_dilated(
        a, w, (1, 1), ((1, 1), (1, 1)),
        dimension_numbers=("NCHW", "OIHW", "NCHW"),
        precision=jax.lax.Precision.HIGHEST)
    out = _ref_bn_relu(conv(x, w1), g1, b1)
    out = _ref_bn_relu(conv(out, w2), g2, b2)
    return jnp.maximum(out + x, 0.0)


if __name__ == "__main__":
    # BasicBlock(inplanes=4, planes=4, stride=1, downsample=None)
    N, C, H, W = 2, 4, 16, 16
    planes = C

    key = jax.random.PRNGKey(0)
    kx, kw1, kw2, kg1, kb1, kg2, kb2 = jax.random.split(key, 7)

    x = jax.random.normal(kx, (N, C, H, W), jnp.float32)
    w1 = jax.random.normal(kw1, (planes, C, 3, 3), jnp.float32) * 0.3
    w2 = jax.random.normal(kw2, (planes, planes, 3, 3), jnp.float32) * 0.3
    g1 = 1.0 + 0.1 * jax.random.normal(kg1, (planes,), jnp.float32)
    b1 = 0.1 * jax.random.normal(kb1, (planes,), jnp.float32)
    g2 = 1.0 + 0.1 * jax.random.normal(kg2, (planes,), jnp.float32)
    b2 = 0.1 * jax.random.normal(kb2, (planes,), jnp.float32)

    out = jax.block_until_ready(basic_block_forward(x, w1, g1, b1, w2, g2, b2))
    ref = jax.block_until_ready(ref_forward(x, w1, g1, b1, w2, g2, b2))

    # bf16 MXU operands + bf16 intermediate/residual storage (f32 accumulation &
    # f32 BN statistics) vs an f32 HIGHEST-precision reference.
    np.testing.assert_allclose(np.asarray(out), np.asarray(ref), atol=1e-1, rtol=1e-1)

    print("KERNEL_OK")
</pallas_src>

<mosaic_0001>
module attributes {stable_mosaic.version = 11 : i64} {
  func.func @conv3x3_stats_kernel(%arg0: i32, %arg1: memref<1x16x16x128xbf16, #tpu.memory_space<vmem>>, %arg2: memref<3x384x128xbf16, #tpu.memory_space<vmem>>, %arg3: memref<1x16x16x128xbf16, #tpu.memory_space<vmem>>, %arg4: memref<1x2x128xf32, #tpu.memory_space<vmem>>) attributes {dimension_semantics = [#tpu.dimension_semantics<parallel>], iteration_bounds = array<i64: 2>, scalar_prefetch = 0 : i64, scratch_operands = 0 : i64, tpu.core_type = #tpu.core_type<tc>, window_params = [{transform_indices = @transform_0, window_bounds = array<i64: 1, 16, 16, 128>}, {pipeline_mode = #tpu.pipeline_mode<synchronous>, transform_indices = @transform_1, window_bounds = array<i64: 3, 384, 128>}, {transform_indices = @transform_2, window_bounds = array<i64: 1, 16, 16, 128>}, {transform_indices = @transform_3, window_bounds = array<i64: 1, 2, 128>}]} {
    %c0 = arith.constant 0 : index
    %c0_0 = arith.constant 0 : index
    %c0_1 = arith.constant 0 : index
    %c0_2 = arith.constant 0 : index
    %0 = vector.load %arg1[%c0, %c0_0, %c0_1, %c0_2] : memref<1x16x16x128xbf16, #tpu.memory_space<vmem>>, vector<1x16x16x128xbf16>
    %1 = vector.shape_cast %0 : vector<1x16x16x128xbf16> to vector<16x16x128xbf16>
    %cst = arith.constant 0.000000e+00 : bf16
    %2 = vector.broadcast %cst : bf16 to vector<16x1x128xbf16>
    %3 = tpu.concatenate %2, %1, %2 in 1 : vector<16x1x128xbf16>, vector<16x16x128xbf16>, vector<16x1x128xbf16> -> vector<16x18x128xbf16>
    %cst_3 = arith.constant 0.000000e+00 : bf16
    %4 = vector.broadcast %cst_3 : bf16 to vector<1x18x128xbf16>
    %5 = tpu.concatenate %4, %3, %4 in 0 : vector<1x18x128xbf16>, vector<16x18x128xbf16>, vector<1x18x128xbf16> -> vector<18x18x128xbf16>
    %6 = vector.extract_strided_slice %5 {offsets = [0, 0, 0], sizes = [18, 16, 128], strides = [1, 1, 1]} : vector<18x18x128xbf16> to vector<18x16x128xbf16>
    %7 = vector.extract_strided_slice %5 {offsets = [0, 1, 0], sizes = [18, 16, 128], strides = [1, 1, 1]} : vector<18x18x128xbf16> to vector<18x16x128xbf16>
    %8 = vector.extract_strided_slice %5 {offsets = [0, 2, 0], sizes = [18, 16, 128], strides = [1, 1, 1]} : vector<18x18x128xbf16> to vector<18x16x128xbf16>
    %9 = tpu.concatenate %6, %7, %8 in 2 : vector<18x16x128xbf16>, vector<18x16x128xbf16>, vector<18x16x128xbf16> -> vector<18x16x384xbf16>
    %cst_4 = arith.constant 0.000000e+00 : f32
    %10 = vector.broadcast %cst_4 : f32 to vector<256x128xf32>
    %11 = vector.extract_strided_slice %9 {offsets = [0, 0, 0], sizes = [16, 16, 384], strides = [1, 1, 1]} : vector<18x16x384xbf16> to vector<16x16x384xbf16>
    %12 = vector.shape_cast %11 : vector<16x16x384xbf16> to vector<256x384xbf16>
    %c0_5 = arith.constant 0 : index
    %c0_6 = arith.constant 0 : index
    %c0_7 = arith.constant 0 : index
    %13 = vector.load %arg2[%c0_5, %c0_6, %c0_7] : memref<3x384x128xbf16, #tpu.memory_space<vmem>>, vector<1x384x128xbf16>
    %14 = vector.shape_cast %13 : vector<1x384x128xbf16> to vector<384x128xbf16>
    %cst_8 = arith.constant dense<0.000000e+00> : vector<256x128xf32>
    %15 = tpu.matmul %12, %14, %cst_8 {dimension_numbers = #tpu.dot_dimension_numbers<[1], [0], [0], [1], [0, 0, 1, 1], [], []>} : vector<256x384xbf16>, vector<384x128xbf16>, vector<256x128xf32> -> vector<256x128xf32>
    %16 = arith.addf %10, %15 : vector<256x128xf32>
    %17 = vector.extract_strided_slice %9 {offsets = [1, 0, 0], sizes = [16, 16, 384], strides = [1, 1, 1]} : vector<18x16x384xbf16> to vector<16x16x384xbf16>
    %18 = vector.shape_cast %17 : vector<16x16x384xbf16> to vector<256x384xbf16>
    %c1 = arith.constant 1 : index
    %c0_9 = arith.constant 0 : index
    %c0_10 = arith.constant 0 : index
    %19 = vector.load %arg2[%c1, %c0_9, %c0_10] : memref<3x384x128xbf16, #tpu.memory_space<vmem>>, vector<1x384x128xbf16>
    %20 = vector.shape_cast %19 : vector<1x384x128xbf16> to vector<384x128xbf16>
    %cst_11 = arith.constant dense<0.000000e+00> : vector<256x128xf32>
    %21 = tpu.matmul %18, %20, %cst_11 {dimension_numbers = #tpu.dot_dimension_numbers<[1], [0], [0], [1], [0, 0, 1, 1], [], []>} : vector<256x384xbf16>, vector<384x128xbf16>, vector<256x128xf32> -> vector<256x128xf32>
    %22 = arith.addf %16, %21 : vector<256x128xf32>
    %23 = vector.extract_strided_slice %9 {offsets = [2, 0, 0], sizes = [16, 16, 384], strides = [1, 1, 1]} : vector<18x16x384xbf16> to vector<16x16x384xbf16>
    %24 = vector.shape_cast %23 : vector<16x16x384xbf16> to vector<256x384xbf16>
    %c2 = arith.constant 2 : index
    %c0_12 = arith.constant 0 : index
    %c0_13 = arith.constant 0 : index
    %25 = vector.load %arg2[%c2, %c0_12, %c0_13] : memref<3x384x128xbf16, #tpu.memory_space<vmem>>, vector<1x384x128xbf16>
    %26 = vector.shape_cast %25 : vector<1x384x128xbf16> to vector<384x128xbf16>
    %cst_14 = arith.constant dense<0.000000e+00> : vector<256x128xf32>
    %27 = tpu.matmul %24, %26, %cst_14 {dimension_numbers = #tpu.dot_dimension_numbers<[1], [0], [0], [1], [0, 0, 1, 1], [], []>} : vector<256x384xbf16>, vector<384x128xbf16>, vector<256x128xf32> -> vector<256x128xf32>
    %28 = arith.addf %22, %27 : vector<256x128xf32>
    %29 = vector.shape_cast %28 : vector<256x128xf32> to vector<16x16x128xf32>
    %30 = arith.truncf %29 : vector<16x16x128xf32> to vector<16x16x128xbf16>
    %c0_15 = arith.constant 0 : index
    %c0_16 = arith.constant 0 : index
    %c0_17 = arith.constant 0 : index
    %c0_18 = arith.constant 0 : index
    %31 = vector.load %arg3[%c0_15, %c0_16, %c0_17, %c0_18] : memref<1x16x16x128xbf16, #tpu.memory_space<vmem>>, vector<1x16x16x128xbf16>
    %32 = vector.shape_cast %31 : vector<1x16x16x128xbf16> to vector<16x16x128xbf16>
    %33 = vector.shape_cast %30 : vector<16x16x128xbf16> to vector<1x16x16x128xbf16>
    tpu.vector_store %arg3[%c0_15, %c0_16, %c0_17, %c0_18], %33 {strides = array<i32>} : memref<1x16x16x128xbf16, #tpu.memory_space<vmem>>, vector<1x16x16x128xbf16>,
    %cst_19 = arith.constant dense<0.000000e+00> : vector<128xf32>
    %34 = vector.multi_reduction <add>, %28, %cst_19 [0] : vector<256x128xf32> to vector<128xf32>
    %35 = vector.shape_cast %34 : vector<128xf32> to vector<1x128xf32>
    %36 = arith.mulf %28, %28 : vector<256x128xf32>
    %cst_20 = arith.constant dense<0.000000e+00> : vector<128xf32>
    %37 = vector.multi_reduction <add>, %36, %cst_20 [0] : vector<256x128xf32> to vector<128xf32>
    %38 = vector.shape_cast %37 : vector<128xf32> to vector<1x128xf32>
    %39 = tpu.concatenate %35, %38 in 0 : vector<1x128xf32>, vector<1x128xf32> -> vector<2x128xf32>
    %c0_21 = arith.constant 0 : index
    %c0_22 = arith.constant 0 : index
    %c0_23 = arith.constant 0 : index
    %40 = vector.load %arg4[%c0_21, %c0_22, %c0_23] : memref<1x2x128xf32, #tpu.memory_space<vmem>>, vector<1x2x128xf32>
    %41 = vector.shape_cast %40 : vector<1x2x128xf32> to vector<2x128xf32>
    %42 = vector.shape_cast %39 : vector<2x128xf32> to vector<1x2x128xf32>
    tpu.vector_store %arg4[%c0_21, %c0_22, %c0_23], %42 {strides = array<i32>} : memref<1x2x128xf32, #tpu.memory_space<vmem>>, vector<1x2x128xf32>,
    return
  }
  func.func @transform_0(%arg0: i32) -> (i32, i32, i32, i32) {
    %c0_i32 = arith.constant 0 : i32
    %c0_i32_0 = arith.constant 0 : i32
    %c0_i32_1 = arith.constant 0 : i32
    %c0_i32_2 = arith.constant 0 : i32
    return %arg0, %c0_i32, %c0_i32_0, %c0_i32_1 : i32, i32, i32, i32
  }
  func.func @transform_1(%arg0: i32) -> (i32, i32, i32) {
    %c0_i32 = arith.constant 0 : i32
    %c0_i32_0 = arith.constant 0 : i32
    %c0_i32_1 = arith.constant 0 : i32
    %c0_i32_2 = arith.constant 0 : i32
    return %c0_i32, %c0_i32_0, %c0_i32_1 : i32, i32, i32
  }
  func.func @transform_2(%arg0: i32) -> (i32, i32, i32, i32) {
    %c0_i32 = arith.constant 0 : i32
    %c0_i32_0 = arith.constant 0 : i32
    %c0_i32_1 = arith.constant 0 : i32
    %c0_i32_2 = arith.constant 0 : i32
    return %arg0, %c0_i32, %c0_i32_0, %c0_i32_1 : i32, i32, i32, i32
  }
  func.func @transform_3(%arg0: i32) -> (i32, i32, i32) {
    %c0_i32 = arith.constant 0 : i32
    %c0_i32_0 = arith.constant 0 : i32
    %c0_i32_1 = arith.constant 0 : i32
    return %arg0, %c0_i32, %c0_i32_0 : i32, i32, i32
  }
}

module attributes {stable_mosaic.version = 11 : i64} {
  func.func @bnrelu_conv3x3_stats_kernel(%arg0: i32, %arg1: memref<1x16x16x128xbf16, #tpu.memory_space<vmem>>, %arg2: memref<1x128xf32, #tpu.memory_space<vmem>>, %arg3: memref<1x128xf32, #tpu.memory_space<vmem>>, %arg4: memref<3x384x128xbf16, #tpu.memory_space<vmem>>, %arg5: memref<1x16x16x128xbf16, #tpu.memory_space<vmem>>, %arg6: memref<1x2x128xf32, #tpu.memory_space<vmem>>) attributes {dimension_semantics = [#tpu.dimension_semantics<parallel>], iteration_bounds = array<i64: 2>, scalar_prefetch = 0 : i64, scratch_operands = 0 : i64, tpu.core_type = #tpu.core_type<tc>, window_params = [{transform_indices = @transform_0, window_bounds = array<i64: 1, 16, 16, 128>}, {pipeline_mode = #tpu.pipeline_mode<synchronous>, transform_indices = @transform_1, window_bounds = array<i64: 1, 128>}, {pipeline_mode = #tpu.pipeline_mode<synchronous>, transform_indices = @transform_2, window_bounds = array<i64: 1, 128>}, {pipeline_mode = #tpu.pipeline_mode<synchronous>, transform_indices = @transform_3, window_bounds = array<i64: 3, 384, 128>}, {transform_indices = @transform_4, window_bounds = array<i64: 1, 16, 16, 128>}, {transform_indices = @transform_5, window_bounds = array<i64: 1, 2, 128>}]} {
    %c0 = arith.constant 0 : index
    %c0_0 = arith.constant 0 : index
    %0 = vector.load %arg2[%c0, %c0_0] : memref<1x128xf32, #tpu.memory_space<vmem>>, vector<1x128xf32>
    %1 = vector.shape_cast %0 : vector<1x128xf32> to vector<1x1x128xf32>
    %c0_1 = arith.constant 0 : index
    %c0_2 = arith.constant 0 : index
    %2 = vector.load %arg3[%c0_1, %c0_2] : memref<1x128xf32, #tpu.memory_space<vmem>>, vector<1x128xf32>
    %3 = vector.shape_cast %2 : vector<1x128xf32> to vector<1x1x128xf32>
    %c0_3 = arith.constant 0 : index
    %c0_4 = arith.constant 0 : index
    %c0_5 = arith.constant 0 : index
    %c0_6 = arith.constant 0 : index
    %4 = vector.load %arg1[%c0_3, %c0_4, %c0_5, %c0_6] : memref<1x16x16x128xbf16, #tpu.memory_space<vmem>>, vector<1x16x16x128xbf16>
    %5 = vector.shape_cast %4 : vector<1x16x16x128xbf16> to vector<16x16x128xbf16>
    %6 = arith.extf %5 : vector<16x16x128xbf16> to vector<16x16x128xf32>
    %7 = vector.broadcast %1 : vector<1x1x128xf32> to vector<16x16x128xf32>
    %8 = arith.mulf %6, %7 : vector<16x16x128xf32>
    %9 = vector.broadcast %3 : vector<1x1x128xf32> to vector<16x16x128xf32>
    %10 = arith.addf %8, %9 : vector<16x16x128xf32>
    %cst = arith.constant 0.000000e+00 : f32
    %11 = vector.broadcast %cst : f32 to vector<16x16x128xf32>
    %12 = arith.maximumf %10, %11 : vector<16x16x128xf32>
    %13 = arith.truncf %12 : vector<16x16x128xf32> to vector<16x16x128xbf16>
    %cst_7 = arith.constant 0.000000e+00 : bf16
    %14 = vector.broadcast %cst_7 : bf16 to vector<16x1x128xbf16>
    %15 = tpu.concatenate %14, %13, %14 in 1 : vector<16x1x128xbf16>, vector<16x16x128xbf16>, vector<16x1x128xbf16> -> vector<16x18x128xbf16>
    %cst_8 = arith.constant 0.000000e+00 : bf16
    %16 = vector.broadcast %cst_8 : bf16 to vector<1x18x128xbf16>
    %17 = tpu.concatenate %16, %15, %16 in 0 : vector<1x18x128xbf16>, vector<16x18x128xbf16>, vector<1x18x128xbf16> -> vector<18x18x128xbf16>
    %18 = vector.extract_strided_slice %17 {offsets = [0, 0, 0], sizes = [18, 16, 128], strides = [1, 1, 1]} : vector<18x18x128xbf16> to vector<18x16x128xbf16>
    %19 = vector.extract_strided_slice %17 {offsets = [0, 1, 0], sizes = [18, 16, 128], strides = [1, 1, 1]} : vector<18x18x128xbf16> to vector<18x16x128xbf16>
    %20 = vector.extract_strided_slice %17 {offsets = [0, 2, 0], sizes = [18, 16, 128], strides = [1, 1, 1]} : vector<18x18x128xbf16> to vector<18x16x128xbf16>
    %21 = tpu.concatenate %18, %19, %20 in 2 : vector<18x16x128xbf16>, vector<18x16x128xbf16>, vector<18x16x128xbf16> -> vector<18x16x384xbf16>
    %cst_9 = arith.constant 0.000000e+00 : f32
    %22 = vector.broadcast %cst_9 : f32 to vector<256x128xf32>
    %23 = vector.extract_strided_slice %21 {offsets = [0, 0, 0], sizes = [16, 16, 384], strides = [1, 1, 1]} : vector<18x16x384xbf16> to vector<16x16x384xbf16>
    %24 = vector.shape_cast %23 : vector<16x16x384xbf16> to vector<256x384xbf16>
    %c0_10 = arith.constant 0 : index
    %c0_11 = arith.constant 0 : index
    %c0_12 = arith.constant 0 : index
    %25 = vector.load %arg4[%c0_10, %c0_11, %c0_12] : memref<3x384x128xbf16, #tpu.memory_space<vmem>>, vector<1x384x128xbf16>
    %26 = vector.shape_cast %25 : vector<1x384x128xbf16> to vector<384x128xbf16>
    %cst_13 = arith.constant dense<0.000000e+00> : vector<256x128xf32>
    %27 = tpu.matmul %24, %26, %cst_13 {dimension_numbers = #tpu.dot_dimension_numbers<[1], [0], [0], [1], [0, 0, 1, 1], [], []>} : vector<256x384xbf16>, vector<384x128xbf16>, vector<256x128xf32> -> vector<256x128xf32>
    %28 = arith.addf %22, %27 : vector<256x128xf32>
    %29 = vector.extract_strided_slice %21 {offsets = [1, 0, 0], sizes = [16, 16, 384], strides = [1, 1, 1]} : vector<18x16x384xbf16> to vector<16x16x384xbf16>
    %30 = vector.shape_cast %29 : vector<16x16x384xbf16> to vector<256x384xbf16>
    %c1 = arith.constant 1 : index
    %c0_14 = arith.constant 0 : index
    %c0_15 = arith.constant 0 : index
    %31 = vector.load %arg4[%c1, %c0_14, %c0_15] : memref<3x384x128xbf16, #tpu.memory_space<vmem>>, vector<1x384x128xbf16>
    %32 = vector.shape_cast %31 : vector<1x384x128xbf16> to vector<384x128xbf16>
    %cst_16 = arith.constant dense<0.000000e+00> : vector<256x128xf32>
    %33 = tpu.matmul %30, %32, %cst_16 {dimension_numbers = #tpu.dot_dimension_numbers<[1], [0], [0], [1], [0, 0, 1, 1], [], []>} : vector<256x384xbf16>, vector<384x128xbf16>, vector<256x128xf32> -> vector<256x128xf32>
    %34 = arith.addf %28, %33 : vector<256x128xf32>
    %35 = vector.extract_strided_slice %21 {offsets = [2, 0, 0], sizes = [16, 16, 384], strides = [1, 1, 1]} : vector<18x16x384xbf16> to vector<16x16x384xbf16>
    %36 = vector.shape_cast %35 : vector<16x16x384xbf16> to vector<256x384xbf16>
    %c2 = arith.constant 2 : index
    %c0_17 = arith.constant 0 : index
    %c0_18 = arith.constant 0 : index
    %37 = vector.load %arg4[%c2, %c0_17, %c0_18] : memref<3x384x128xbf16, #tpu.memory_space<vmem>>, vector<1x384x128xbf16>
    %38 = vector.shape_cast %37 : vector<1x384x128xbf16> to vector<384x128xbf16>
    %cst_19 = arith.constant dense<0.000000e+00> : vector<256x128xf32>
    %39 = tpu.matmul %36, %38, %cst_19 {dimension_numbers = #tpu.dot_dimension_numbers<[1], [0], [0], [1], [0, 0, 1, 1], [], []>} : vector<256x384xbf16>, vector<384x128xbf16>, vector<256x128xf32> -> vector<256x128xf32>
    %40 = arith.addf %34, %39 : vector<256x128xf32>
    %41 = vector.shape_cast %40 : vector<256x128xf32> to vector<16x16x128xf32>
    %42 = arith.truncf %41 : vector<16x16x128xf32> to vector<16x16x128xbf16>
    %c0_20 = arith.constant 0 : index
    %c0_21 = arith.constant 0 : index
    %c0_22 = arith.constant 0 : index
    %c0_23 = arith.constant 0 : index
    %43 = vector.load %arg5[%c0_20, %c0_21, %c0_22, %c0_23] : memref<1x16x16x128xbf16, #tpu.memory_space<vmem>>, vector<1x16x16x128xbf16>
    %44 = vector.shape_cast %43 : vector<1x16x16x128xbf16> to vector<16x16x128xbf16>
    %45 = vector.shape_cast %42 : vector<16x16x128xbf16> to vector<1x16x16x128xbf16>
    tpu.vector_store %arg5[%c0_20, %c0_21, %c0_22, %c0_23], %45 {strides = array<i32>} : memref<1x16x16x128xbf16, #tpu.memory_space<vmem>>, vector<1x16x16x128xbf16>,
    %cst_24 = arith.constant dense<0.000000e+00> : vector<128xf32>
    %46 = vector.multi_reduction <add>, %40, %cst_24 [0] : vector<256x128xf32> to vector<128xf32>
    %47 = vector.shape_cast %46 : vector<128xf32> to vector<1x128xf32>
    %48 = arith.mulf %40, %40 : vector<256x128xf32>
    %cst_25 = arith.constant dense<0.000000e+00> : vector<128xf32>
    %49 = vector.multi_reduction <add>, %48, %cst_25 [0] : vector<256x128xf32> to vector<128xf32>
    %50 = vector.shape_cast %49 : vector<128xf32> to vector<1x128xf32>
    %51 = tpu.concatenate %47, %50 in 0 : vector<1x128xf32>, vector<1x128xf32> -> vector<2x128xf32>
    %c0_26 = arith.constant 0 : index
    %c0_27 = arith.constant 0 : index
    %c0_28 = arith.constant 0 : index
    %52 = vector.load %arg6[%c0_26, %c0_27, %c0_28] : memref<1x2x128xf32, #tpu.memory_space<vmem>>, vector<1x2x128xf32>
    %53 = vector.shape_cast %52 : vector<1x2x128xf32> to vector<2x128xf32>
    %54 = vector.shape_cast %51 : vector<2x128xf32> to vector<1x2x128xf32>
    tpu.vector_store %arg6[%c0_26, %c0_27, %c0_28], %54 {strides = array<i32>} : memref<1x2x128xf32, #tpu.memory_space<vmem>>, vector<1x2x128xf32>,
    return
  }
  func.func @transform_0(%arg0: i32) -> (i32, i32, i32, i32) {
    %c0_i32 = arith.constant 0 : i32
    %c0_i32_0 = arith.constant 0 : i32
    %c0_i32_1 = arith.constant 0 : i32
    %c0_i32_2 = arith.constant 0 : i32
    return %arg0, %c0_i32, %c0_i32_0, %c0_i32_1 : i32, i32, i32, i32
  }
  func.func @transform_1(%arg0: i32) -> (i32, i32) {
    %c0_i32 = arith.constant 0 : i32
    %c0_i32_0 = arith.constant 0 : i32
    %c0_i32_1 = arith.constant 0 : i32
    return %c0_i32, %c0_i32_0 : i32, i32
  }
  func.func @transform_2(%arg0: i32) -> (i32, i32) {
    %c0_i32 = arith.constant 0 : i32
    %c0_i32_0 = arith.constant 0 : i32
    %c0_i32_1 = arith.constant 0 : i32
    return %c0_i32, %c0_i32_0 : i32, i32
  }
  func.func @transform_3(%arg0: i32) -> (i32, i32, i32) {
    %c0_i32 = arith.constant 0 : i32
    %c0_i32_0 = arith.constant 0 : i32
    %c0_i32_1 = arith.constant 0 : i32
    %c0_i32_2 = arith.constant 0 : i32
    return %c0_i32, %c0_i32_0, %c0_i32_1 : i32, i32, i32
  }
  func.func @transform_4(%arg0: i32) -> (i32, i32, i32, i32) {
    %c0_i32 = arith.constant 0 : i32
    %c0_i32_0 = arith.constant 0 : i32
    %c0_i32_1 = arith.constant 0 : i32
    %c0_i32_2 = arith.constant 0 : i32
    return %arg0, %c0_i32, %c0_i32_0, %c0_i32_1 : i32, i32, i32, i32
  }
  func.func @transform_5(%arg0: i32) -> (i32, i32, i32) {
    %c0_i32 = arith.constant 0 : i32
    %c0_i32_0 = arith.constant 0 : i32
    %c0_i32_1 = arith.constant 0 : i32
    return %arg0, %c0_i32, %c0_i32_0 : i32, i32, i32
  }
}

module attributes {stable_mosaic.version = 11 : i64} {
  func.func @bn_relu_add_relu_kernel(%arg0: i32, %arg1: memref<1x16x16x128xbf16, #tpu.memory_space<vmem>>, %arg2: memref<1x128xf32, #tpu.memory_space<vmem>>, %arg3: memref<1x128xf32, #tpu.memory_space<vmem>>, %arg4: memref<1x16x16x128xbf16, #tpu.memory_space<vmem>>, %arg5: memref<1x16x16x128xf32, #tpu.memory_space<vmem>>) attributes {dimension_semantics = [#tpu.dimension_semantics<parallel>], iteration_bounds = array<i64: 2>, scalar_prefetch = 0 : i64, scratch_operands = 0 : i64, tpu.core_type = #tpu.core_type<tc>, window_params = [{transform_indices = @transform_0, window_bounds = array<i64: 1, 16, 16, 128>}, {pipeline_mode = #tpu.pipeline_mode<synchronous>, transform_indices = @transform_1, window_bounds = array<i64: 1, 128>}, {pipeline_mode = #tpu.pipeline_mode<synchronous>, transform_indices = @transform_2, window_bounds = array<i64: 1, 128>}, {transform_indices = @transform_3, window_bounds = array<i64: 1, 16, 16, 128>}, {transform_indices = @transform_4, window_bounds = array<i64: 1, 16, 16, 128>}]} {
    %c0 = arith.constant 0 : index
    %c0_0 = arith.constant 0 : index
    %0 = vector.load %arg2[%c0, %c0_0] : memref<1x128xf32, #tpu.memory_space<vmem>>, vector<1x128xf32>
    %1 = vector.shape_cast %0 : vector<1x128xf32> to vector<1x1x128xf32>
    %c0_1 = arith.constant 0 : index
    %c0_2 = arith.constant 0 : index
    %2 = vector.load %arg3[%c0_1, %c0_2] : memref<1x128xf32, #tpu.memory_space<vmem>>, vector<1x128xf32>
    %3 = vector.shape_cast %2 : vector<1x128xf32> to vector<1x1x128xf32>
    %c0_3 = arith.constant 0 : index
    %c0_4 = arith.constant 0 : index
    %c0_5 = arith.constant 0 : index
    %c0_6 = arith.constant 0 : index
    %4 = vector.load %arg1[%c0_3, %c0_4, %c0_5, %c0_6] : memref<1x16x16x128xbf16, #tpu.memory_space<vmem>>, vector<1x16x16x128xbf16>
    %5 = vector.shape_cast %4 : vector<1x16x16x128xbf16> to vector<16x16x128xbf16>
    %6 = arith.extf %5 : vector<16x16x128xbf16> to vector<16x16x128xf32>
    %7 = vector.broadcast %1 : vector<1x1x128xf32> to vector<16x16x128xf32>
    %8 = arith.mulf %6, %7 : vector<16x16x128xf32>
    %9 = vector.broadcast %3 : vector<1x1x128xf32> to vector<16x16x128xf32>
    %10 = arith.addf %8, %9 : vector<16x16x128xf32>
    %cst = arith.constant 0.000000e+00 : f32
    %11 = vector.broadcast %cst : f32 to vector<16x16x128xf32>
    %12 = arith.maximumf %10, %11 : vector<16x16x128xf32>
    %c0_7 = arith.constant 0 : index
    %c0_8 = arith.constant 0 : index
    %c0_9 = arith.constant 0 : index
    %c0_10 = arith.constant 0 : index
    %13 = vector.load %arg4[%c0_7, %c0_8, %c0_9, %c0_10] : memref<1x16x16x128xbf16, #tpu.memory_space<vmem>>, vector<1x16x16x128xbf16>
    %14 = vector.shape_cast %13 : vector<1x16x16x128xbf16> to vector<16x16x128xbf16>
    %15 = arith.extf %14 : vector<16x16x128xbf16> to vector<16x16x128xf32>
    %16 = arith.addf %12, %15 : vector<16x16x128xf32>
    %cst_11 = arith.constant 0.000000e+00 : f32
    %17 = vector.broadcast %cst_11 : f32 to vector<16x16x128xf32>
    %18 = arith.maximumf %16, %17 : vector<16x16x128xf32>
    %c0_12 = arith.constant 0 : index
    %c0_13 = arith.constant 0 : index
    %c0_14 = arith.constant 0 : index
    %c0_15 = arith.constant 0 : index
    %19 = vector.load %arg5[%c0_12, %c0_13, %c0_14, %c0_15] : memref<1x16x16x128xf32, #tpu.memory_space<vmem>>, vector<1x16x16x128xf32>
    %20 = vector.shape_cast %19 : vector<1x16x16x128xf32> to vector<16x16x128xf32>
    %21 = vector.shape_cast %18 : vector<16x16x128xf32> to vector<1x16x16x128xf32>
    tpu.vector_store %arg5[%c0_12, %c0_13, %c0_14, %c0_15], %21 {strides = array<i32>} : memref<1x16x16x128xf32, #tpu.memory_space<vmem>>, vector<1x16x16x128xf32>,
    return
  }
  func.func @transform_0(%arg0: i32) -> (i32, i32, i32, i32) {
    %c0_i32 = arith.constant 0 : i32
    %c0_i32_0 = arith.constant 0 : i32
    %c0_i32_1 = arith.constant 0 : i32
    %c0_i32_2 = arith.constant 0 : i32
    return %arg0, %c0_i32, %c0_i32_0, %c0_i32_1 : i32, i32, i32, i32
  }
  func.func @transform_1(%arg0: i32) -> (i32, i32) {
    %c0_i32 = arith.constant 0 : i32
    %c0_i32_0 = arith.constant 0 : i32
    %c0_i32_1 = arith.constant 0 : i32
    return %c0_i32, %c0_i32_0 : i32, i32
  }
  func.func @transform_2(%arg0: i32) -> (i32, i32) {
    %c0_i32 = arith.constant 0 : i32
    %c0_i32_0 = arith.constant 0 : i32
    %c0_i32_1 = arith.constant 0 : i32
    return %c0_i32, %c0_i32_0 : i32, i32
  }
  func.func @transform_3(%arg0: i32) -> (i32, i32, i32, i32) {
    %c0_i32 = arith.constant 0 : i32
    %c0_i32_0 = arith.constant 0 : i32
    %c0_i32_1 = arith.constant 0 : i32
    %c0_i32_2 = arith.constant 0 : i32
    return %arg0, %c0_i32, %c0_i32_0, %c0_i32_1 : i32, i32, i32, i32
  }
  func.func @transform_4(%arg0: i32) -> (i32, i32, i32, i32) {
    %c0_i32 = arith.constant 0 : i32
    %c0_i32_0 = arith.constant 0 : i32
    %c0_i32_1 = arith.constant 0 : i32
    %c0_i32_2 = arith.constant 0 : i32
    return %arg0, %c0_i32, %c0_i32_0, %c0_i32_1 : i32, i32, i32, i32
  }
}

</mosaic_0001>

<bundles_post_ra>
// kernel: basic_block_forward.5
= control target key start
LH: loop header
LB: loop body
LE: loop exit
PB: predicated region body
PF: predicated region fallthrough
CT: control target
= control target key end

     0   :  { %s836_s15 = smov 0   ;;  %s1012_s0 = inlined_call_operand.vmem [shape: bf16[2,16,16,128], index: 0, kind: input, shape index: {}]   ;;  %s1013_s1 = inlined_call_operand.vmem [shape: f32[1,128], index: 1, kind: input, shape index: {}]   ;;  %s1014_s2 = inlined_call_operand.vmem [shape: f32[1,128], index: 2, kind: input, shape index: {}]   ;;  %s1015_s3 = inlined_call_operand.vmem [shape: bf16[2,16,16,128], index: 3, kind: input, shape index: {}]   ;;  %s1016_s4 = inlined_call_operand.vmem [shape: f32[2,16,16,128], index: 4, kind: output, shape index: {}]  }
   0x1 LB: > { %s619_s16 = sadd.s32 4294967295, %s809_s15   ;;  %p623_p0 = scmp.ge.s32.totalorder %s809_s15, 1  ;;  %s809_s15 = sphi %s836_s15, %s14_s15  }
   0x2   : > { %p172_p1 = scmp.lt.s32.totalorder %s809_s15, 3 }
   0x4   : > { %p173_p2 = pnand %p623_p0, %p172_p1 }
   0x5   : > { %p203_p3 = scmp.lt.s32.totalorder (!%p173_p2), %s619_s16, 1 }
   0x6   : > { %176 = sbr.rel (%p173_p2) target bundleno = 78 (0x4e), region = 36 }
   0xb   : > { %s1018_s16 = smov (!%p203_p3, %s619_s16), 1  ;;  %v860_v0 = vld [vmem:[%s1013_s1] ss:$0 sm:$0xff] }
   0xc   : > { %s634_s17 = sshll.u32 %s1018_s16, 7  ;;  %v871_v11 = vld [vmem:[%s1014_s2] ss:$0 sm:$0xff]  ;;  %s636_s28 = sshll.u32 %s1018_s16, 8 }
   0xd   : > { %s850_s20 = scalar_lea.vmem %s1012_s0, %s634_s17  ;;  %s855_s23 = scalar_lea.vmem %s1015_s3, %s634_s17 }
   0xe   : > { %v638_v1 = vld [vmem:[%s850_s20] sm:$0xff]   ;;  %v765_v3 = vld [vmem:[%s850_s20 + $0x8] sm:$0xff]   ;;  %v766_v9 = vld [vmem:[%s850_s20 + $0x10] sm:$0xff]   ;;  %s896_s5 = scalar_lea.vmem %s1016_s4, %s636_s28 }
   0xf   : > { %v702_v2 = vld [vmem:[%s855_s23] sm:$0xff]   ;;  %v639_v4 = vunpack.c.l.bf16 %v638_v1  ;;  %v640_v6 = vunpack.c.h.bf16 %v638_v1  ;;  %v780_v8 = vld [vmem:[%s855_s23 + $0x8] sm:$0xff]   ;;  %v781_v10 = vld [vmem:[%s855_s23 + $0x10] sm:$0xff]   ;;  %v643_v12 = vunpack.c.l.bf16 %v765_v3  ;;  %v644_v14 = vunpack.c.h.bf16 %v765_v3 }
  0x10   : > { %v703_v5 = vunpack.c.l.bf16 %v702_v2  ;;  %v704_v7 = vunpack.c.h.bf16 %v702_v2  ;;  %v707_v13 = vunpack.c.l.bf16 %v780_v8  ;;  %v708_v15 = vunpack.c.h.bf16 %v780_v8  ;;  %v767_v16 = vld [vmem:[%s850_s20 + $0x18] sm:$0xff]   ;;  %v768_v50 = vld [vmem:[%s850_s20 + $0x20] sm:$0xff]   ;;  %v769_v60 = vld [vmem:[%s850_s20 + $0x28] sm:$0xff]  }
  0x11   : > { %v290_v17 = vmul.f32 %v639_v4, %v860_v0  ;;  %v291_v18 = vmul.f32 %v640_v6, %v860_v0  ;;  %v647_v19 = vunpack.c.l.bf16 %v766_v9  ;;  %v711_v20 = vunpack.c.l.bf16 %v781_v10  ;;  %v877_v21 = vld [vmem:[%s855_s23 + $0x18] sm:$0xff]   ;;  %v783_v55 = vld [vmem:[%s855_s23 + $0x20] sm:$0xff]   ;;  %v784_v2 = vld [vmem:[%s855_s23 + $0x28] sm:$0xff]  }
  0x12   : > { %v292_v22 = vmul.f32 %v643_v12, %v860_v0  ;;  %v293_v23 = vmul.f32 %v644_v14, %v860_v0  ;;  %v648_v24 = vunpack.c.h.bf16 %v766_v9  ;;  %v712_v25 = vunpack.c.h.bf16 %v781_v10 }
  0x13   : > { %v328_v26 = vadd.f32 %v871_v11, %v290_v17  ;;  %v329_v27 = vadd.f32 %v871_v11, %v291_v18  ;;  %v294_v28 = vmul.f32 %v647_v19, %v860_v0  ;;  %v651_v29 = vunpack.c.l.bf16 %v767_v16 }
  0x14   : > { %v330_v30 = vadd.f32 %v871_v11, %v292_v22  ;;  %v331_v31 = vadd.f32 %v871_v11, %v293_v23  ;;  %v295_v32 = vmul.f32 %v648_v24, %v860_v0  ;;  %v715_v33 = vunpack.c.l.bf16 %v877_v21  ;;  %v771_v22 = vld [vmem:[%s850_s20 + $0x38] sm:$0xff]  }
  0x15   : > { %v360_v34 = vmax.f32 %v328_v26, 0.0  ;;  %v361_v35 = vmax.f32 %v329_v27, 0.0  ;;  %v332_v36 = vadd.f32 %v871_v11, %v294_v28  ;;  %v296_v37 = vmul.f32 %v651_v29, %v860_v0 }
  0x16   : > { %v362_v38 = vmax.f32 %v330_v30, 0.0  ;;  %v363_v39 = vmax.f32 %v331_v31, 0.0  ;;  %v333_v40 = vadd.f32 %v871_v11, %v295_v32  ;;  %v652_v41 = vunpack.c.h.bf16 %v767_v16  ;;  %v924_v31 = vld [vmem:[%s855_s23 + $0x38] sm:$0xff]  }
  0x17   : > { %v456_v42 = vadd.f32 %v703_v5, %v360_v34  ;;  %v457_v43 = vadd.f32 %v704_v7, %v361_v35  ;;  %v364_v44 = vmax.f32 %v332_v36, 0.0  ;;  %v334_v45 = vadd.f32 %v871_v11, %v296_v37  ;;  %v770_v7 = vld [vmem:[%s850_s20 + $0x30] sm:$0xff]  }
  0x18   : > { %v458_v46 = vadd.f32 %v707_v13, %v362_v38  ;;  %v459_v47 = vadd.f32 %v708_v15, %v363_v39  ;;  %v365_v48 = vmax.f32 %v333_v40, 0.0  ;;  %v297_v49 = vmul.f32 %v652_v41, %v860_v0  ;;  %v785_v13 = vld [vmem:[%s855_s23 + $0x30] sm:$0xff]  }
  0x19   : > { %v488_v51 = vmax.f32 %v456_v42, 0.0  ;;  %v489_v52 = vmax.f32 %v457_v43, 0.0  ;;  %v460_v53 = vadd.f32 %v711_v20, %v364_v44  ;;  %v366_v54 = vmax.f32 %v334_v45, 0.0 }
  0x1a   : > { %v490_v56 = vmax.f32 %v458_v46, 0.0  ;;  %v491_v57 = vmax.f32 %v459_v47, 0.0  ;;  %v461_v58 = vadd.f32 %v712_v25, %v365_v48  ;;  %v335_v59 = vadd.f32 %v871_v11, %v297_v49  ;;  %v772_v48 = vld [vmem:[%s850_s20 + $0x40] sm:$0xff]  }
  0x1b   : > { %520 = vst [vmem:[%s896_s5] sm:$0xff] %v488_v51  ;;  %521 = vst [vmem:[%s896_s5 + $0x8] sm:$0xff] %v489_v52  ;;  %v492_v61 = vmax.f32 %v460_v53, 0.0  ;;  %v462_v62 = vadd.f32 %v715_v33, %v366_v54  ;;  %v716_v63 = vunpack.c.h.bf16 %v877_v21  ;;  %v655_v1 = vunpack.c.l.bf16 %v768_v50 }
  0x1c   : > { %522 = vst [vmem:[%s896_s5 + $0x10] sm:$0xff] %v490_v56  ;;  %523 = vst [vmem:[%s896_s5 + $0x18] sm:$0xff] %v491_v57  ;;  %v493_v3 = vmax.f32 %v461_v58, 0.0  ;;  %v367_v4 = vmax.f32 %v335_v59, 0.0  ;;  %v719_v5 = vunpack.c.l.bf16 %v783_v55  ;;  %v656_v6 = vunpack.c.h.bf16 %v768_v50  ;;  %v787_v56 = vld [vmem:[%s855_s23 + $0x40] sm:$0xff]  }
  0x1d   : > { %524 = vst [vmem:[%s896_s5 + $0x20] sm:$0xff] %v492_v61  ;;  %v494_v8 = vmax.f32 %v462_v62, 0.0  ;;  %v298_v9 = vmul.f32 %v655_v1, %v860_v0  ;;  %v720_v10 = vunpack.c.h.bf16 %v783_v55  ;;  %v659_v12 = vunpack.c.l.bf16 %v769_v60  ;;  %v773_v61 = vld [vmem:[%s850_s20 + $0x48] sm:$0xff]  }
  0x1e   : > { %525 = vst [vmem:[%s896_s5 + $0x28] sm:$0xff] %v493_v3  ;;  %v463_v14 = vadd.f32 %v716_v63, %v367_v4  ;;  %v299_v15 = vmul.f32 %v656_v6, %v860_v0  ;;  %v723_v16 = vunpack.c.l.bf16 %v784_v2  ;;  %v660_v17 = vunpack.c.h.bf16 %v769_v60 }
  0x1f   : > { %526 = vst [vmem:[%s896_s5 + $0x30] sm:$0xff] %v494_v8  ;;  %v336_v18 = vadd.f32 %v871_v11, %v298_v9  ;;  %v300_v19 = vmul.f32 %v659_v12, %v860_v0  ;;  %v724_v20 = vunpack.c.h.bf16 %v784_v2  ;;  %v663_v21 = vunpack.c.l.bf16 %v770_v7  ;;  %v774_v8 = vld [vmem:[%s850_s20 + $0x50] sm:$0xff]  }
  0x20   : > { %v495_v23 = vmax.f32 %v463_v14, 0.0  ;;  %v337_v24 = vadd.f32 %v871_v11, %v299_v15  ;;  %v301_v25 = vmul.f32 %v660_v17, %v860_v0  ;;  %v727_v26 = vunpack.c.l.bf16 %v785_v13 }
  0x21   : > { %v368_v27 = vmax.f32 %v336_v18, 0.0  ;;  %v338_v28 = vadd.f32 %v871_v11, %v300_v19  ;;  %v302_v29 = vmul.f32 %v663_v21, %v860_v0  ;;  %v664_v30 = vunpack.c.h.bf16 %v770_v7  ;;  %v788_v7 = vld [vmem:[%s855_s23 + $0x48] sm:$0xff]  }
  0x22   : > { %527 = vst [vmem:[%s896_s5 + $0x38] sm:$0xff] %v495_v23  ;;  %v369_v32 = vmax.f32 %v337_v24, 0.0  ;;  %v339_v33 = vadd.f32 %v871_v11, %v301_v25  ;;  %v728_v34 = vunpack.c.h.bf16 %v785_v13  ;;  %v667_v35 = vunpack.c.l.bf16 %v771_v22 }
  0x23   : > { %v464_v36 = vadd.f32 %v719_v5, %v368_v27  ;;  %v370_v37 = vmax.f32 %v338_v28, 0.0  ;;  %v340_v38 = vadd.f32 %v871_v11, %v302_v29  ;;  %v303_v39 = vmul.f32 %v664_v30, %v860_v0 }
  0x24   : > { %v465_v40 = vadd.f32 %v720_v10, %v369_v32  ;;  %v371_v41 = vmax.f32 %v339_v33, 0.0  ;;  %v304_v42 = vmul.f32 %v667_v35, %v860_v0  ;;  %v731_v43 = vunpack.c.l.bf16 %v924_v31 }
  0x25   : > { %v496_v44 = vmax.f32 %v464_v36, 0.0  ;;  %v466_v45 = vadd.f32 %v723_v16, %v370_v37  ;;  %v372_v46 = vmax.f32 %v340_v38, 0.0  ;;  %v341_v47 = vadd.f32 %v871_v11, %v303_v39 }
  0x26   : > { %v497_v49 = vmax.f32 %v465_v40, 0.0  ;;  %v467_v50 = vadd.f32 %v724_v20, %v371_v41  ;;  %v342_v51 = vadd.f32 %v871_v11, %v304_v42  ;;  %v668_v52 = vunpack.c.h.bf16 %v771_v22  ;;  %v789_v22 = vld [vmem:[%s855_s23 + $0x50] sm:$0xff]   ;;  %v790_v40 = vld [vmem:[%s855_s23 + $0x58] sm:$0xff]  }
  0x27   : > { %528 = vst [vmem:[%s896_s5 + $0x40] sm:$0xff] %v496_v44  ;;  %v498_v53 = vmax.f32 %v466_v45, 0.0  ;;  %v468_v54 = vadd.f32 %v727_v26, %v372_v46  ;;  %v373_v55 = vmax.f32 %v341_v47, 0.0  ;;  %v671_v60 = vunpack.c.l.bf16 %v772_v48  ;;  %v776_v45 = vld [vmem:[%s850_s20 + $0x60] sm:$0xff]  }
  0x28   : > { %529 = vst [vmem:[%s896_s5 + $0x48] sm:$0xff] %v497_v49  ;;  %v499_v57 = vmax.f32 %v467_v50, 0.0  ;;  %v374_v58 = vmax.f32 %v342_v51, 0.0  ;;  %v305_v59 = vmul.f32 %v668_v52, %v860_v0  ;;  %v732_v1 = vunpack.c.h.bf16 %v924_v31  ;;  %v775_v31 = vld [vmem:[%s850_s20 + $0x58] sm:$0xff]  }
  0x29   : > { %530 = vst [vmem:[%s896_s5 + $0x50] sm:$0xff] %v498_v53  ;;  %v500_v62 = vmax.f32 %v468_v54, 0.0  ;;  %v469_v63 = vadd.f32 %v728_v34, %v373_v55  ;;  %v672_v2 = vunpack.c.h.bf16 %v772_v48  ;;  %v306_v5 = vmul.f32 %v671_v60, %v860_v0 }
  0x2a   : > { %531 = vst [vmem:[%s896_s5 + $0x58] sm:$0xff] %v499_v57  ;;  %v470_v3 = vadd.f32 %v731_v43, %v374_v58  ;;  %v343_v4 = vadd.f32 %v871_v11, %v305_v59  ;;  %v735_v6 = vunpack.c.l.bf16 %v787_v56  ;;  %v736_v12 = vunpack.c.h.bf16 %v787_v56  ;;  %v791_v58 = vld [vmem:[%s855_s23 + $0x60] sm:$0xff]   ;;  %v777_v59 = vld [vmem:[%s850_s20 + $0x68] sm:$0xff]  }
  0x2b   : > { %532 = vst [vmem:[%s896_s5 + $0x60] sm:$0xff] %v500_v62  ;;  %v501_v9 = vmax.f32 %v469_v63, 0.0  ;;  %v307_v10 = vmul.f32 %v672_v2, %v860_v0  ;;  %v675_v13 = vunpack.c.l.bf16 %v773_v61  ;;  %v344_v16 = vadd.f32 %v871_v11, %v306_v5 }
  0x2c   : > { %v502_v14 = vmax.f32 %v470_v3, 0.0  ;;  %v375_v15 = vmax.f32 %v343_v4, 0.0  ;;  %v676_v17 = vunpack.c.h.bf16 %v773_v61  ;;  %v739_v20 = vunpack.c.l.bf16 %v788_v7 }
  0x2d   : > { %533 = vst [vmem:[%s896_s5 + $0x68] sm:$0xff] %v501_v9  ;;  %v345_v18 = vadd.f32 %v871_v11, %v307_v10  ;;  %v308_v19 = vmul.f32 %v675_v13, %v860_v0  ;;  %v679_v21 = vunpack.c.l.bf16 %v774_v8  ;;  %v376_v24 = vmax.f32 %v344_v16, 0.0  ;;  %v792_v9 = vld [vmem:[%s855_s23 + $0x68] sm:$0xff]   ;;  %v778_v10 = vld [vmem:[%s850_s20 + $0x70] sm:$0xff]  }
  0x2e   : > { %534 = vst [vmem:[%s896_s5 + $0x70] sm:$0xff] %v502_v14  ;;  %v471_v23 = vadd.f32 %v732_v1, %v375_v15  ;;  %v309_v25 = vmul.f32 %v676_v17, %v860_v0  ;;  %v740_v26 = vunpack.c.h.bf16 %v788_v7  ;;  %v680_v30 = vunpack.c.h.bf16 %v774_v8 }
  0x2f   : > { %v377_v27 = vmax.f32 %v345_v18, 0.0  ;;  %v346_v28 = vadd.f32 %v871_v11, %v308_v19  ;;  %v310_v29 = vmul.f32 %v679_v21, %v860_v0  ;;  %v472_v33 = vadd.f32 %v735_v6, %v376_v24 }
  0x30   : > { %v503_v32 = vmax.f32 %v471_v23, 0.0  ;;  %v347_v34 = vadd.f32 %v871_v11, %v309_v25  ;;  %v743_v35 = vunpack.c.l.bf16 %v789_v22  ;;  %v311_v39 = vmul.f32 %v680_v30, %v860_v0 }
  0x31   : > { %v473_v36 = vadd.f32 %v736_v12, %v377_v27  ;;  %v378_v37 = vmax.f32 %v346_v28, 0.0  ;;  %v348_v38 = vadd.f32 %v871_v11, %v310_v29  ;;  %v504_v41 = vmax.f32 %v472_v33, 0.0  ;;  %v793_v28 = vld [vmem:[%s855_s23 + $0x70] sm:$0xff]   ;;  %v779_v33 = vld [vmem:[%s850_s20 + $0x78] sm:$0xff]  }
  0x32   : > { %535 = vst [vmem:[%s896_s5 + $0x78] sm:$0xff] %v503_v32  ;;  %v379_v42 = vmax.f32 %v347_v34, 0.0  ;;  %v744_v43 = vunpack.c.h.bf16 %v789_v22  ;;  %v683_v44 = vunpack.c.l.bf16 %v775_v31  ;;  %v349_v49 = vadd.f32 %v871_v11, %v311_v39 }
  0x33   : > { %v505_v46 = vmax.f32 %v473_v36, 0.0  ;;  %v474_v47 = vadd.f32 %v739_v20, %v378_v37  ;;  %v380_v48 = vmax.f32 %v348_v38, 0.0  ;;  %536 = vst [vmem:[%s896_s5 + $0x80] sm:$0xff] %v504_v41  ;;  %v747_v52 = vunpack.c.l.bf16 %v790_v40 }
  0x34   : > { %v475_v50 = vadd.f32 %v740_v26, %v379_v42  ;;  %v312_v51 = vmul.f32 %v683_v44, %v860_v0  ;;  %v684_v53 = vunpack.c.h.bf16 %v775_v31  ;;  %v381_v56 = vmax.f32 %v349_v49, 0.0  ;;  %v794_v49 = vld [vmem:[%s855_s23 + $0x78] sm:$0xff]  }
  0x35   : > { %537 = vst [vmem:[%s896_s5 + $0x88] sm:$0xff] %v505_v46  ;;  %v506_v54 = vmax.f32 %v474_v47, 0.0  ;;  %v476_v55 = vadd.f32 %v743_v35, %v380_v48  ;;  %v687_v57 = vunpack.c.l.bf16 %v776_v45  ;;  %v748_v63 = vunpack.c.h.bf16 %v790_v40 }
  0x36   : > { %v507_v60 = vmax.f32 %v475_v50, 0.0  ;;  %v350_v61 = vadd.f32 %v871_v11, %v312_v51  ;;  %v313_v62 = vmul.f32 %v684_v53, %v860_v0  ;;  %v477_v2 = vadd.f32 %v744_v43, %v381_v56 }
  0x37   : > { %538 = vst [vmem:[%s896_s5 + $0x90] sm:$0xff] %v506_v54  ;;  %v508_v1 = vmax.f32 %v476_v55, 0.0  ;;  %v314_v3 = vmul.f32 %v687_v57, %v860_v0  ;;  %v688_v4 = vunpack.c.h.bf16 %v776_v45  ;;  %v751_v7 = vunpack.c.l.bf16 %v791_v58 }
  0x38   : > { %539 = vst [vmem:[%s896_s5 + $0x98] sm:$0xff] %v507_v60  ;;  %v382_v5 = vmax.f32 %v350_v61, 0.0  ;;  %v351_v6 = vadd.f32 %v871_v11, %v313_v62  ;;  %v691_v8 = vunpack.c.l.bf16 %v777_v59  ;;  %v509_v12 = vmax.f32 %v477_v2, 0.0 }
  0x39   : > { %540 = vst [vmem:[%s896_s5 + $0xa0] sm:$0xff] %v508_v1  ;;  %v352_v13 = vadd.f32 %v871_v11, %v314_v3  ;;  %v315_v14 = vmul.f32 %v688_v4, %v860_v0  ;;  %v752_v15 = vunpack.c.h.bf16 %v791_v58  ;;  %v692_v19 = vunpack.c.h.bf16 %v777_v59 }
  0x3a   : > { %v478_v16 = vadd.f32 %v747_v52, %v382_v5  ;;  %v383_v17 = vmax.f32 %v351_v6, 0.0  ;;  %v316_v18 = vmul.f32 %v691_v8, %v860_v0  ;;  %541 = vst [vmem:[%s896_s5 + $0xa8] sm:$0xff] %v509_v12  ;;  %v755_v22 = vunpack.c.l.bf16 %v792_v9 }
  0x3b   : > { %v384_v20 = vmax.f32 %v352_v13, 0.0  ;;  %v353_v21 = vadd.f32 %v871_v11, %v315_v14  ;;  %v695_v23 = vunpack.c.l.bf16 %v778_v10  ;;  %v317_v27 = vmul.f32 %v692_v19, %v860_v0 }
  0x3c   : > { %v510_v24 = vmax.f32 %v478_v16, 0.0  ;;  %v479_v25 = vadd.f32 %v748_v63, %v383_v17  ;;  %v354_v26 = vadd.f32 %v871_v11, %v316_v18  ;;  %v756_v31 = vunpack.c.h.bf16 %v792_v9 }
  0x3d   : > { %v480_v29 = vadd.f32 %v751_v7, %v384_v20  ;;  %v385_v30 = vmax.f32 %v353_v21, 0.0  ;;  %v318_v32 = vmul.f32 %v695_v23, %v860_v0  ;;  %v355_v36 = vadd.f32 %v871_v11, %v317_v27 }
  0x3e   : > { %542 = vst [vmem:[%s896_s5 + $0xb0] sm:$0xff] %v510_v24  ;;  %v511_v34 = vmax.f32 %v479_v25, 0.0  ;;  %v386_v35 = vmax.f32 %v354_v26, 0.0  ;;  %v696_v37 = vunpack.c.h.bf16 %v778_v10  ;;  %v759_v41 = vunpack.c.l.bf16 %v793_v28 }
  0x3f   : > { %v512_v38 = vmax.f32 %v480_v29, 0.0  ;;  %v481_v39 = vadd.f32 %v752_v15, %v385_v30  ;;  %v356_v40 = vadd.f32 %v871_v11, %v318_v32  ;;  %v387_v43 = vmax.f32 %v355_v36, 0.0 }
  0x40   : > { %543 = vst [vmem:[%s896_s5 + $0xb8] sm:$0xff] %v511_v34  ;;  %v482_v42 = vadd.f32 %v755_v22, %v386_v35  ;;  %v319_v44 = vmul.f32 %v696_v37, %v860_v0  ;;  %v699_v45 = vunpack.c.l.bf16 %v779_v33  ;;  %v760_v48 = vunpack.c.h.bf16 %v793_v28 }
  0x41   : > { %544 = vst [vmem:[%s896_s5 + $0xc0] sm:$0xff] %v512_v38  ;;  %v513_v46 = vmax.f32 %v481_v39, 0.0  ;;  %v388_v47 = vmax.f32 %v356_v40, 0.0  ;;  %v700_v50 = vunpack.c.h.bf16 %v779_v33  ;;  %v483_v52 = vadd.f32 %v756_v31, %v387_v43 }
  0x42   : > { %v514_v51 = vmax.f32 %v482_v42, 0.0  ;;  %v357_v53 = vadd.f32 %v871_v11, %v319_v44  ;;  %v320_v54 = vmul.f32 %v699_v45, %v860_v0  ;;  %v763_v60 = vunpack.c.l.bf16 %v794_v49 }
  0x43   : > { %545 = vst [vmem:[%s896_s5 + $0xc8] sm:$0xff] %v513_v46  ;;  %v484_v55 = vadd.f32 %v759_v41, %v388_v47  ;;  %v321_v56 = vmul.f32 %v700_v50, %v860_v0  ;;  %v515_v57 = vmax.f32 %v483_v52, 0.0  ;;  %v764_v63 = vunpack.c.h.bf16 %v794_v49 }
  0x44   : > { %546 = vst [vmem:[%s896_s5 + $0xd0] sm:$0xff] %v514_v51  ;;  %v389_v58 = vmax.f32 %v357_v53, 0.0  ;;  %v358_v59 = vadd.f32 %v871_v11, %v320_v54 }
  0x45   : > { %v516_v61 = vmax.f32 %v484_v55, 0.0  ;;  %v359_v62 = vadd.f32 %v871_v11, %v321_v56  ;;  %547 = vst [vmem:[%s896_s5 + $0xd8] sm:$0xff] %v515_v57 }
  0x46   : > { %v485_v1 = vadd.f32 %v760_v48, %v389_v58  ;;  %v390_v2 = vmax.f32 %v358_v59, 0.0 }
  0x47   : > { %548 = vst [vmem:[%s896_s5 + $0xe0] sm:$0xff] %v516_v61  ;;  %v391_v3 = vmax.f32 %v359_v62, 0.0 }
  0x48   : > { %v517_v4 = vmax.f32 %v485_v1, 0.0  ;;  %v486_v0 = vadd.f32 %v763_v60, %v390_v2 }
  0x49   : > { %v487_v5 = vadd.f32 %v764_v63, %v391_v3 }
  0x4a   : > { %549 = vst [vmem:[%s896_s5 + $0xe8] sm:$0xff] %v517_v4  ;;  %v518_v6 = vmax.f32 %v486_v0, 0.0 }
  0x4b   : > { %v519_v7 = vmax.f32 %v487_v5, 0.0 }
  0x4c   : > { %550 = vst [vmem:[%s896_s5 + $0xf0] sm:$0xff] %v518_v6 }
  0x4d   : > { %551 = vst [vmem:[%s896_s5 + $0xf8] sm:$0xff] %v519_v7 }
  0x4e PF: > { %s14_s15 = sadd.s32 1, %s809_s15  }
  0x4f   : > { %p11_p4 = scmp.ge.s32.totalorder %s14_s15, 4  }
  0x51   :  { %13 = sbr.rel (!%p11_p4) target bundleno = 1 (0x1), region = 69 }

// kernel: basic_block_forward.4
= control target key start
LH: loop header
LB: loop body
LE: loop exit
PB: predicated region body
PF: predicated region fallthrough
CT: control target
= control target key end

     0   :  { %s3968_s18 = smov 0   ;;  %s5197_s0 = inlined_call_operand.vmem [shape: bf16[2,16,16,128], index: 0, kind: input, shape index: {}]   ;;  %s5198_s1 = inlined_call_operand.vmem [shape: f32[1,128], index: 1, kind: input, shape index: {}]   ;;  %s5199_s2 = inlined_call_operand.vmem [shape: f32[1,128], index: 2, kind: input, shape index: {}]   ;;  %s5200_s3 = inlined_call_operand.vmem [shape: bf16[3,384,128], index: 3, kind: input, shape index: {}]   ;;  %s5201_s4 = inlined_call_operand.vmem [shape: bf16[2,16,16,128], index: 4, kind: output, shape index: {0}]   ;;  %s5202_s5 = inlined_call_operand.vmem [shape: f32[2,2,128], index: 5, kind: output, shape index: {1}]  }
   0x1 LB: > { %s2856_s19 = sadd.s32 4294967295, %s3935_s18   ;;  %p2860_p0 = scmp.ge.s32.totalorder %s3935_s18, 1  ;;  %s3935_s18 = sphi %s3968_s18, %s16_s18  }
   0x2   : > { %p190_p1 = scmp.lt.s32.totalorder %s3935_s18, 3 }
   0x4   : > { %p191_p2 = pnand %p2860_p0, %p190_p1 }
   0x6   : > { %194 = sbr.rel (%p191_p2) target bundleno = 558 (0x22e), region = 36 }
   0xb   : > { %v3855_v0 = vld [vmem:[%s5200_s3 + $0x138] sm:$0xff]   ;;  %v3857_v2 = vld [vmem:[%s5200_s3 + $0x130] sm:$0xff]   ;;  %p222_p3 = scmp.lt.s32.totalorder %s2856_s19, 1  ;;  %v3859_v4 = vld [vmem:[%s5200_s3 + $0x128] sm:$0xff]   ;;  %vm571_vm0 = vcmask 1040384   ;;  %vm857_vm4 = vcmask 1046528  }
   0xc   : > { %v3856_v1 = vld [vmem:[%s5200_s3 + $0xf8] sm:$0xff]   ;;  %3278 = vmatprep.subr.bf16.mxu0 %v3855_v0  ;;  %3830 = vmatprep.subr.bf16.mxu1 %v3855_v0  ;;  %v3858_v3 = vld [vmem:[%s5200_s3 + $0xf0] sm:$0xff]   ;;  %v3860_v5 = vld [vmem:[%s5200_s3 + $0xe8] sm:$0xff]   ;;  %vm572_vm1 = vsmask.f32 256 }
   0xd   : > { %3279 = vmatpush3.bf16.msra.mxu0 %v3856_v1  ;;  %3838 = vmatpush3.bf16.msra.mxu1 %v3856_v1  ;;  %s5245_s19 = smov (!%p222_p3, %s2856_s19), 1  ;;  %v3861_v6 = vld [vmem:[%s5200_s3 + $0x120] sm:$0xff]   ;;  %v3863_v8 = vld [vmem:[%s5200_s3 + $0x118] sm:$0xff]   ;;  %v3865_v10 = vld [vmem:[%s5200_s3 + $0x110] sm:$0xff]   ;;  %vm606_vm2 = vsmask.f32 7424 }
   0xe   : > { %3280 = vmatprep.subr.bf16.mxu0 %v3857_v2  ;;  %3831 = vmatprep.subr.bf16.mxu1 %v3857_v2  ;;  %s3070_s9 = sshll.u32 %s5245_s19, 7  ;;  %v3862_v7 = vld [vmem:[%s5200_s3 + $0xe0] sm:$0xff]   ;;  %v3864_v9 = vld [vmem:[%s5200_s3 + $0xd8] sm:$0xff]   ;;  %v3866_v19 = vld [vmem:[%s5200_s3 + $0xd0] sm:$0xff]  }
   0xf   : > { %s4011_s16 = scalar_lea.vmem %s5197_s0, %s3070_s9  ;;  %v4022_v11 = vld [vmem:[%s5198_s1] ss:$0 sm:$0xff]  ;;  %v3867_v22 = vld [vmem:[%s5200_s3 + $0x108] sm:$0xff]   ;;  %v4068_v58 = vld [vmem:[%s5200_s3 + $0x178] sm:$0xff]   ;;  %s5067_s26 = scalar_lea.vmem %s5201_s4, %s3070_s9 }
  0x10   : > { %v3105_v12 = vld [vmem:[%s4011_s16] sm:$0xff]   ;;  %v3248_v27 = vld [vmem:[%s4011_s16 + $0x8] sm:$0xff]   ;;  %v3249_v46 = vld [vmem:[%s4011_s16 + $0x10] sm:$0xff]   ;;  %s2865_s9 = sshll.u32 %s5245_s19, 1 }
  0x11   : > { %3281 = vmatpush3.bf16.msra.mxu0 %v3858_v3  ;;  %3839 = vmatpush3.bf16.msra.mxu1 %v3858_v3  ;;  %v3106_v13 = vunpack.c.l.bf16 %v3105_v12  ;;  %v3107_v14 = vunpack.c.h.bf16 %v3105_v12  ;;  %v3259_v15 = vld [vmem:[%s4011_s16 + $0x60] sm:$0xff]   ;;  %v3260_v28 = vld [vmem:[%s4011_s16 + $0x68] sm:$0xff]   ;;  %v3110_v31 = vunpack.c.l.bf16 %v3248_v27  ;;  %v3111_v32 = vunpack.c.h.bf16 %v3248_v27  ;;  %v4073_v59 = vld [vmem:[%s5200_s3 + $0xb8] sm:$0xff]   ;;  %s235_s28 = scalar_lea.vmem %s5202_s5, %s2865_s9 }
  0x12   : > { %3282 = vmatprep.subr.bf16.mxu0 %v3859_v4  ;;  %3832 = vmatprep.subr.bf16.mxu1 %v3859_v4  ;;  %v4029_v16 = vld [vmem:[%s5199_s2] ss:$0 sm:$0xff]  ;;  %v3154_v17 = vunpack.c.l.bf16 %v3259_v15  ;;  %v3155_v18 = vunpack.c.h.bf16 %v3259_v15  ;;  %v3868_v33 = vld [vmem:[%s5200_s3 + $0xc8] sm:$0xff]   ;;  %v3158_v37 = vunpack.c.l.bf16 %v3260_v28  ;;  %v3159_v38 = vunpack.c.h.bf16 %v3260_v28  ;;  %vm4077_vm3 = vmand %vm571_vm0, %vm572_vm1 }
  0x13   : > { %v309_v20 = vmul.f32 %v3106_v13, %v4022_v11  ;;  %v310_v21 = vmul.f32 %v3107_v14, %v4022_v11  ;;  %v3869_v34 = vld [vmem:[%s5200_s3 + $0x100] sm:$0xff]   ;;  %v311_v41 = vmul.f32 %v3110_v31, %v4022_v11  ;;  %v312_v42 = vmul.f32 %v3111_v32, %v4022_v11 }
  0x14   : > { %v333_v23 = vmul.f32 %v3154_v17, %v4022_v11  ;;  %v334_v24 = vmul.f32 %v3155_v18, %v4022_v11  ;;  %v335_v44 = vmul.f32 %v3158_v37, %v4022_v11  ;;  %v336_v45 = vmul.f32 %v3159_v38, %v4022_v11  ;;  %v3870_v51 = vld [vmem:[%s5200_s3 + $0xc0] sm:$0xff]  }
  0x15   : > { %3283 = vmatpush3.bf16.msra.mxu0 %v3860_v5  ;;  %3840 = vmatpush3.bf16.msra.mxu1 %v3860_v5  ;;  %v347_v25 = vadd.f32 %v4029_v16, %v309_v20  ;;  %v348_v26 = vadd.f32 %v4029_v16, %v310_v21  ;;  %v349_v48 = vadd.f32 %v4029_v16, %v311_v41  ;;  %v3114_v50 = vunpack.c.l.bf16 %v3249_v46  ;;  %v3261_v20 = vld [vmem:[%s4011_s16 + $0x70] sm:$0xff]  }
  0x16   : > { %3284 = vmatprep.subr.bf16.mxu0 %v3861_v6  ;;  %3833 = vmatprep.subr.bf16.mxu1 %v3861_v6  ;;  %v371_v29 = vadd.f32 %v4029_v16, %v333_v23  ;;  %v372_v30 = vadd.f32 %v4029_v16, %v334_v24  ;;  %v350_v49 = vadd.f32 %v4029_v16, %v312_v42  ;;  %v3115_v1 = vunpack.c.h.bf16 %v3249_v46 }
  0x17   : > { %v379_v35 = vmax.f32 %v347_v25, 0.0  ;;  %v380_v36 = vmax.f32 %v348_v26, 0.0  ;;  %v373_v54 = vadd.f32 %v4029_v16, %v335_v44  ;;  %v374_v55 = vadd.f32 %v4029_v16, %v336_v45  ;;  %v3876_v44 = vld [vmem:[%s5200_s3 + $0xb0] sm:$0xff]  }
  0x18   : > { %v403_v39 = vmax.f32 %v371_v29, 0.0  ;;  %v404_v40 = vmax.f32 %v372_v30, 0.0  ;;  %v381_v60 = vmax.f32 %v349_v48, 0.0  ;;  %v382_v61 = vmax.f32 %v350_v49, 0.0 }
  0x19   : > { %3285 = vmatpush3.bf16.msra.mxu0 %v3862_v7  ;;  %3841 = vmatpush3.bf16.msra.mxu1 %v3862_v7  ;;  %v411_v43 = vpack.c.bf16 %v380_v36, %v379_v35  ;;  %v405_v63 = vmax.f32 %v373_v54, 0.0  ;;  %v406_v0 = vmax.f32 %v374_v55, 0.0  ;;  %v313_v5 = vmul.f32 %v3114_v50, %v4022_v11  ;;  %v3250_v50 = vld [vmem:[%s4011_s16 + $0x18] sm:$0xff]  }
  0x1a   : > { %3286 = vmatprep.subr.bf16.mxu0 %v3863_v8  ;;  %3834 = vmatprep.subr.bf16.mxu1 %v3863_v8  ;;  %v423_v47 = vpack.c.bf16 %v404_v40, %v403_v39  ;;  %v412_v4 = vpack.c.bf16 %v382_v61, %v381_v60  ;;  %v3162_v40 = vunpack.c.l.bf16 %v3261_v20  ;;  %v3163_v61 = vunpack.c.h.bf16 %v3261_v20 }
  0x1b   : > { %v428_v52 = vshrl.u32 %v411_v43, 16  ;;  %v431_v53 = vshll.u32 %v411_v43, 16  ;;  %v424_v8 = vpack.c.bf16 %v406_v0, %v405_v63  ;;  %v351_v32 = vadd.f32 %v4029_v16, %v313_v5 }
  0x1c   : > { %v512_v56 = vshrl.u32 %v423_v47, 16  ;;  %v515_v57 = vshll.u32 %v423_v47, 16  ;;  %v435_v14 = vshrl.u32 %v412_v4, 16  ;;  %v438_v18 = vshll.u32 %v412_v4, 16 }
  0x1d   : > { %3287 = vmatpush3.bf16.msra.mxu0 %v3864_v9  ;;  %3842 = vmatpush3.bf16.msra.mxu1 %v3864_v9  ;;  %v430_v62 = vrot.slane %v428_v52, 7  ;;  %v314_v9 = vmul.f32 %v3115_v1, %v4022_v11  ;;  %v522_v31 = vshll.u32 %v424_v8, 16  ;;  %v383_v45 = vmax.f32 %v351_v32, 0.0  ;;  %v3873_v52 = vld [vmem:[%s5200_s3 + $0x170] sm:$0xff]   ;;  %v3875_v32 = vld [vmem:[%s5200_s3 + $0x160] sm:$0xff]  }
  0x1e   : > { %3288 = vmatprep.subr.bf16.mxu0 %v3865_v10  ;;  %3835 = vmatprep.subr.bf16.mxu1 %v3865_v10  ;;  %v514_v3 = vrot.slane %v512_v56, 7  ;;  %v437_v28 = vrot.slane %v435_v14, 7  ;;  %v337_v0 = vmul.f32 %v3162_v40, %v4022_v11  ;;  %v3118_v1 = vunpack.c.l.bf16 %v3250_v50 }
  0x1f   : > { %v433_v6 = vor.u32 %v431_v53, %v430_v62  ;;  %v4084_v7 = vsel %vm4077_vm3, %v430_v62, 0  ;;  %v352_v36 = vadd.f32 %v4029_v16, %v314_v9  ;;  %v3880_v9 = vld [vmem:[%s5200_s3 + $0xa8] sm:$0xff]  }
  0x20   : > { %v623_v10 = vshll.u32 %v4084_v7, 16  ;;  %v517_v12 = vor.u32 %v515_v57, %v514_v3  ;;  %v4090_v13 = vsel %vm4077_vm3, %v514_v3, 0  ;;  %v4111_v35 = vsel %vm4077_vm3, %v437_v28, 0  ;;  %v3262_v3 = vld [vmem:[%s4011_s16 + $0x78] sm:$0xff]  }
  0x21   : > { %3289 = vmatpush3.bf16.msra.mxu0 %v3866_v19  ;;  %3843 = vmatpush3.bf16.msra.mxu1 %v3866_v19  ;;  %v4096_v15 = vsel %vm4077_vm3, 0, %v433_v6  ;;  %v767_v17 = vshll.u32 %v4090_v13, 16  ;;  %v519_v19 = vshrl.u32 %v424_v8, 16  ;;  %v635_v38 = vshll.u32 %v4111_v35, 16 }
  0x22   : > { %3290 = vmatprep.subr.bf16.mxu0 %v3867_v22  ;;  %3836 = vmatprep.subr.bf16.mxu1 %v3867_v22  ;;  %v616_v21 = vshrl.u32 %v4096_v15, 16  ;;  %v618_v22 = vshll.u32 %v4096_v15, 16  ;;  %v625_v23 = vrot.slane %v623_v10, 1  ;;  %v4104_v24 = vsel %vm4077_vm3, 0, %v517_v12 }
  0x23   : > { %v760_v25 = vshrl.u32 %v4104_v24, 16  ;;  %v762_v26 = vshll.u32 %v4104_v24, 16  ;;  %v769_v27 = vrot.slane %v767_v17, 1  ;;  %v521_v30 = vrot.slane %v519_v19, 7 }
  0x24   : > { %v620_v29 = vrot.slane %v618_v22, 1  ;;  %v637_v49 = vrot.slane %v635_v38, 1  ;;  %v384_v55 = vmax.f32 %v352_v36, 0.0  ;;  %v338_v6 = vmul.f32 %v3163_v61, %v4022_v11 }
  0x25   : > { %3291 = vmatpush3.bf16.msra.mxu0 %v3868_v33  ;;  %3844 = vmatpush3.bf16.msra.mxu1 %v3868_v33  ;;  %v764_v33 = vrot.slane %v762_v26, 1  ;;  %v524_v39 = vor.u32 %v522_v31, %v521_v30  ;;  %v4121_v43 = vsel %vm4077_vm3, %v521_v30, 0  ;;  %v3119_v8 = vunpack.c.h.bf16 %v3250_v50  ;;  %v3251_v26 = vld [vmem:[%s4011_s16 + $0x20] sm:$0xff]  }
  0x26   : > { %3292 = vmatprep.subr.bf16.mxu0 %v3869_v34  ;;  %3837 = vmatprep.subr.bf16.mxu1 %v3869_v34  ;;  %v440_v34 = vor.u32 %v438_v18, %v437_v28  ;;  %v621_v37 = vor.u32 %v620_v29, %v616_v21  ;;  %v779_v54 = vshll.u32 %v4121_v43, 16  ;;  %v413_v63 = vpack.c.bf16 %v384_v55, %v383_v45  ;;  %v3884_v31 = vld [vmem:[%s5200_s3 + $0xa0] sm:$0xff]   ;;  %v3877_v55 = vld [vmem:[%s5200_s3 + $0x158] sm:$0xff]  }
  0x27   : > { %v765_v41 = vor.u32 %v764_v33, %v760_v25  ;;  %v4141_v53 = vsel %vm4077_vm3, 0, %v524_v39  ;;  %v315_v14 = vmul.f32 %v3118_v1, %v4022_v11  ;;  %v376_v19 = vadd.f32 %v4029_v16, %v338_v6 }
  0x28   : > { %v4117_v42 = vsel %vm4077_vm3, 0, %v440_v34  ;;  %v4127_v46 = vsel %vm606_vm2, %v621_v37, %v625_v23  ;;  %v772_v57 = vshrl.u32 %v4141_v53, 16  ;;  %v774_v60 = vshll.u32 %v4141_v53, 16 }
  0x29   : > { %3293 = vmatpush3.bf16.msra.mxu0 %v3870_v51  ;;  %3845 = vmatpush3.bf16.msra.mxu1 %v3870_v51  ;;  %v628_v47 = vshrl.u32 %v4117_v42, 16  ;;  %v630_v48 = vshll.u32 %v4117_v42, 16  ;;  %v4134_v51 = vsel %vm606_vm2, %v765_v41, %v769_v27  ;;  %v781_v62 = vrot.slane %v779_v54, 1 }
  0x2a   : > { %3686 = vmatprep.subr.bf16.mxu1 %v4068_v58  ;;  %3734 = vmatprep.subr.bf16.mxu0 %v4073_v59  ;;  %v776_v5 = vrot.slane %v774_v60, 1  ;;  %v442_v10 = vshrl.u32 %v413_v63, 16  ;;  %v445_v12 = vshll.u32 %v413_v63, 16  ;;  %v316_v20 = vmul.f32 %v3119_v8, %v4022_v11 }
  0x2b   : > { %1198 = vmatprep.mubr.bf16.mxu0 %v4127_v46  ;;  %1294 = vmatprep.mubr.bf16.mxu1 %v4134_v51  ;;  %v632_v56 = vrot.slane %v630_v48, 1  ;;  %v353_v23 = vadd.f32 %v4029_v16, %v315_v14  ;;  %v3166_v25 = vunpack.c.l.bf16 %v3262_v3  ;;  %v408_v28 = vmax.f32 %v376_v19, 0.0  ;;  %v3892_v14 = vld [vmem:[%s5200_s3 + $0x90] sm:$0xff]  }
  0x2c   : > { %1199 = vmatmul.mubr.bf16.vlgmr.msra.gmra.mxu0 %v4096_v15  ;;  %1295 = vmatmul.mubr.bf16.vlgmr.msra.gmra.mxu1 %v4104_v24  ;;  %v777_v18 = vor.u32 %v776_v5, %v772_v57  ;;  %v444_v21 = vrot.slane %v442_v10, 7  ;;  %v354_v29 = vadd.f32 %v4029_v16, %v316_v20  ;;  %v3167_v30 = vunpack.c.h.bf16 %v3262_v3  ;;  %v3878_v5 = vld [vmem:[%s5200_s3 + $0x150] sm:$0xff]  }
  0x2d   : > { %3735 = vmatpush3.bf16.msra.mxu0 %v4073_v59  ;;  %3687 = vmatpush3.bf16.msra.mxu1 %v4068_v58  ;;  %v633_v4 = vor.u32 %v632_v56, %v628_v47  ;;  %v3874_v59 = vld [vmem:[%s5200_s3 + $0x168] sm:$0xff]   ;;  %v375_v58 = vadd.f32 %v4029_v16, %v337_v0  ;;  %v385_v36 = vmax.f32 %v353_v23, 0.0  ;;  %v339_v37 = vmul.f32 %v3166_v25, %v4022_v11  ;;  %v3889_v56 = vld [vmem:[%s5200_s3 + $0x98] sm:$0xff]  }
  0x2e   : > { %3736 = vmatprep.subr.bf16.mxu0 %v3876_v44  ;;  %3688 = vmatprep.subr.bf16.mxu1 %v3873_v52  ;;  %v4171_v27 = vsel %vm606_vm2, %v777_v18, %v781_v62  ;;  %v447_v33 = vor.u32 %v445_v12, %v444_v21  ;;  %v4183_v34 = vsel %vm4077_vm3, %v444_v21, 0  ;;  %v386_v40 = vmax.f32 %v354_v29, 0.0 }
  0x2f   : > { %v4163_v17 = vsel %vm606_vm2, %v633_v4, %v637_v49  ;;  %v407_v22 = vmax.f32 %v375_v58, 0.0  ;;  %1302 = vmatprep.mubr.bf16.mxu1 %v4171_v27  ;;  %v647_v38 = vshll.u32 %v4183_v34, 16  ;;  %v340_v41 = vmul.f32 %v3167_v30, %v4022_v11 }
  0x30   : > { %1206 = vmatprep.mubr.bf16.mxu0 %v4163_v17  ;;  %v377_v45 = vadd.f32 %v4029_v16, %v339_v37  ;;  %v3122_v47 = vunpack.c.l.bf16 %v3251_v26  ;;  %v3123_v48 = vunpack.c.h.bf16 %v3251_v26  ;;  %v414_v60 = vpack.c.bf16 %v386_v40, %v385_v36  ;;  %v3897_v36 = vld [vmem:[%s5200_s3 + $0x88] sm:$0xff]  }
  0x31   : > { %3737 = vmatpush3.bf16.msra.mxu0 %v3876_v44  ;;  %3689 = vmatpush3.bf16.msra.mxu1 %v3873_v52  ;;  %v425_v39 = vpack.c.bf16 %v408_v28, %v407_v22  ;;  %v4192_v44 = vsel %vm4077_vm3, 0, %v447_v33  ;;  %v649_v52 = vrot.slane %v647_v38, 1  ;;  %v378_v61 = vadd.f32 %v4029_v16, %v340_v41  ;;  %v3252_v28 = vld [vmem:[%s4011_s16 + $0x28] sm:$0xff]  }
  0x32   : > { %3738 = vmatprep.subr.bf16.mxu0 %v3880_v9  ;;  %3690 = vmatprep.subr.bf16.mxu1 %v3874_v59  ;;  %v640_v49 = vshrl.u32 %v4192_v44, 16  ;;  %v642_v50 = vshll.u32 %v4192_v44, 16  ;;  %v409_v62 = vmax.f32 %v377_v45, 0.0  ;;  %v317_v1 = vmul.f32 %v3122_v47, %v4022_v11 }
  0x33   : > { %v526_v54 = vshrl.u32 %v425_v39, 16  ;;  %v529_v57 = vshll.u32 %v425_v39, 16  ;;  %v318_v3 = vmul.f32 %v3123_v48, %v4022_v11  ;;  %v864_v4 = vrot.slane %v4111_v35, 1 }
  0x34   : > { %1207 = vmatmul.mubr.bf16.gmra.mxu0 %v4117_v42  ;;  %1303 = vmatmul.mubr.bf16.gmra.mxu1 %v4141_v53  ;;  %v644_v63 = vrot.slane %v642_v50, 1  ;;  %v449_v6 = vshrl.u32 %v414_v60, 16  ;;  %v452_v8 = vshll.u32 %v414_v60, 16  ;;  %v355_v58 = vadd.f32 %v4029_v16, %v317_v1  ;;  %v3900_v1 = vld [vmem:[%s5200_s3 + $0x80] sm:$0xff]  }
  0x35   : > { %3739 = vmatpush3.bf16.msra.mxu0 %v3880_v9  ;;  %3691 = vmatpush3.bf16.msra.mxu1 %v3874_v59  ;;  %v528_v0 = vrot.slane %v526_v54, 7  ;;  %v410_v9 = vmax.f32 %v378_v61, 0.0  ;;  %v356_v21 = vadd.f32 %v4029_v16, %v318_v3  ;;  %v860_v26 = vrot.slane %v4096_v15, 1 }
  0x36   : > { %3740 = vmatprep.subr.bf16.mxu0 %v3884_v31  ;;  %3692 = vmatprep.subr.bf16.mxu1 %v3875_v32  ;;  %v645_v59 = vor.u32 %v644_v63, %v640_v49  ;;  %v451_v19 = vrot.slane %v449_v6, 7  ;;  %v387_v25 = vmax.f32 %v355_v58, 0.0  ;;  %v861_v33 = vrot.slane %v4084_v7, 1 }
  0x37   : > { %v531_v10 = vor.u32 %v529_v57, %v528_v0  ;;  %v4212_v12 = vsel %vm4077_vm3, %v528_v0, 0  ;;  %v426_v20 = vpack.c.bf16 %v410_v9, %v409_v62  ;;  %v388_v40 = vmax.f32 %v356_v21, 0.0 }
  0x38   : > { %v791_v18 = vshll.u32 %v4212_v12, 16  ;;  %v4221_v22 = vsel %vm606_vm2, %v645_v59, %v649_v52  ;;  %v4242_v37 = vsel %vm4077_vm3, %v451_v19, 0  ;;  %v863_v57 = vrot.slane %v4117_v42, 1 }
  0x39   : > { %3741 = vmatpush3.bf16.msra.mxu0 %v3884_v31  ;;  %3693 = vmatpush3.bf16.msra.mxu1 %v3875_v32  ;;  %v4225_v23 = vsel %vm4077_vm3, 0, %v531_v10  ;;  %v454_v31 = vor.u32 %v452_v8, %v451_v19  ;;  %v3879_v32 = vld [vmem:[%s5200_s3 + $0x148] sm:$0xff]   ;;  %v533_v38 = vshrl.u32 %v426_v20, 16  ;;  %v536_v39 = vshll.u32 %v426_v20, 16 }
  0x3a   : > { %3742 = vmatprep.subr.bf16.mxu0 %v3889_v56  ;;  %3694 = vmatprep.subr.bf16.mxu1 %v3877_v55  ;;  %v784_v29 = vshrl.u32 %v4225_v23, 16  ;;  %v786_v30 = vshll.u32 %v4225_v23, 16  ;;  %v793_v45 = vrot.slane %v791_v18, 1  ;;  %v659_v47 = vshll.u32 %v4242_v37, 16 }
  0x3b   : > { %1214 = vmatprep.mubr.bf16.mxu0 %v4221_v22  ;;  %v4246_v7 = vsel %vm4077_vm3, 0, %v454_v31  ;;  %v535_v50 = vrot.slane %v533_v38, 7  ;;  %v415_v52 = vpack.c.bf16 %v388_v40, %v387_v25  ;;  %v3126_v60 = vunpack.c.l.bf16 %v3252_v28 }
  0x3c   : > { %1215 = vmatmul.mubr.bf16.gmra.mxu0 %v4192_v44  ;;  %v788_v41 = vrot.slane %v786_v30, 1  ;;  %v652_v48 = vshrl.u32 %v4246_v7, 16  ;;  %v654_v49 = vshll.u32 %v4246_v7, 16  ;;  %v3127_v58 = vunpack.c.h.bf16 %v3252_v28 }
  0x3d   : > { %3743 = vmatpush3.bf16.msra.mxu0 %v3889_v56  ;;  %3695 = vmatpush3.bf16.msra.mxu1 %v3877_v55  ;;  %v661_v55 = vrot.slane %v659_v47, 1  ;;  %v3881_v56 = vld [vmem:[%s5200_s3 + $0x140] sm:$0xff]   ;;  %v538_v62 = vor.u32 %v536_v39, %v535_v50  ;;  %v4257_v63 = vsel %vm4077_vm3, %v535_v50, 0  ;;  %v456_v0 = vshrl.u32 %v415_v52, 16 }
  0x3e   : > { %3696 = vmatprep.subr.bf16.mxu1 %v3878_v5  ;;  %3744 = vmatprep.subr.bf16.mxu0 %v3892_v14  ;;  %v789_v54 = vor.u32 %v788_v41, %v784_v29  ;;  %v656_v61 = vrot.slane %v654_v49, 1  ;;  %v803_v6 = vshll.u32 %v4257_v63, 16  ;;  %v459_v8 = vshll.u32 %v415_v52, 16  ;;  %v3904_v29 = vld [vmem:[%s5200_s3 + $0x1f8] sm:$0xff]  }
  0x3f   : > { %v4272_v59 = vsel %vm4077_vm3, 0, %v538_v62  ;;  %v458_v10 = vrot.slane %v456_v0, 7  ;;  %v319_v20 = vmul.f32 %v3126_v60, %v4022_v11  ;;  %v320_v28 = vmul.f32 %v3127_v58, %v4022_v11  ;;  %v3254_v52 = vld [vmem:[%s4011_s16 + $0x38] sm:$0xff]  }
  0x40   : > { %v4263_v3 = vsel %vm606_vm2, %v789_v54, %v793_v45  ;;  %v657_v9 = vor.u32 %v656_v61, %v652_v48  ;;  %v798_v18 = vshll.u32 %v4272_v59, 16  ;;  %v805_v19 = vrot.slane %v803_v6, 1  ;;  %v3253_v45 = vld [vmem:[%s4011_s16 + $0x30] sm:$0xff]  }
  0x41   : > { %3745 = vmatpush3.bf16.msra.mxu0 %v3892_v14  ;;  %3697 = vmatpush3.bf16.msra.mxu1 %v3878_v5  ;;  %5208 = vst [vmem:[#allocation2_spill] sm:$0xff] %v4263_v3  ;;  %v4267_v5 = vsel %vm857_vm4, %v860_v26, %v861_v33  ;;  %v796_v14 = vshrl.u32 %v4272_v59, 16  ;;  %v461_v25 = vor.u32 %v459_v8, %v458_v10  ;;  %v4283_v26 = vsel %vm4077_vm3, %v458_v10, 0 }
  0x42   : > { %3746 = vmatprep.subr.bf16.mxu0 %v3897_v36  ;;  %3698 = vmatprep.subr.bf16.mxu1 %v3879_v32  ;;  %v4279_v21 = vsel %vm606_vm2, %v657_v9, %v661_v55  ;;  %v800_v30 = vrot.slane %v798_v18, 1  ;;  %v671_v31 = vshll.u32 %v4283_v26, 16  ;;  %v357_v33 = vadd.f32 %v4029_v16, %v319_v20  ;;  %v4332_v20 = vld [vmem:[%s4011_s16 + $0x48] sm:$0xff]  }
  0x43   : > { %1310 = vmatprep.mubr.bf16.mxu1 %v4263_v3  ;;  %1222 = vmatprep.mubr.bf16.mxu0 %v4279_v21  ;;  %v4299_v38 = vsel %vm4077_vm3, 0, %v461_v25  ;;  %v358_v39 = vadd.f32 %v4029_v16, %v320_v28  ;;  %v867_v40 = vrot.slane %v4183_v34, 1  ;;  %v869_v41 = vrot.slane %v4246_v7, 1 }
  0x44   : > { %1311 = vmatmul.mubr.bf16.gmra.mxu1 %v4225_v23  ;;  %1223 = vmatmul.mubr.bf16.gmra.mxu0 %v4246_v7  ;;  %v801_v47 = vor.u32 %v800_v30, %v796_v14  ;;  %v664_v48 = vshrl.u32 %v4299_v38, 16  ;;  %v666_v49 = vshll.u32 %v4299_v38, 16  ;;  %v4310_v50 = vsel %vm857_vm4, %v863_v57, %v864_v4 }
  0x45   : > { %3747 = vmatpush3.bf16.msra.mxu0 %v3897_v36  ;;  %3699 = vmatpush3.bf16.msra.mxu1 %v3879_v32  ;;  %v3882_v32 = vld [vmem:[%s5200_s3 + $0x78] sm:$0xff]   ;;  %v866_v36 = vrot.slane %v4192_v44, 1  ;;  %v673_v54 = vrot.slane %v671_v31, 1  ;;  %v389_v55 = vmax.f32 %v357_v33, 0.0  ;;  %v390_v34 = vmax.f32 %v358_v39, 0.0 }
  0x46   : > { %3748 = vmatprep.subr.bf16.mxu0 %v3900_v1  ;;  %3700 = vmatprep.subr.bf16.mxu1 %v3881_v56  ;;  %v870_v60 = vrot.slane %v4242_v37, 1  ;;  %v4315_v61 = vsel %vm606_vm2, %v801_v47, %v805_v19  ;;  %v668_v62 = vrot.slane %v666_v49, 1  ;;  %v3130_v0 = vunpack.c.l.bf16 %v3253_v45 }
  0x47   : > { %5209 = vst [vmem:[#allocation3_spill] sm:$0xff] %v4315_v61  ;;  %v3131_v35 = vunpack.c.h.bf16 %v3253_v45  ;;  %1318 = vmatprep.mubr.bf16.mxu1 %v4315_v61  ;;  %v416_v4 = vpack.c.bf16 %v390_v34, %v389_v55  ;;  %v872_v37 = vrot.slane %v4299_v38, 1  ;;  %v3134_v10 = vunpack.c.l.bf16 %v3254_v52  ;;  %v3883_v45 = vld [vmem:[%s5200_s3 + $0x38] sm:$0xff]   ;;  %v3885_v55 = vld [vmem:[%s5200_s3 + $0x70] sm:$0xff]  }
  0x48   : > { %v4322_v57 = vsel %vm857_vm4, %v869_v41, %v870_v60  ;;  %v669_v6 = vor.u32 %v668_v62, %v664_v48  ;;  %v321_v8 = vmul.f32 %v3130_v0, %v4022_v11  ;;  %v873_v18 = vrot.slane %v4283_v26, 1 }
  0x49   : > { %3749 = vmatpush3.bf16.msra.mxu0 %v3900_v1  ;;  %3701 = vmatpush3.bf16.msra.mxu1 %v3881_v56  ;;  %v4319_v56 = vsel %vm857_vm4, %v866_v36, %v867_v40  ;;  %v3255_v1 = vld [vmem:[%s4011_s16 + $0x40] sm:$0xff]   ;;  %v322_v9 = vmul.f32 %v3131_v35, %v4022_v11  ;;  %v463_v58 = vshrl.u32 %v416_v4, 16  ;;  %v466_v14 = vshll.u32 %v416_v4, 16 }
  0x4a   : > { %3550 = vmatprep.subr.bf16.mxu0 %v3904_v29  ;;  %3414 = vmatprep.subr.bf16.mxu1 %v3882_v32  ;;  %v3135_v19 = vunpack.c.h.bf16 %v3254_v52  ;;  %v4335_v25 = vsel %vm606_vm2, %v669_v6, %v673_v54  ;;  %v359_v28 = vadd.f32 %v4029_v16, %v321_v8  ;;  %v323_v30 = vmul.f32 %v3134_v10, %v4022_v11 }
  0x4b   : > { %v360_v29 = vadd.f32 %v4029_v16, %v322_v9  ;;  %1230 = vmatprep.mubr.bf16.mxu0 %v4335_v25  ;;  %v465_v31 = vrot.slane %v463_v58, 7  ;;  %v3138_v33 = vunpack.c.l.bf16 %v3255_v1  ;;  %v3139_v36 = vunpack.c.h.bf16 %v3255_v1  ;;  %v3886_v58 = vld [vmem:[%s5200_s3 + $0x30] sm:$0xff]  }
  0x4c   : > { %1319 = vmatmul.mubr.bf16.gmra.mxu1 %v4272_v59  ;;  %v324_v32 = vmul.f32 %v3135_v19, %v4022_v11  ;;  %1231 = vmatmul.mubr.bf16.gmra.mxu0 %v4299_v38  ;;  %v391_v26 = vmax.f32 %v359_v28, 0.0  ;;  %v361_v40 = vadd.f32 %v4029_v16, %v323_v30  ;;  %v3142_v41 = vunpack.c.l.bf16 %v4332_v20 }
  0x4d   : > { %3702 = vmatprep.mubr.bf16.mxu1 %v4267_v5  ;;  %v392_v39 = vmax.f32 %v360_v29, 0.0  ;;  %v468_v47 = vor.u32 %v466_v14, %v465_v31  ;;  %v595_v48 = vsel %vm4077_vm3, %v465_v31, 0  ;;  %v325_v52 = vmul.f32 %v3138_v33, %v4022_v11 }
  0x4e   : > { %v362_v49 = vadd.f32 %v4029_v16, %v324_v32  ;;  %v683_v54 = vshll.u32 %v595_v48, 16  ;;  %v876_v60 = vrot.slane %v595_v48, 1  ;;  %v393_v62 = vmax.f32 %v361_v40, 0.0  ;;  %v3887_v32 = vld [vmem:[%s5200_s3 + $0x68] sm:$0xff]  }
  0x4f   : > { %v417_v34 = vpack.c.bf16 %v392_v39, %v391_v26  ;;  %v4357_v0 = vsel %vm4077_vm3, 0, %v468_v47  ;;  %v326_v4 = vmul.f32 %v3139_v36, %v4022_v11  ;;  %v363_v1 = vadd.f32 %v4029_v16, %v325_v52 }
  0x50   : > { %v394_v35 = vmax.f32 %v362_v49, 0.0  ;;  %v676_v6 = vshrl.u32 %v4357_v0, 16  ;;  %v678_v8 = vshll.u32 %v4357_v0, 16  ;;  %v685_v9 = vrot.slane %v683_v54, 1 }
  0x51   : > { %v470_v10 = vshrl.u32 %v417_v34, 16  ;;  %v473_v14 = vshll.u32 %v417_v34, 16  ;;  %v875_v19 = vrot.slane %v4357_v0, 1  ;;  %v364_v29 = vadd.f32 %v4029_v16, %v326_v4 }
  0x52   : > { %v418_v28 = vpack.c.bf16 %v394_v35, %v393_v62  ;;  %v680_v30 = vrot.slane %v678_v8, 1  ;;  %v395_v33 = vmax.f32 %v363_v1, 0.0  ;;  %v3143_v36 = vunpack.c.h.bf16 %v4332_v20  ;;  %v3890_v20 = vld [vmem:[%s5200_s3 + $0x60] sm:$0xff]  }
  0x53   : > { %v472_v31 = vrot.slane %v470_v10, 7  ;;  %v4375_v26 = vsel %vm857_vm4, %v872_v37, %v873_v18  ;;  %v327_v52 = vmul.f32 %v3142_v41, %v4022_v11  ;;  %v3888_v37 = vld [vmem:[%s5200_s3 + $0x28] sm:$0xff]   ;;  %v3891_v8 = vld [vmem:[%s5200_s3 + $0x20] sm:$0xff]   ;;  %v3257_v10 = vld [vmem:[%s4011_s16 + $0x50] sm:$0xff]  }
  0x54   : > { %3703 = vmatmul.mubr.bf16.vlgmr.msra.gmra.mxu1 %v4310_v50  ;;  %v477_v39 = vshrl.u32 %v418_v28, 16  ;;  %v480_v40 = vshll.u32 %v418_v28, 16  ;;  %v681_v47 = vor.u32 %v680_v30, %v676_v6  ;;  %v328_v35 = vmul.f32 %v3143_v36, %v4022_v11  ;;  %v3893_v28 = vld [vmem:[%s5200_s3 + $0x58] sm:$0xff]  }
  0x55   : > { %3415 = vmatpush3.bf16.msra.mxu1 %v3883_v45  ;;  %3706 = vmatprep.mubr.bf16.mxu1 %v4319_v56  ;;  %v396_v45 = vmax.f32 %v364_v29, 0.0  ;;  %v475_v48 = vor.u32 %v473_v14, %v472_v31  ;;  %v596_v49 = vsel %vm4077_vm3, %v472_v31, 0 }
  0x56   : > { %3416 = vmatprep.subr.bf16.mxu1 %v3885_v55  ;;  %v695_v54 = vshll.u32 %v596_v49, 16  ;;  %v4381_v55 = vsel %vm857_vm4, %v875_v19, %v876_v60  ;;  %v479_v18 = vrot.slane %v477_v39, 7  ;;  %v4390_v62 = vsel %vm606_vm2, %v681_v47, %v685_v9 }
  0x57   : > { %v419_v34 = vpack.c.bf16 %v396_v45, %v395_v33  ;;  %v4394_v41 = vsel %vm4077_vm3, 0, %v475_v48  ;;  %v879_v60 = vrot.slane %v596_v49, 1  ;;  %1238 = vmatprep.mubr.bf16.mxu0 %v4390_v62  ;;  %v365_v9 = vadd.f32 %v4029_v16, %v327_v52  ;;  %v3927_v49 = vld [vmem:[%s5199_s2] ss:$0 sm:$0xff] }
  0x58   : > { %v688_v4 = vshrl.u32 %v4394_v41, 16  ;;  %v690_v1 = vshll.u32 %v4394_v41, 16  ;;  %v482_v6 = vor.u32 %v480_v40, %v479_v18  ;;  %1239 = vmatmul.mubr.bf16.gmra.mxu0 %v4357_v0  ;;  %v4409_v11 = vsel %vm4077_vm3, %v479_v18, 0  ;;  %v3258_v40 = vld [vmem:[%s4011_s16 + $0x58] sm:$0xff]  }
  0x59   : > { %3417 = vmatpush3.bf16.msra.mxu1 %v3886_v58  ;;  %v697_v58 = vrot.slane %v695_v54, 1  ;;  %v878_v14 = vrot.slane %v4394_v41, 1  ;;  %v484_v19 = vshrl.u32 %v419_v34, 16  ;;  %v707_v30 = vshll.u32 %v4409_v11, 16 }
  0x5a   : > { %3418 = vmatprep.subr.bf16.mxu1 %v3887_v32  ;;  %v692_v29 = vrot.slane %v690_v1, 1  ;;  %v4418_v16 = vsel %vm4077_vm3, 0, %v482_v6  ;;  %v487_v31 = vshll.u32 %v419_v34, 16  ;;  %v882_v39 = vrot.slane %v4409_v11, 1 }
  0x5b   : > { %v700_v32 = vshrl.u32 %v4418_v16, 16  ;;  %v702_v33 = vshll.u32 %v4418_v16, 16  ;;  %v881_v36 = vrot.slane %v4418_v16, 1  ;;  %v709_v47 = vrot.slane %v707_v30, 1 }
  0x5c   : > { %3707 = vmatmul.mubr.bf16.gmra.mxu1 %v4322_v57  ;;  %v693_v45 = vor.u32 %v692_v29, %v688_v4  ;;  %v486_v48 = vrot.slane %v484_v19, 7  ;;  %v366_v52 = vadd.f32 %v3927_v49, %v328_v35  ;;  %v397_v18 = vmax.f32 %v365_v9, 0.0 }
  0x5d   : > { %3710 = vmatprep.mubr.bf16.mxu1 %v4375_v26  ;;  %3419 = vmatpush3.bf16.msra.mxu1 %v3888_v37  ;;  %v704_v54 = vrot.slane %v702_v33, 1  ;;  %v4430_v37 = vsel %vm857_vm4, %v878_v14, %v879_v60  ;;  %v3146_v34 = vunpack.c.l.bf16 %v3257_v10  ;;  %v3894_v60 = vld [vmem:[%s5200_s3 + $0x18] sm:$0xff]   ;;  %v3147_v9 = vunpack.c.h.bf16 %v3257_v10  ;;  %v3928_v14 = vld [vmem:[%s5198_s1] ss:$0 sm:$0xff] }
  0x5e   : > { %3420 = vmatprep.subr.bf16.mxu1 %v3890_v20  ;;  %v4433_v1 = vsel %vm606_vm2, %v693_v45, %v697_v58  ;;  %v489_v20 = vor.u32 %v487_v31, %v486_v48  ;;  %v598_v4 = vsel %vm4077_vm3, %v486_v48, 0  ;;  %v398_v6 = vmax.f32 %v366_v52, 0.0 }
  0x5f   : > { %1246 = vmatprep.mubr.bf16.mxu0 %v4433_v1  ;;  %v705_v11 = vor.u32 %v704_v54, %v700_v32  ;;  %v719_v19 = vshll.u32 %v598_v4, 16  ;;  %v885_v35 = vrot.slane %v598_v4, 1  ;;  %v329_v29 = vmul.f32 %v3928_v14, %v3146_v34  ;;  %v3896_v4 = vld [vmem:[%s5200_s3 + $0x10] sm:$0xff]  }
  0x60   : > { %v4443_v58 = vsel %vm4077_vm3, 0, %v489_v20  ;;  %v3150_v30 = vunpack.c.l.bf16 %v3258_v40  ;;  %1247 = vmatmul.mubr.bf16.gmra.mxu0 %v4394_v41  ;;  %v330_v54 = vmul.f32 %v3928_v14, %v3147_v9  ;;  %v3151_v20 = vunpack.c.h.bf16 %v3258_v40 }
  0x61   : > { %3421 = vmatpush3.bf16.msra.mxu1 %v3891_v8  ;;  %v420_v8 = vpack.c.bf16 %v398_v6, %v397_v18  ;;  %v4454_v10 = vsel %vm606_vm2, %v705_v11, %v709_v47  ;;  %v712_v31 = vshrl.u32 %v4443_v58, 16  ;;  %v714_v32 = vshll.u32 %v4443_v58, 16 }
  0x62   : > { %3422 = vmatprep.subr.bf16.mxu1 %v3893_v28  ;;  %v3895_v28 = vld [vmem:[%s5200_s3 + $0x50] sm:$0xff]   ;;  %v721_v33 = vrot.slane %v719_v19, 1  ;;  %1254 = vmatprep.mubr.bf16.mxu0 %v4454_v10  ;;  %v884_v45 = vrot.slane %v4443_v58, 1  ;;  %v367_v34 = vadd.f32 %v3927_v49, %v329_v29  ;;  %v331_v47 = vmul.f32 %v3928_v14, %v3150_v30  ;;  %v3898_v19 = vld [vmem:[%s5200_s3 + $0x48] sm:$0xff]  }
  0x63   : > { %v491_v48 = vshrl.u32 %v420_v8, 16  ;;  %v494_v52 = vshll.u32 %v420_v8, 16  ;;  %v716_v18 = vrot.slane %v714_v32, 1  ;;  %v368_v11 = vadd.f32 %v3927_v49, %v330_v54 }
  0x64   : > { %3711 = vmatmul.mubr.bf16.gmra.mxu1 %v4381_v55  ;;  %v399_v3 = vmax.f32 %v367_v34, 0.0  ;;  %v332_v8 = vmul.f32 %v3928_v14, %v3151_v20  ;;  %v369_v9 = vadd.f32 %v3927_v49, %v331_v47  ;;  %v3899_v14 = vld [vmem:[%s5200_s3 + $0x8] sm:$0xff]   ;;  %v3902_v47 = vld [vmem:[%s5200_s3] sm:$0xff]  }
  0x65   : > { %3714 = vmatprep.mubr.bf16.mxu1 %v4430_v37  ;;  %3423 = vmatpush3.bf16.msra.mxu1 %v3894_v60  ;;  %v493_v6 = vrot.slane %v491_v48, 7  ;;  %v717_v61 = vor.u32 %v716_v18, %v712_v31  ;;  %v4468_v60 = vsel %vm857_vm4, %v881_v36, %v882_v39  ;;  %v400_v30 = vmax.f32 %v368_v11, 0.0  ;;  %v4501_v11 = vld [vmem:[%s5200_s3 + $0x238] sm:$0xff]  }
  0x66   : > { %3424 = vmatprep.subr.bf16.mxu1 %v3895_v28  ;;  %v4476_v28 = vsel %vm857_vm4, %v884_v45, %v885_v35  ;;  %v370_v54 = vadd.f32 %v3927_v49, %v332_v8  ;;  %v401_v31 = vmax.f32 %v369_v9, 0.0 }
  0x67   : > { %v496_v40 = vor.u32 %v494_v52, %v493_v6  ;;  %v599_v29 = vsel %vm4077_vm3, %v493_v6, 0  ;;  %v4473_v32 = vsel %vm606_vm2, %v717_v61, %v721_v33  ;;  %v421_v39 = vpack.c.bf16 %v400_v30, %v399_v3  ;;  %v3901_v61 = vld [vmem:[%s5200_s3 + $0x40] sm:$0xff]  }
  0x68   : > { %v731_v48 = vshll.u32 %v599_v29, 16  ;;  %1255 = vmatmul.mubr.bf16.gmra.mxu0 %v4418_v16  ;;  %v888_v35 = vrot.slane %v599_v29, 1  ;;  %v402_v18 = vmax.f32 %v370_v54, 0.0 }
  0x69   : > { %3425 = vmatpush3.bf16.msra.mxu1 %v3896_v4  ;;  %v4483_v36 = vsel %vm4077_vm3, 0, %v496_v40  ;;  %1262 = vmatprep.mubr.bf16.mxu0 %v4473_v32  ;;  %v498_v3 = vshrl.u32 %v421_v39, 16  ;;  %v501_v52 = vshll.u32 %v421_v39, 16 }
  0x6a   : > { %3426 = vmatprep.subr.bf16.mxu1 %v3898_v19  ;;  %v887_v49 = vrot.slane %v4483_v36, 1  ;;  %v724_v33 = vshrl.u32 %v4483_v36, 16  ;;  %v726_v45 = vshll.u32 %v4483_v36, 16  ;;  %v733_v20 = vrot.slane %v731_v48, 1 }
  0x6b   : > { %v500_v4 = vrot.slane %v498_v3, 7  ;;  %v422_v6 = vpack.c.bf16 %v402_v18, %v401_v31  ;;  %v896_v3 = vrot.slane %v4104_v24, 1 }
  0x6c   : > { %3715 = vmatmul.mubr.bf16.gmra.mxu1 %v4468_v60  ;;  %v728_v34 = vrot.slane %v726_v45, 1  ;;  %v4504_v19 = vsel %vm857_vm4, %v887_v49, %v888_v35 }
  0x6d   : > { %3718 = vmatprep.mubr.bf16.mxu1 %v4476_v28  ;;  %3427 = vmatpush3.bf16.msra.mxu1 %v3899_v14  ;;  %v503_v9 = vor.u32 %v501_v52, %v500_v4  ;;  %v600_v40 = vsel %vm4077_vm3, %v500_v4, 0  ;;  %v505_v29 = vshrl.u32 %v422_v6, 16  ;;  %v508_v30 = vshll.u32 %v422_v6, 16 }
  0x6e   : > { %3428 = vmatprep.subr.bf16.mxu1 %v3901_v61  ;;  %v729_v8 = vor.u32 %v728_v34, %v724_v33  ;;  %v891_v54 = vrot.slane %v600_v40, 1  ;;  %v743_v14 = vshll.u32 %v600_v40, 16  ;;  %v897_v52 = vrot.slane %v4090_v13, 1 }
  0x6f   : > { %v4513_v39 = vsel %vm4077_vm3, 0, %v503_v9  ;;  %v507_v31 = vrot.slane %v505_v29, 7 }
  0x70   : > { %v4509_v48 = vsel %vm606_vm2, %v729_v8, %v733_v20  ;;  %1263 = vmatmul.mubr.bf16.gmra.mxu0 %v4443_v58  ;;  %v890_v61 = vrot.slane %v4513_v39, 1  ;;  %v736_v49 = vshrl.u32 %v4513_v39, 16  ;;  %v738_v35 = vshll.u32 %v4513_v39, 16 }
  0x71   : > { %3429 = vmatpush3.bf16.msra.mxu1 %v3902_v47  ;;  %1270 = vmatprep.mubr.bf16.mxu0 %v4509_v48  ;;  %v510_v33 = vor.u32 %v508_v30, %v507_v31  ;;  %v601_v45 = vsel %vm4077_vm3, %v507_v31, 0  ;;  %v745_v47 = vrot.slane %v743_v14, 1  ;;  %v4537_v40 = vsel %vm857_vm4, %v896_v3, %v897_v52 }
  0x72   : > { %3782 = vmatprep.subr.bf16.mxu1 %v4501_v11  ;;  %v4527_v18 = vsel %vm857_vm4, %v890_v61, %v891_v54  ;;  %v894_v34 = vrot.slane %v601_v45, 1  ;;  %v740_v20 = vrot.slane %v738_v35, 1  ;;  %v755_v13 = vshll.u32 %v601_v45, 16 }
  0x73   : > { %v4532_v4 = vsel %vm4077_vm3, 0, %v510_v33  ;;  %v899_v14 = vrot.slane %v4141_v53, 1  ;;  %v900_v31 = vrot.slane %v4121_v43, 1  ;;  %v902_v35 = vrot.slane %v4225_v23, 1 }
  0x74   : > { %3719 = vmatmul.mubr.bf16.gmra.mxu1 %v4504_v19  ;;  %v893_v6 = vrot.slane %v4532_v4, 1  ;;  %v741_v8 = vor.u32 %v740_v20, %v736_v49  ;;  %v750_v9 = vshll.u32 %v4532_v4, 16  ;;  %v748_v54 = vshrl.u32 %v4532_v4, 16 }
  0x75   : > { %3722 = vmatprep.mubr.bf16.mxu1 %v4527_v18  ;;  %v757_v49 = vrot.slane %v755_v13, 1  ;;  %v903_v33 = vrot.slane %v4212_v12, 1  ;;  %v4555_v45 = vsel %vm857_vm4, %v899_v14, %v900_v31  ;;  %v905_v43 = vrot.slane %v4272_v59, 1  ;;  %v3909_v13 = vld [vmem:[%s5200_s3 + $0x1e8] sm:$0xff]   ;;  %v3914_v14 = vld [vmem:[%s5200_s3 + $0x1d8] sm:$0xff]  }
  0x76   : > { %v4540_v29 = vsel %vm857_vm4, %v893_v6, %v894_v34  ;;  %v4543_v30 = vsel %vm606_vm2, %v741_v8, %v745_v47  ;;  %v752_v2 = vrot.slane %v750_v9, 1  ;;  %v906_v12 = vrot.slane %v4257_v63, 1  ;;  %v3905_v6 = vld [vmem:[%s5200_s3 + $0x1b8] sm:$0xff]   ;;  %v3906_v63 = vld [vmem:[%s5200_s3 + $0x1f0] sm:$0xff]  }
  0x77   : > { %v4561_v52 = vsel %vm857_vm4, %v902_v35, %v903_v33  ;;  %v3937_v20 = vmov 0   ;;  %v3908_v8 = vld [vmem:[%s5200_s3 + $0x230] sm:$0xff]   ;;  %v3915_v31 = vld [vmem:[%s5200_s3 + $0x198] sm:$0xff]   ;;  %v3919_v33 = vld [vmem:[%s5200_s3 + $0x1c8] sm:$0xff]  }
  0x78   : > { %1271 = vmatmul.mubr.bf16.gmra.mxu0 %v4483_v36  ;;  %v753_v61 = vor.u32 %v752_v2, %v748_v54  ;;  %v4570_v34 = vsel %vm857_vm4, %v905_v43, %v906_v12  ;;  %v4573_v47 = vrot.slane %v3937_v20, 1  ;;  %v3907_v9 = vld [vmem:[%s5200_s3 + $0x1b0] sm:$0xff]   ;;  %v3913_v54 = vld [vmem:[%s5200_s3 + $0x228] sm:$0xff]   ;;  %v3912_v2 = vld [vmem:[%s5200_s3 + $0x1a0] sm:$0xff]  }
  0x79   : > { %1278 = vmatprep.mubr.bf16.mxu0 %v4543_v30  ;;  %v3917_v35 = vld [vmem:[%s5200_s3 + $0x190] sm:$0xff]   ;;  %v3925_v43 = vld [vmem:[%s5200_s3 + $0x208] sm:$0xff]  }
  0x7a   : > { %v4558_v3 = vsel %vm606_vm2, %v753_v61, %v757_v49  ;;  %v3916_v61 = vld [vmem:[%s5200_s3 + $0x1d0] sm:$0xff]   ;;  %v3920_v12 = vld [vmem:[%s5200_s3 + $0x188] sm:$0xff]  }
  0x7b   : > { %v3924_v49 = vld [vmem:[%s5200_s3 + $0x210] sm:$0xff]  }
  0x7c   : > { %3723 = vmatmul.mubr.bf16.gmra.mxu1 %v4540_v29 }
  0x7d   : > { %3726 = vmatprep.mubr.bf16.mxu1 %v4537_v40 }
  0x80   : > { %1279 = vmatmul.mubr.bf16.gmra.mxu0 %v4513_v39 }
  0x81   : > { %1286 = vmatprep.mubr.bf16.mxu0 %v4558_v3 }
  0x84   : > { %3727 = vmatmul.mubr.bf16.gmra.mxu1 %v4555_v45 }
  0x85   : > { %3730 = vmatprep.mubr.bf16.mxu1 %v4561_v52 }
  0x88   : > { %1287 = vmatmul.mubr.bf16.gmra.mxu0 %v4532_v4 }
  0x89   : > { %3750 = vmatprep.mubr.bf16.mxu0 %v4573_v47 }
  0x8c   : > { %3731 = vmatmul.mubr.bf16.gmra.mxu1 %v4570_v34 }
  0x8d   : > { %1664 = vmatprep.mubr.bf16.mxu1 %v4573_v47 }
  0x90   : > { %3751 = vmatmul.mubr.bf16.vlgmr.msra.gmra.mxu0 %v4267_v5  ;;  %v3910_v5 = vld [vmem:[%s5200_s3 + $0x1a8] sm:$0xff]  }
  0x91   : > { %3551 = vmatpush3.bf16.msra.mxu0 %v3905_v6  ;;  %3754 = vmatprep.mubr.bf16.mxu0 %v4310_v50  ;;  %v3921_v6 = vld [vmem:[%s5200_s3 + $0x1c0] sm:$0xff]  }
  0x92   : > { %3552 = vmatprep.subr.bf16.mxu0 %v3906_v63  ;;  %v3926_v63 = vld [vmem:[%s5200_s3 + $0x200] sm:$0xff]  }
  0x94   : > { %1665 = vmatmul.mubr.bf16.vlgmr.msra.gmra.mxu1 %v3937_v20 }
  0x95   : > { %3783 = vmatpush3.bf16.msra.mxu1 %v4501_v11  ;;  %1672 = vmatprep.mubr.bf16.mxu1 %v4127_v46  ;;  %v3911_v46 = vld [vmem:[%s5200_s3 + $0x1e0] sm:$0xff]  }
  0x96   : > { %3784 = vmatprep.subr.bf16.mxu1 %v3908_v8  ;;  %3553 = vmatpush3.bf16.msra.mxu0 %v3907_v9  ;;  %v3918_v11 = vld [vmem:[%s5200_s3 + $0x220] sm:$0xff]  }
  0x97   : > { %3554 = vmatprep.subr.bf16.mxu0 %v3909_v13 }
  0x98   : > { %3755 = vmatmul.mubr.bf16.gmra.mxu0 %v4319_v56 }
  0x99   : > { %3785 = vmatpush3.bf16.msra.mxu1 %v3908_v8  ;;  %3758 = vmatprep.mubr.bf16.mxu0 %v4322_v57  ;;  %v3922_v8 = vld [vmem:[%s5200_s3 + $0x180] sm:$0xff]  }
  0x9a   : > { %3786 = vmatprep.subr.bf16.mxu1 %v3913_v54  ;;  %3555 = vmatpush3.bf16.msra.mxu0 %v3910_v5 }
  0x9b   : > { %3556 = vmatprep.subr.bf16.mxu0 %v3911_v46 }
  0x9c   : > { %1673 = vmatmul.mubr.bf16.gmra.mxu1 %v4096_v15  ;;  %v3923_v15 = vld [vmem:[%s5200_s3 + $0x218] sm:$0xff]  }
  0x9d   : > { %1680 = vmatprep.mubr.bf16.mxu1 %v4163_v17  ;;  %3787 = vmatpush3.bf16.msra.mxu1 %v3913_v54 }
  0x9e   : > { %3788 = vmatprep.subr.bf16.mxu1 %v3918_v11  ;;  %3557 = vmatpush3.bf16.msra.mxu0 %v3912_v2 }
  0x9f   : > { %3558 = vmatprep.subr.bf16.mxu0 %v3914_v14 }
  0xa0   : > { %3759 = vmatmul.mubr.bf16.gmra.mxu0 %v4375_v26 }
  0xa1   : > { %3789 = vmatpush3.bf16.msra.mxu1 %v3918_v11  ;;  %3762 = vmatprep.mubr.bf16.mxu0 %v4381_v55 }
  0xa2   : > { %3790 = vmatprep.subr.bf16.mxu1 %v3923_v15  ;;  %3559 = vmatpush3.bf16.msra.mxu0 %v3915_v31 }
  0xa3   : > { %3560 = vmatprep.subr.bf16.mxu0 %v3916_v61 }
  0xa4   : > { %1681 = vmatmul.mubr.bf16.gmra.mxu1 %v4117_v42 }
  0xa5   : > { %1688 = vmatprep.mubr.bf16.mxu1 %v4221_v22  ;;  %3791 = vmatpush3.bf16.msra.mxu1 %v3923_v15 }
  0xa6   : > { %3792 = vmatprep.subr.bf16.mxu1 %v3924_v49  ;;  %3561 = vmatpush3.bf16.msra.mxu0 %v3917_v35 }
  0xa7   : > { %3562 = vmatprep.subr.bf16.mxu0 %v3919_v33 }
  0xa8   : > { %3763 = vmatmul.mubr.bf16.gmra.mxu0 %v4430_v37 }
  0xa9   : > { %3793 = vmatpush3.bf16.msra.mxu1 %v3924_v49  ;;  %3766 = vmatprep.mubr.bf16.mxu0 %v4468_v60 }
  0xaa   : > { %3794 = vmatprep.subr.bf16.mxu1 %v3925_v43  ;;  %3563 = vmatpush3.bf16.msra.mxu0 %v3920_v12 }
  0xab   : > { %3564 = vmatprep.subr.bf16.mxu0 %v3921_v6 }
  0xac   : > { %1689 = vmatmul.mubr.bf16.gmra.mxu1 %v4192_v44 }
  0xad   : > { %1696 = vmatprep.mubr.bf16.mxu1 %v4279_v21  ;;  %3795 = vmatpush3.bf16.msra.mxu1 %v3925_v43 }
  0xae   : > { %3796 = vmatprep.subr.bf16.mxu1 %v3926_v63  ;;  %3565 = vmatpush3.bf16.msra.mxu0 %v3922_v8 }
  0xb0   : > { %3767 = vmatmul.mubr.bf16.gmra.mxu0 %v4476_v28 }
  0xb1   : > { %3797 = vmatpush3.bf16.msra.mxu1 %v3926_v63  ;;  %3770 = vmatprep.mubr.bf16.mxu0 %v4504_v19 }
  0xb4   : > { %1697 = vmatmul.mubr.bf16.gmra.mxu1 %v4246_v7 }
  0xb5   : > { %1704 = vmatprep.mubr.bf16.mxu1 %v4335_v25 }
  0xb8   : > { %3771 = vmatmul.mubr.bf16.gmra.mxu0 %v4527_v18 }
  0xb9   : > { %3774 = vmatprep.mubr.bf16.mxu0 %v4540_v29 }
  0xbc   : > { %1705 = vmatmul.mubr.bf16.gmra.mxu1 %v4299_v38 }
  0xbd   : > { %1712 = vmatprep.mubr.bf16.mxu1 %v4390_v62 }
  0xc0   : > { %3775 = vmatmul.mubr.bf16.gmra.mxu0 %v4537_v40 }
  0xc1   : > { %3778 = vmatprep.mubr.bf16.mxu0 %v4555_v45 }
  0xc4   : > { %1713 = vmatmul.mubr.bf16.gmra.mxu1 %v4357_v0 }
  0xc5   : > { %1720 = vmatprep.mubr.bf16.mxu1 %v4433_v1 }
  0xc8   : > { %3779 = vmatmul.mubr.bf16.gmra.mxu0 %v4561_v52 }
  0xc9   : > { %2179 = vmatprep.mubr.bf16.mxu0 %v4163_v17 }
  0xcc   : > { %1721 = vmatmul.mubr.bf16.gmra.mxu1 %v4394_v41 }
  0xcd   : > { %1728 = vmatprep.mubr.bf16.mxu1 %v4454_v10 }
  0xd0   : > { %2180 = vmatmul.mubr.bf16.vlgmr.msra.gmra.mxu0 %v4117_v42 }
  0xd1   : > { %2187 = vmatprep.mubr.bf16.mxu0 %v4221_v22 }
  0xd4   : > { %1729 = vmatmul.mubr.bf16.gmra.mxu1 %v4418_v16 }
  0xd5   : > { %1736 = vmatprep.mubr.bf16.mxu1 %v4473_v32 }
  0xd8   : > { %2188 = vmatmul.mubr.bf16.gmra.mxu0 %v4192_v44 }
  0xd9   : > { %2195 = vmatprep.mubr.bf16.mxu0 %v4279_v21 }
  0xdc   : > { %1737 = vmatmul.mubr.bf16.gmra.mxu1 %v4443_v58 }
  0xdd   : > { %1744 = vmatprep.mubr.bf16.mxu1 %v4509_v48 }
  0xe0   : > { %2196 = vmatmul.mubr.bf16.gmra.mxu0 %v4246_v7 }
  0xe1   : > { %2203 = vmatprep.mubr.bf16.mxu0 %v4335_v25 }
  0xe4   : > { %1745 = vmatmul.mubr.bf16.gmra.mxu1 %v4483_v36 }
  0xe5   : > { %1752 = vmatprep.mubr.bf16.mxu1 %v4543_v30 }
  0xe8   : > { %2204 = vmatmul.mubr.bf16.gmra.mxu0 %v4299_v38 }
  0xe9   : > { %2211 = vmatprep.mubr.bf16.mxu0 %v4390_v62 }
  0xec   : > { %v3294_v42 = vpop.f32.mrf.mxu0  ;;  %1753 = vmatmul.mubr.bf16.gmra.mxu1 %v4513_v39  ;;  %v3366_v17 = vpop.f32.mrf.mxu1 }
  0xed   : > { %1760 = vmatprep.mubr.bf16.mxu1 %v4558_v3 }
  0xee   : > { %v3295_v44 = vpop.f32.mrf.mxu0  ;;  %v3367_v21 = vpop.f32.mrf.mxu1 }
  0xef   : > { %v4694_v22 = vadd.f32 %v3295_v44, %v3294_v42  ;;  %v4696_v9 = vadd.f32 %v3367_v21, %v3366_v17  ;;  %v5210_v17 = vld [vmem:[#allocation2_spill] sm:$0xff] }
  0xf0   : > { %v3297_v7 = vpop.f32.mrf.mxu0  ;;  %v3369_v13 = vpop.f32.mrf.mxu1  ;;  %2212 = vmatmul.mubr.bf16.gmra.mxu0 %v4357_v0 }
  0xf1   : > { %2219 = vmatprep.mubr.bf16.mxu0 %v4433_v1 }
  0xf2   : > { %v3298_v54 = vpop.f32.mrf.mxu0  ;;  %v3370_v5 = vpop.f32.mrf.mxu1 }
  0xf3   : > { %v4698_v25 = vadd.f32 %v3298_v54, %v3297_v7  ;;  %v4700_v46 = vadd.f32 %v3370_v5, %v3369_v13 }
  0xf4   : > { %v3300_v38 = vpop.f32.mrf.mxu0  ;;  %1761 = vmatmul.mubr.bf16.gmra.mxu1 %v4532_v4  ;;  %v3372_v62 = vpop.f32.mrf.mxu1 }
  0xf5   : > { %1768 = vmatprep.mubr.bf16.mxu1 %v4134_v51 }
  0xf6   : > { %v3301_v11 = vpop.f32.mrf.mxu0  ;;  %v3373_v14 = vpop.f32.mrf.mxu1 }
  0xf7   : > { %v3302_v2 = vadd.f32 %v3301_v11, %v3300_v38  ;;  %v4706_v15 = vadd.f32 %v3373_v14, %v3372_v62 }
  0xf8   : > { %v3303_v31 = vpop.f32.mrf.mxu0  ;;  %v3375_v61 = vpop.f32.mrf.mxu1  ;;  %2220 = vmatmul.mubr.bf16.gmra.mxu0 %v4394_v41 }
  0xf9   : > { %2227 = vmatprep.mubr.bf16.mxu0 %v4454_v10 }
  0xfa   : > { %v3304_v49 = vpop.f32.mrf.mxu0  ;;  %v3376_v33 = vpop.f32.mrf.mxu1 }
  0xfb   : > { %v3305_v35 = vadd.f32 %v3304_v49, %v3303_v31  ;;  %v4708_v43 = vadd.f32 %v3376_v33, %v3375_v61 }
  0xfc   : > { %1769 = vmatmul.mubr.bf16.gmra.mxu1 %v4104_v24  ;;  %v3306_v0 = vpop.f32.mrf.mxu0 }
  0xfd   : > { %1776 = vmatprep.mubr.bf16.mxu1 %v4171_v27 }
  0xfe   : > { %v3307_v1 = vpop.f32.mrf.mxu0 }
  0xff   : > { %v3308_v12 = vadd.f32 %v3307_v1, %v3306_v0 }
 0x100   : > { %v3309_v6 = vpop.f32.mrf.mxu0  ;;  %2228 = vmatmul.mubr.bf16.gmra.mxu0 %v4418_v16 }
 0x101   : > { %2235 = vmatprep.mubr.bf16.mxu0 %v4473_v32 }
 0x102   : > { %v3310_v63 = vpop.f32.mrf.mxu0 }
 0x103   : > { %v3311_v42 = vadd.f32 %v3310_v63, %v3309_v6 }
 0x104   : > { %v3378_v8 = vpop.f32.mrf.mxu1  ;;  %1777 = vmatmul.mubr.bf16.gmra.mxu1 %v4141_v53  ;;  %v3312_v21 = vpop.f32.mrf.mxu0 }
 0x105   : > { %1784 = vmatprep.mubr.bf16.mxu1 %v5210_v17 }
 0x106   : > { %v3379_v41 = vpop.f32.mrf.mxu1  ;;  %v3313_v7 = vpop.f32.mrf.mxu0 }
 0x107   : > { %v4718_v44 = vadd.f32 %v3379_v41, %v3378_v8  ;;  %v3314_v54 = vadd.f32 %v3313_v7, %v3312_v21 }
 0x108   : > { %v3381_v10 = vpop.f32.mrf.mxu1  ;;  %v3315_v38 = vpop.f32.mrf.mxu0  ;;  %2236 = vmatmul.mubr.bf16.gmra.mxu0 %v4443_v58 }
 0x109   : > { %2243 = vmatprep.mubr.bf16.mxu0 %v4509_v48 }
 0x10a   : > { %v3382_v13 = vpop.f32.mrf.mxu1  ;;  %v3316_v16 = vpop.f32.mrf.mxu0 }
 0x10b   : > { %v4720_v5 = vadd.f32 %v3382_v13, %v3381_v10  ;;  %v3317_v11 = vadd.f32 %v3316_v16, %v3315_v38 }
 0x10c   : > { %v3384_v62 = vpop.f32.mrf.mxu1  ;;  %1785 = vmatmul.mubr.bf16.gmra.mxu1 %v4225_v23  ;;  %v3318_v61 = vpop.f32.mrf.mxu0 }
 0x10d   : > { %3798 = vmatprep.mubr.bf16.mxu1 %v4310_v50 }
 0x10e   : > { %v3385_v32 = vpop.f32.mrf.mxu1  ;;  %v3319_v33 = vpop.f32.mrf.mxu0 }
 0x10f   : > { %v4726_v14 = vadd.f32 %v3385_v32, %v3384_v62  ;;  %v3320_v1 = vadd.f32 %v3319_v33, %v3318_v61 }
 0x110   : > { %v3387_v31 = vpop.f32.mrf.mxu1  ;;  %2244 = vmatmul.mubr.bf16.gmra.mxu0 %v4483_v36  ;;  %v3321_v58 = vpop.f32.mrf.mxu0 }
 0x111   : > { %2251 = vmatprep.mubr.bf16.mxu0 %v4543_v30 }
 0x112   : > { %v3388_v49 = vpop.f32.mrf.mxu1  ;;  %v3322_v63 = vpop.f32.mrf.mxu0 }
 0x113   : > { %v4728_v0 = vadd.f32 %v3388_v49, %v3387_v31  ;;  %v3323_v41 = vadd.f32 %v3322_v63, %v3321_v58 }
 0x114   : > { %v3704_v6 = vpop.f32.mrf.mxu1  ;;  %3799 = vmatmul.mubr.bf16.vlgmr.msra.gmra.mxu1 %v4319_v56 }
 0x115   : > { %v4732_v48 = vadd.f32 %v3704_v6, %v3302_v2  ;;  %3802 = vmatprep.mubr.bf16.mxu1 %v4322_v57 }
 0x116   : > { %v1361_v50 = vpop.f32.mrf.mxu1 }
 0x117   : > { %v4737_v8 = vadd.f32 %v4694_v22, %v1361_v50 }
 0x118   : > { %v3705_v21 = vpop.f32.mrf.mxu1  ;;  %v3324_v56 = vpop.f32.mrf.mxu0  ;;  %2252 = vmatmul.mubr.bf16.gmra.mxu0 %v4513_v39 }
 0x119   : > { %v4739_v10 = vadd.f32 %v3705_v21, %v3305_v35  ;;  %2259 = vmatprep.mubr.bf16.mxu0 %v4558_v3 }
 0x11a   : > { %v1364_v7 = vpop.f32.mrf.mxu1  ;;  %v3325_v30 = vpop.f32.mrf.mxu0 }
 0x11b   : > { %v4742_v36 = vadd.f32 %v4698_v25, %v1364_v7  ;;  %v3326_v35 = vadd.f32 %v3325_v30, %v3324_v56 }
 0x11c   : > { %v3708_v2 = vpop.f32.mrf.mxu1  ;;  %3803 = vmatmul.mubr.bf16.gmra.mxu1 %v4375_v26  ;;  %v3327_v38 = vpop.f32.mrf.mxu0 }
 0x11d   : > { %v4746_v57 = vadd.f32 %v3708_v2, %v3314_v54  ;;  %3806 = vmatprep.mubr.bf16.mxu1 %v4381_v55 }
 0x11e   : > { %v1377_v22 = vpop.f32.mrf.mxu1  ;;  %v3328_v16 = vpop.f32.mrf.mxu0 }
 0x11f   : > { %v4750_v13 = vadd.f32 %v3308_v12, %v1377_v22  ;;  %v3329_v39 = vadd.f32 %v3328_v16, %v3327_v38 }
 0x120   : > { %v3709_v25 = vpop.f32.mrf.mxu1  ;;  %v3330_v26 = vpop.f32.mrf.mxu0  ;;  %2260 = vmatmul.mubr.bf16.gmra.mxu0 %v4532_v4 }
 0x121   : > { %v4752_v62 = vadd.f32 %v3709_v25, %v3317_v11  ;;  %2267 = vmatprep.mubr.bf16.mxu0 %v4134_v51 }
 0x122   : > { %v1380_v32 = vpop.f32.mrf.mxu1  ;;  %v3331_v3 = vpop.f32.mrf.mxu0 }
 0x123   : > { %v4754_v31 = vadd.f32 %v3311_v42, %v1380_v32  ;;  %v3332_v11 = vadd.f32 %v3331_v3, %v3330_v26 }
 0x124   : > { %v3712_v54 = vpop.f32.mrf.mxu1  ;;  %3807 = vmatmul.mubr.bf16.gmra.mxu1 %v4430_v37  ;;  %v3333_v49 = vpop.f32.mrf.mxu0 }
 0x125   : > { %v4758_v55 = vadd.f32 %v3712_v54, %v3326_v35  ;;  %3810 = vmatprep.mubr.bf16.mxu1 %v4468_v60 }
 0x126   : > { %v1393_v12 = vpop.f32.mrf.mxu1  ;;  %v3334_v6 = vpop.f32.mrf.mxu0 }
 0x127   : > { %v4762_v61 = vadd.f32 %v3320_v1, %v1393_v12  ;;  %v3335_v4 = vadd.f32 %v3334_v6, %v3333_v49 }
 0x128   : > { %v3713_v42 = vpop.f32.mrf.mxu1  ;;  %v3336_v37 = vpop.f32.mrf.mxu0  ;;  %2268 = vmatmul.mubr.bf16.gmra.mxu0 %v4104_v24 }
 0x129   : > { %v4764_v33 = vadd.f32 %v3713_v42, %v3329_v39  ;;  %2275 = vmatprep.mubr.bf16.mxu0 %v4171_v27 }
 0x12a   : > { %v1396_v58 = vpop.f32.mrf.mxu1  ;;  %v3337_v51 = vpop.f32.mrf.mxu0 }
 0x12b   : > { %v4766_v50 = vadd.f32 %v3323_v41, %v1396_v58  ;;  %v3338_v1 = vadd.f32 %v3337_v51, %v3336_v37 }
 0x12c   : > { %v3716_v63 = vpop.f32.mrf.mxu1  ;;  %3811 = vmatmul.mubr.bf16.gmra.mxu1 %v4476_v28  ;;  %v3339_v7 = vpop.f32.mrf.mxu0 }
 0x12d   : > { %3814 = vmatprep.mubr.bf16.mxu1 %v4504_v19  ;;  %v4774_v2 = vadd.f32 %v3716_v63, %v3338_v1 }
 0x12e   : > { %v1409_v60 = vpop.f32.mrf.mxu1  ;;  %v3340_v41 = vpop.f32.mrf.mxu0 }
 0x12f   : > { %v4772_v21 = vadd.f32 %v3332_v11, %v1409_v60  ;;  %v3341_v22 = vadd.f32 %v3340_v41, %v3339_v7 }
 0x130   : > { %v3717_v56 = vpop.f32.mrf.mxu1  ;;  %v3342_v24 = vpop.f32.mrf.mxu0  ;;  %2276 = vmatmul.mubr.bf16.gmra.mxu0 %v4141_v53 }
 0x131   : > { %v4780_v27 = vadd.f32 %v3717_v56, %v3341_v22  ;;  %2283 = vmatprep.mubr.bf16.mxu0 %v5210_v17  ;;  %v5211_v17 = vld [vmem:[#allocation3_spill] sm:$0xff] }
 0x132   : > { %v1412_v30 = vpop.f32.mrf.mxu1  ;;  %v3343_v19 = vpop.f32.mrf.mxu0 }
 0x133   : > { %v4776_v35 = vadd.f32 %v3335_v4, %v1412_v30  ;;  %v3344_v25 = vadd.f32 %v3343_v19, %v3342_v24 }
 0x134   : > { %v3720_v28 = vpop.f32.mrf.mxu1  ;;  %3815 = vmatmul.mubr.bf16.gmra.mxu1 %v4527_v18  ;;  %v3345_v16 = vpop.f32.mrf.mxu0 }
 0x135   : > { %3818 = vmatprep.mubr.bf16.mxu1 %v4540_v29 }
 0x136   : > { %v1425_v38 = vpop.f32.mrf.mxu1  ;;  %v3346_v26 = vpop.f32.mrf.mxu0 }
 0x137   : > { %v4784_v39 = vadd.f32 %v3344_v25, %v1425_v38  ;;  %v3347_v3 = vadd.f32 %v3346_v26, %v3345_v16 }
 0x138   : > { %v3721_v32 = vpop.f32.mrf.mxu1  ;;  %v3348_v12 = vpop.f32.mrf.mxu0  ;;  %2284 = vmatmul.mubr.bf16.gmra.mxu0 %v4225_v23 }
 0x139   : > { %2291 = vmatprep.mubr.bf16.mxu0 %v5211_v17 }
 0x13a   : > { %v1428_v54 = vpop.f32.mrf.mxu1  ;;  %v3349_v29 = vpop.f32.mrf.mxu0 }
 0x13b   : > { %v4788_v18 = vadd.f32 %v3347_v3, %v1428_v54  ;;  %v3350_v49 = vadd.f32 %v3349_v29, %v3348_v12 }
 0x13c   : > { %v3724_v53 = vpop.f32.mrf.mxu1  ;;  %3819 = vmatmul.mubr.bf16.gmra.mxu1 %v4537_v40  ;;  %v3351_v42 = vpop.f32.mrf.mxu0 }
 0x13d   : > { %3822 = vmatprep.mubr.bf16.mxu1 %v4555_v45  ;;  %v4792_v58 = vadd.f32 %v3720_v28, %v3350_v49 }
 0x13e   : > { %v1441_v11 = vpop.f32.mrf.mxu1  ;;  %v3352_v4 = vpop.f32.mrf.mxu0 }
 0x13f   : > { %v3353_v63 = vadd.f32 %v3352_v4, %v3351_v42 }
 0x140   : > { %v3725_v6 = vpop.f32.mrf.mxu1  ;;  %v3354_v51 = vpop.f32.mrf.mxu0  ;;  %2292 = vmatmul.mubr.bf16.gmra.mxu0 %v4272_v59 }
 0x141   : > { %v4796_v40 = vadd.f32 %v3721_v32, %v3353_v63  ;;  %2299 = vmatprep.mubr.bf16.mxu0 %v4573_v47 }
 0x142   : > { %v1444_v37 = vpop.f32.mrf.mxu1  ;;  %v3355_v60 = vpop.f32.mrf.mxu0 }
 0x143   : > { %v3356_v7 = vadd.f32 %v3355_v60, %v3354_v51 }
 0x144   : > { %v3728_v23 = vpop.f32.mrf.mxu1  ;;  %3823 = vmatmul.mubr.bf16.gmra.mxu1 %v4561_v52  ;;  %v3357_v41 = vpop.f32.mrf.mxu0 }
 0x145   : > { %v4799_v45 = vadd.f32 %v3728_v23, %v4706_v15  ;;  %3826 = vmatprep.mubr.bf16.mxu1 %v4570_v34  ;;  %v4806_v59 = vadd.f32 %v3356_v7, %v1441_v11 }
 0x146   : > { %v1457_v1 = vpop.f32.mrf.mxu1  ;;  %v3358_v22 = vpop.f32.mrf.mxu0 }
 0x147   : > { %v4804_v56 = vadd.f32 %v4696_v9, %v1457_v1  ;;  %v3359_v24 = vadd.f32 %v3358_v22, %v3357_v41 }
 0x148   : > { %v3729_v30 = vpop.f32.mrf.mxu1  ;;  %v3360_v34 = vpop.f32.mrf.mxu0  ;;  %2300 = vmatmul.mubr.bf16.gmra.mxu0 %v3937_v20 }
 0x149   : > { %v4809_v52 = vadd.f32 %v3729_v30, %v4708_v43  ;;  %v4816_v9 = vadd.f32 %v3359_v24, %v1444_v37 }
 0x14a   : > { %v1460_v15 = vpop.f32.mrf.mxu1  ;;  %v3361_v25 = vpop.f32.mrf.mxu0 }
 0x14b   : > { %v4812_v28 = vadd.f32 %v4700_v46, %v1460_v15  ;;  %v3362_v16 = vadd.f32 %v3361_v25, %v3360_v34 }
 0x14c   : > { %v3732_v19 = vpop.f32.mrf.mxu1  ;;  %3827 = vmatmul.mubr.bf16.gmra.mxu1 %v4573_v47  ;;  %v3363_v26 = vpop.f32.mrf.mxu0 }
 0x14d   : > { %v4819_v38 = vadd.f32 %v3732_v19, %v4726_v14  ;;  %v4824_v54 = vadd.f32 %v3724_v53, %v3362_v16 }
 0x14e   : > { %v1473_v43 = vpop.f32.mrf.mxu1  ;;  %v3364_v20 = vpop.f32.mrf.mxu0 }
 0x14f   : > { %v4822_v32 = vadd.f32 %v4718_v44, %v1473_v43  ;;  %v3365_v12 = vadd.f32 %v3364_v20, %v3363_v26 }
 0x150   : > { %v3733_v46 = vpop.f32.mrf.mxu1  ;;  %v3752_v29 = vpop.f32.mrf.mxu0 }
 0x151   : > { %v4827_v3 = vadd.f32 %v3733_v46, %v4728_v0  ;;  %v4832_v11 = vadd.f32 %v3725_v6, %v3365_v12 }
 0x152   : > { %v1476_v47 = vpop.f32.mrf.mxu1  ;;  %v1827_v44 = vpop.f32.mrf.mxu0 }
 0x153   : > { %v4830_v17 = vadd.f32 %v4720_v5, %v1476_v47 }
 0x154   : > { %v3430_v14 = vpop.f32.mrf.mxu1  ;;  %v3753_v37 = vpop.f32.mrf.mxu0 }
 0x156   : > { %v3431_v49 = vpop.f32.mrf.mxu1  ;;  %v1830_v0 = vpop.f32.mrf.mxu0 }
 0x157   : > { %v3432_v42 = vadd.f32 %v3431_v49, %v3430_v14 }
 0x158   : > { %v3433_v4 = vpop.f32.mrf.mxu1  ;;  %v3756_v1 = vpop.f32.mrf.mxu0 }
 0x159   : > { %v1667_v53 = vadd.f32 %v3432_v42, %v4737_v8 }
 0x15a   : > { %v3434_v63 = vpop.f32.mrf.mxu1  ;;  %v1843_v41 = vpop.f32.mrf.mxu0 }
 0x15b   : > { %v4835_v51 = vadd.f32 %v1827_v44, %v1667_v53  ;;  %v3435_v23 = vadd.f32 %v3434_v63, %v3433_v4 }
 0x15c   : > { %v3436_v60 = vpop.f32.mrf.mxu1  ;;  %v3757_v15 = vpop.f32.mrf.mxu0 }
 0x15d   : > { %v1670_v5 = vadd.f32 %v3435_v23, %v4742_v36 }
 0x15e   : > { %v3437_v7 = vpop.f32.mrf.mxu1  ;;  %v1846_v8 = vpop.f32.mrf.mxu0 }
 0x15f   : > { %v4838_v6 = vadd.f32 %v1830_v0, %v1670_v5  ;;  %v3438_v30 = vadd.f32 %v3437_v7, %v3436_v60 }
 0x160   : > { %v3439_v22 = vpop.f32.mrf.mxu1  ;;  %v3760_v16 = vpop.f32.mrf.mxu0 }
 0x161   : > { %v1675_v24 = vadd.f32 %v3438_v30, %v4732_v48 }
 0x162   : > { %v3440_v34 = vpop.f32.mrf.mxu1  ;;  %v1859_v36 = vpop.f32.mrf.mxu0 }
 0x163   : > { %v3441_v19 = vadd.f32 %v3440_v34, %v3439_v22  ;;  %v4841_v25 = vadd.f32 %v3752_v29, %v1675_v24 }
 0x164   : > { %v3442_v43 = vpop.f32.mrf.mxu1  ;;  %v3761_v14 = vpop.f32.mrf.mxu0 }
 0x165   : > { %v1678_v26 = vadd.f32 %v3441_v19, %v4739_v10 }
 0x166   : > { %v3443_v46 = vpop.f32.mrf.mxu1  ;;  %v1862_v48 = vpop.f32.mrf.mxu0 }
 0x167   : > { %v3444_v20 = vadd.f32 %v3443_v46, %v3442_v43  ;;  %v4844_v47 = vadd.f32 %v3753_v37, %v1678_v26 }
 0x168   : > { %v3445_v12 = vpop.f32.mrf.mxu1  ;;  %v4849_v53 = vpop.f32.mrf.mxu0 }
 0x169   : > { %v1683_v49 = vadd.f32 %v3444_v20, %v4750_v13 }
 0x16a   : > { %v3446_v44 = vpop.f32.mrf.mxu1  ;;  %v1875_v0 = vpop.f32.mrf.mxu0 }
 0x16b   : > { %v3447_v42 = vadd.f32 %v3446_v44, %v3445_v12  ;;  %v4847_v4 = vadd.f32 %v1843_v41, %v1683_v49 }
 0x16c   : > { %v3448_v29 = vpop.f32.mrf.mxu1  ;;  %v4854_v5 = vpop.f32.mrf.mxu0 }
 0x16d   : > { %v1686_v63 = vadd.f32 %v3447_v42, %v4754_v31 }
 0x16e   : > { %v3449_v10 = vpop.f32.mrf.mxu1  ;;  %v1878_v30 = vpop.f32.mrf.mxu0 }
 0x16f   : > { %v3450_v23 = vadd.f32 %v3449_v10, %v3448_v29  ;;  %v4852_v60 = vadd.f32 %v1846_v8, %v1686_v63 }
 0x170   : > { %v3451_v37 = vpop.f32.mrf.mxu1  ;;  %v4859_v34 = vpop.f32.mrf.mxu0 }
 0x171   : > { %v1691_v13 = vadd.f32 %v3450_v23, %v4746_v57 }
 0x172   : > { %v3452_v7 = vpop.f32.mrf.mxu1  ;;  %v4862_v43 = vpop.f32.mrf.mxu0 }
 0x173   : > { %v3453_v22 = vadd.f32 %v3452_v7, %v3451_v37  ;;  %v4857_v41 = vadd.f32 %v3756_v1, %v1691_v13 }
 0x174   : > { %v3454_v24 = vpop.f32.mrf.mxu1  ;;  %v4866_v20 = vpop.f32.mrf.mxu0 }
 0x175   : > { %v1694_v31 = vadd.f32 %v3453_v22, %v4752_v62 }
 0x176   : > { %v3455_v19 = vpop.f32.mrf.mxu1  ;;  %v4869_v49 = vpop.f32.mrf.mxu0 }
 0x177   : > { %v3456_v8 = vadd.f32 %v3455_v19, %v3454_v24  ;;  %v4864_v26 = vadd.f32 %v3757_v15, %v1694_v31 }
 0x178   : > { %v3457_v46 = vpop.f32.mrf.mxu1  ;;  %v4873_v29 = vpop.f32.mrf.mxu0 }
 0x179   : > { %v1699_v57 = vadd.f32 %v3456_v8, %v4762_v61 }
 0x17a   : > { %v3458_v12 = vpop.f32.mrf.mxu1  ;;  %v4876_v10 = vpop.f32.mrf.mxu0 }
 0x17b   : > { %v3459_v1 = vadd.f32 %v3458_v12, %v3457_v46  ;;  %v4871_v44 = vadd.f32 %v1859_v36, %v1699_v57 }
 0x17c   : > { %v3460_v42 = vpop.f32.mrf.mxu1  ;;  %v4880_v13 = vpop.f32.mrf.mxu0 }
 0x17d   : > { %v1702_v62 = vadd.f32 %v3459_v1, %v4766_v50 }
 0x17e   : > { %v3461_v63 = vpop.f32.mrf.mxu1  ;;  %v4883_v22 = vpop.f32.mrf.mxu0 }
 0x17f   : > { %v3462_v15 = vadd.f32 %v3461_v63, %v3460_v42  ;;  %v4878_v23 = vadd.f32 %v1862_v48, %v1702_v62 }
 0x180   : > { %v3463_v37 = vpop.f32.mrf.mxu1  ;;  %v4887_v19 = vpop.f32.mrf.mxu0 }
 0x181   : > { %v1707_v61 = vadd.f32 %v3462_v15, %v4758_v55 }
 0x182   : > { %v3464_v7 = vpop.f32.mrf.mxu1  ;;  %v4890_v46 = vpop.f32.mrf.mxu0 }
 0x183   : > { %v3465_v36 = vadd.f32 %v3464_v7, %v3463_v37  ;;  %v4885_v24 = vadd.f32 %v3760_v16, %v1707_v61 }
 0x184   : > { %v3466_v31 = vpop.f32.mrf.mxu1  ;;  %v4894_v1 = vpop.f32.mrf.mxu0 }
 0x185   : > { %v1710_v50 = vadd.f32 %v3465_v36, %v4764_v33 }
 0x186   : > { %v3467_v8 = vpop.f32.mrf.mxu1  ;;  %v4897_v62 = vpop.f32.mrf.mxu0 }
 0x187   : > { %v3468_v48 = vadd.f32 %v3467_v8, %v3466_v31  ;;  %v4892_v57 = vadd.f32 %v3761_v14, %v1710_v50 }
 0x188   : > { %v3469_v12 = vpop.f32.mrf.mxu1  ;;  %v4901_v37 = vpop.f32.mrf.mxu0 }
 0x189   : > { %v1715_v55 = vadd.f32 %v3468_v48, %v4772_v21  ;;  %5212 = vst [vmem:[#allocation2_spill] sm:$0xff] %v4901_v37 }
 0x18a   : > { %v3470_v42 = vpop.f32.mrf.mxu1  ;;  %v4904_v7 = vpop.f32.mrf.mxu0 }
 0x18b   : > { %v3471_v16 = vadd.f32 %v3470_v42, %v3469_v12  ;;  %v4899_v63 = vadd.f32 %v1875_v0, %v1715_v55 }
 0x18c   : > { %v3472_v15 = vpop.f32.mrf.mxu1  ;;  %v4908_v50 = vpop.f32.mrf.mxu0 }
 0x18d   : > { %v1718_v33 = vadd.f32 %v3471_v16, %v4776_v35  ;;  %5213 = vst [vmem:[#allocation3_spill] sm:$0xff] %v4908_v50 }
 0x18e   : > { %v3473_v61 = vpop.f32.mrf.mxu1  ;;  %v4911_v48 = vpop.f32.mrf.mxu0 }
 0x18f   : > { %v3474_v14 = vadd.f32 %v3473_v61, %v3472_v15  ;;  %v4906_v36 = vadd.f32 %v1878_v30, %v1718_v33 }
 0x190   : > { %v3475_v31 = vpop.f32.mrf.mxu1  ;;  %v3566_v35 = vpop.f32.mrf.mxu0 }
 0x191   : > { %v1723_v21 = vadd.f32 %v3474_v14, %v4774_v2 }
 0x192   : > { %v3476_v8 = vpop.f32.mrf.mxu1  ;;  %v3567_v15 = vpop.f32.mrf.mxu0 }
 0x193   : > { %v3477_v0 = vadd.f32 %v3476_v8, %v3475_v31  ;;  %v4914_v12 = vadd.f32 %v4849_v53, %v1723_v21  ;;  %v4917_v33 = vadd.f32 %v3567_v15, %v3566_v35 }
 0x194   : > { %v3478_v55 = vpop.f32.mrf.mxu1  ;;  %v4922_v14 = vpop.f32.mrf.mxu0 }
 0x195   : > { %v1726_v42 = vadd.f32 %v3477_v0, %v4780_v27 }
 0x196   : > { %v3479_v16 = vpop.f32.mrf.mxu1  ;;  %v4925_v53 = vpop.f32.mrf.mxu0 }
 0x197   : > { %v3480_v30 = vadd.f32 %v3479_v16, %v3478_v55  ;;  %v4920_v61 = vadd.f32 %v4854_v5, %v1726_v42 }
 0x198   : > { %v3481_v2 = vpop.f32.mrf.mxu1  ;;  %v4930_v0 = vpop.f32.mrf.mxu0 }
 0x199   : > { %v1731_v31 = vadd.f32 %v3480_v30, %v4784_v39 }
 0x19a   : > { %v3482_v8 = vpop.f32.mrf.mxu1  ;;  %v4933_v5 = vpop.f32.mrf.mxu0 }
 0x19b   : > { %v3483_v21 = vadd.f32 %v3482_v8, %v3481_v2  ;;  %v4928_v50 = vadd.f32 %v4862_v43, %v1731_v31 }
 0x19c   : > { %v3484_v27 = vpop.f32.mrf.mxu1  ;;  %v4938_v15 = vpop.f32.mrf.mxu0 }
 0x19d   : > { %v1734_v55 = vadd.f32 %v3483_v21, %v4788_v18 }
 0x19e   : > { %v3485_v35 = vpop.f32.mrf.mxu1  ;;  %v4941_v43 = vpop.f32.mrf.mxu0 }
 0x19f   : > { %v3486_v42 = vadd.f32 %v3485_v35, %v3484_v27  ;;  %v4936_v16 = vadd.f32 %v4869_v49, %v1734_v55 }
 0x1a0   : > { %v3487_v39 = vpop.f32.mrf.mxu1  ;;  %v4946_v21 = vpop.f32.mrf.mxu0 }
 0x1a1   : > { %5214 = vst [vmem:[#allocation4_spill] sm:$0xff] %v4936_v16  ;;  %v1739_v30 = vadd.f32 %v3486_v42, %v4792_v58 }
 0x1a2   : > { %v3488_v2 = vpop.f32.mrf.mxu1  ;;  %v4949_v49 = vpop.f32.mrf.mxu0 }
 0x1a3   : > { %v3489_v31 = vadd.f32 %v3488_v2, %v3487_v39  ;;  %v4944_v8 = vadd.f32 %v4859_v34, %v1739_v30 }
 0x1a4   : > { %v3490_v18 = vpop.f32.mrf.mxu1  ;;  %v4954_v42 = vpop.f32.mrf.mxu0 }
 0x1a5   : > { %v1742_v27 = vadd.f32 %v3489_v31, %v4796_v40 }
 0x1a6   : > { %v3491_v35 = vpop.f32.mrf.mxu1  ;;  %v4957_v34 = vpop.f32.mrf.mxu0 }
 0x1a7   : > { %v3492_v55 = vadd.f32 %v3491_v35, %v3490_v18  ;;  %v4952_v37 = vadd.f32 %v4866_v20, %v1742_v27 }
 0x1a8   : > { %v3493_v58 = vpop.f32.mrf.mxu1  ;;  %v4962_v31 = vpop.f32.mrf.mxu0 }
 0x1a9   : > { %5215 = vst [vmem:[#allocation5_spill] sm:$0xff] %v4952_v37  ;;  %v1747_v39 = vadd.f32 %v3492_v55, %v4806_v59 }
 0x1aa   : > { %v3494_v2 = vpop.f32.mrf.mxu1  ;;  %v4965_v20 = vpop.f32.mrf.mxu0 }
 0x1ab   : > { %v3495_v30 = vadd.f32 %v3494_v2, %v3493_v58  ;;  %v4960_v16 = vadd.f32 %v4876_v10, %v1747_v39 }
 0x1ac   : > { %v3496_v40 = vpop.f32.mrf.mxu1  ;;  %v4970_v55 = vpop.f32.mrf.mxu0 }
 0x1ad   : > { %5216 = vst [vmem:[#allocation6_spill] sm:$0xff] %v4960_v16  ;;  %v1750_v18 = vadd.f32 %v3495_v30, %v4816_v9 }
 0x1ae   : > { %v3497_v35 = vpop.f32.mrf.mxu1  ;;  %v4973_v10 = vpop.f32.mrf.mxu0 }
 0x1af   : > { %v3498_v27 = vadd.f32 %v3497_v35, %v3496_v40  ;;  %v4968_v37 = vadd.f32 %v4883_v22, %v1750_v18 }
 0x1b0   : > { %v3499_v59 = vpop.f32.mrf.mxu1  ;;  %v4978_v30 = vpop.f32.mrf.mxu0 }
 0x1b1   : > { %5217 = vst [vmem:[#allocation7_spill] sm:$0xff] %v4968_v37  ;;  %v1755_v58 = vadd.f32 %v3498_v27, %v4824_v54 }
 0x1b2   : > { %v3500_v2 = vpop.f32.mrf.mxu1  ;;  %v4981_v22 = vpop.f32.mrf.mxu0 }
 0x1b3   : > { %v3501_v39 = vadd.f32 %v3500_v2, %v3499_v59  ;;  %v4976_v16 = vadd.f32 %v4873_v29, %v1755_v58 }
 0x1b4   : > { %v3502_v9 = vpop.f32.mrf.mxu1  ;;  %v4986_v27 = vpop.f32.mrf.mxu0 }
 0x1b5   : > { %5218 = vst [vmem:[#allocation8_spill] sm:$0xff] %v4976_v16  ;;  %v1758_v40 = vadd.f32 %v3501_v39, %v4832_v11 }
 0x1b6   : > { %v3503_v35 = vpop.f32.mrf.mxu1  ;;  %v4989_v29 = vpop.f32.mrf.mxu0 }
 0x1b7   : > { %v3504_v18 = vadd.f32 %v3503_v35, %v3502_v9  ;;  %v4984_v37 = vadd.f32 %v4880_v13, %v1758_v40 }
 0x1b8   : > { %v3505_v54 = vpop.f32.mrf.mxu1  ;;  %v4994_v39 = vpop.f32.mrf.mxu0 }
 0x1b9   : > { %5219 = vst [vmem:[#allocation9_spill] sm:$0xff] %v4984_v37  ;;  %v1763_v59 = vadd.f32 %v3504_v18, %v4804_v56 }
 0x1ba   : > { %v3506_v2 = vpop.f32.mrf.mxu1  ;;  %v4997_v13 = vpop.f32.mrf.mxu0 }
 0x1bb   : > { %v3507_v58 = vadd.f32 %v3506_v2, %v3505_v54  ;;  %v4992_v16 = vadd.f32 %v4890_v46, %v1763_v59 }
 0x1bc   : > { %v3508_v11 = vpop.f32.mrf.mxu1  ;;  %v5002_v18 = vpop.f32.mrf.mxu0 }
 0x1bd   : > { %5220 = vst [vmem:[#allocation10_spill] sm:$0xff] %v4992_v16  ;;  %v1766_v9 = vadd.f32 %v3507_v58, %v4812_v28 }
 0x1be   : > { %v3509_v35 = vpop.f32.mrf.mxu1  ;;  %v5005_v46 = vpop.f32.mrf.mxu0 }
 0x1bf   : > { %v3510_v40 = vadd.f32 %v3509_v35, %v3508_v11  ;;  %v5000_v37 = vadd.f32 %v4897_v62, %v1766_v9 }
 0x1c0   : > { %v3511_v56 = vpop.f32.mrf.mxu1  ;;  %v5010_v58 = vpop.f32.mrf.mxu0 }
 0x1c1   : > { %5221 = vst [vmem:[#allocation11_spill] sm:$0xff] %v5000_v37  ;;  %v1771_v54 = vadd.f32 %v3510_v40, %v4799_v45 }
 0x1c2   : > { %v3512_v2 = vpop.f32.mrf.mxu1  ;;  %v5013_v62 = vpop.f32.mrf.mxu0 }
 0x1c3   : > { %v3513_v59 = vadd.f32 %v3512_v2, %v3511_v56  ;;  %v5008_v16 = vadd.f32 %v4887_v19, %v1771_v54 }
 0x1c4   : > { %v3514_v28 = vpop.f32.mrf.mxu1  ;;  %v5018_v40 = vpop.f32.mrf.mxu0 }
 0x1c5   : > { %5222 = vst [vmem:[#allocation12_spill] sm:$0xff] %v5008_v16  ;;  %v1774_v11 = vadd.f32 %v3513_v59, %v4809_v52 }
 0x1c6   : > { %v3515_v35 = vpop.f32.mrf.mxu1  ;;  %v5021_v19 = vpop.f32.mrf.mxu0 }
 0x1c7   : > { %v3516_v9 = vadd.f32 %v3515_v35, %v3514_v28  ;;  %v5016_v37 = vadd.f32 %v4894_v1, %v1774_v11 }
 0x1c8   : > { %v3517_v45 = vpop.f32.mrf.mxu1  ;;  %v5026_v59 = vpop.f32.mrf.mxu0 }
 0x1c9   : > { %5223 = vst [vmem:[#allocation13_spill] sm:$0xff] %v5016_v37  ;;  %v1779_v56 = vadd.f32 %v3516_v9, %v4822_v32 }
 0x1ca   : > { %v3518_v2 = vpop.f32.mrf.mxu1  ;;  %v5029_v1 = vpop.f32.mrf.mxu0 }
 0x1cb   : > { %v3519_v54 = vadd.f32 %v3518_v2, %v3517_v45  ;;  %v5024_v16 = vadd.f32 %v4904_v7, %v1779_v56 }
 0x1cc   : > { %v3520_v52 = vpop.f32.mrf.mxu1  ;;  %v5034_v9 = vpop.f32.mrf.mxu0 }
 0x1cd   : > { %5224 = vst [vmem:[#allocation14_spill] sm:$0xff] %v5024_v16  ;;  %v1782_v28 = vadd.f32 %v3519_v54, %v4830_v17  ;;  %v3574_v54 = vadd.f32 %v4933_v5, %v4930_v0 }
 0x1ce   : > { %v3521_v35 = vpop.f32.mrf.mxu1  ;;  %v5039_v56 = vpop.f32.mrf.mxu0 }
 0x1cf   : > { %v3522_v11 = vadd.f32 %v3521_v35, %v3520_v52  ;;  %v5032_v37 = vadd.f32 %v4911_v48, %v1782_v28 }
 0x1d0   : > { %v3523_v32 = vpop.f32.mrf.mxu1  ;;  %v5041_v16 = vpop.f32.mrf.mxu0 }
 0x1d1   : > { %5225 = vst [vmem:[#allocation15_spill] sm:$0xff] %v5032_v37  ;;  %v5037_v45 = vadd.f32 %v3522_v11, %v4819_v38  ;;  %v3577_v38 = vadd.f32 %v4941_v43, %v4938_v15  ;;  %v3571_v37 = vadd.f32 %v4925_v53, %v4922_v14 }
 0x1d2   : > { %v3524_v7 = vpop.f32.mrf.mxu1  ;;  %v5048_v48 = vpop.f32.mrf.mxu0 }
 0x1d3   : > { %5226 = vst [vmem:[#allocation16_spill] sm:$0xff] %v5037_v45  ;;  %v3525_v2 = vadd.f32 %v3524_v7, %v3523_v32 }
 0x1d4   : > { %v3800_v17 = vpop.f32.mrf.mxu1  ;;  %v5053_v32 = vpop.f32.mrf.mxu0 }
 0x1d5   : > { %v5046_v52 = vadd.f32 %v3525_v2, %v4827_v3  ;;  %v2351_v35 = vadd.f32 %v3800_v17, %v3574_v54 }
 0x1d6   : > { %v2342_v28 = vpop.f32.mrf.mxu1  ;;  %v5058_v5 = vpop.f32.mrf.mxu0 }
 0x1d7   : > { %5227 = vst [vmem:[#allocation17_spill] sm:$0xff] %v5046_v52  ;;  %v2343_v11 = vadd.f32 %v4917_v33, %v2342_v28  ;;  %v2471_v52 = vadd.f32 %v2351_v35, %v4841_v25 }
 0x1d8   : > { %v3801_v7 = vpop.f32.mrf.mxu1  ;;  %v5069_v33 = vpop.f32.mrf.mxu0 }
 0x1d9   : > { %v2469_v0 = vadd.f32 %v2343_v11, %v4835_v51  ;;  %v2354_v3 = vadd.f32 %v3801_v7, %v3577_v38  ;;  %v3586_v51 = vadd.f32 %v4965_v20, %v4962_v31 }
 0x1da   : > { %v2345_v2 = vpop.f32.mrf.mxu1  ;;  %v5078_v17 = vpop.f32.mrf.mxu0 }
 0x1db   : > { %v2472_v45 = vadd.f32 %v2354_v3, %v4844_v47  ;;  %v2346_v15 = vadd.f32 %v3571_v37, %v2345_v2  ;;  %v3580_v47 = vadd.f32 %v4949_v49, %v4946_v21  ;;  %v3589_v37 = vadd.f32 %v4973_v10, %v4970_v55 }
 0x1dc   : > { %v3804_v14 = vpop.f32.mrf.mxu1  ;;  %v2698_v43 = vmul.f32 %v2469_v0, %v2469_v0  ;;  %v5081_v20 = vpop.f32.mrf.mxu0  ;;  %v3583_v55 = vadd.f32 %v4957_v34, %v4954_v42 }
 0x1dd   : > { %v3176_v53 = vpack.c.bf16 %v2472_v45, %v2471_v52  ;;  %v2470_v25 = vadd.f32 %v2346_v15, %v4838_v6  ;;  %v2367_v11 = vadd.f32 %v3804_v14, %v3586_v51  ;;  %v2700_v6 = vmul.f32 %v2471_v52, %v2471_v52 }
 0x1de   : > { %v2358_v54 = vpop.f32.mrf.mxu1  ;;  %v2701_v10 = vmul.f32 %v2472_v45, %v2472_v45  ;;  %v5087_v15 = vpop.f32.mrf.mxu0 }
 0x1df   : > { %3263 = vst [vmem:[%s5067_s26 + $0x8] sm:$0xff] %v3176_v53   ;;  %v3171_v28 = vpack.c.bf16 %v2470_v25, %v2469_v0  ;;  %v2661_v38 = vadd.f32 %v2470_v25, %v2469_v0  ;;  %v2699_v35 = vmul.f32 %v2470_v25, %v2470_v25  ;;  %v2359_v31 = vadd.f32 %v3580_v47, %v2358_v54 }
 0x1e0   : > { %v3805_v7 = vpop.f32.mrf.mxu1  ;;  %v2475_v14 = vadd.f32 %v2367_v11, %v4857_v41  ;;  %v3598_v47 = vadd.f32 %v4997_v13, %v4994_v39  ;;  %v5095_v34 = vpop.f32.mrf.mxu0 }
 0x1e1   : > { %3172 = vst [vmem:[%s5067_s26] sm:$0xff] %v3171_v28   ;;  %v2662_v3 = vadd.f32 %v2661_v38, %v2471_v52  ;;  %v2730_v21 = vadd.f32 %v2699_v35, %v2698_v43  ;;  %v2370_v49 = vadd.f32 %v3805_v7, %v3589_v37  ;;  %v2473_v2 = vadd.f32 %v2359_v31, %v4847_v4 }
 0x1e2   : > { %v2361_v0 = vpop.f32.mrf.mxu1  ;;  %v3592_v52 = vadd.f32 %v4981_v22, %v4978_v30  ;;  %v3601_v30 = vadd.f32 %v5005_v46, %v5002_v18 }
 0x1e3   : > { %v2731_v53 = vadd.f32 %v2730_v21, %v2700_v6  ;;  %v2663_v51 = vadd.f32 %v2662_v3, %v2472_v45  ;;  %v2476_v25 = vadd.f32 %v2370_v49, %v4864_v26  ;;  %v2362_v42 = vadd.f32 %v3583_v55, %v2361_v0  ;;  %v5098_v45 = vpop.f32.mrf.mxu0 }
 0x1e4   : > { %v3808_v4 = vpop.f32.mrf.mxu1  ;;  %v2702_v43 = vmul.f32 %v2473_v2, %v2473_v2  ;;  %v2704_v3 = vmul.f32 %v2475_v14, %v2475_v14 }
 0x1e5   : > { %v2664_v37 = vadd.f32 %v2663_v51, %v2473_v2  ;;  %v2732_v54 = vadd.f32 %v2731_v53, %v2701_v10  ;;  %v3186_v28 = vpack.c.bf16 %v2476_v25, %v2475_v14  ;;  %v2474_v41 = vadd.f32 %v2362_v42, %v4852_v60  ;;  %v5103_v31 = vpop.f32.mrf.mxu0 }
 0x1e6   : > { %v2374_v26 = vpop.f32.mrf.mxu1  ;;  %v2383_v39 = vadd.f32 %v3808_v4, %v3598_v47  ;;  %v3595_v60 = vadd.f32 %v4989_v29, %v4986_v27  ;;  %v2705_v53 = vmul.f32 %v2476_v25, %v2476_v25  ;;  %v3604_v42 = vadd.f32 %v5013_v62, %v5010_v58 }
 0x1e7   : > { %v2733_v22 = vadd.f32 %v2732_v54, %v2702_v43  ;;  %3265 = vst [vmem:[%s5067_s26 + $0x18] sm:$0xff] %v3186_v28   ;;  %v2375_v13 = vadd.f32 %v3592_v52, %v2374_v26  ;;  %v3181_v38 = vpack.c.bf16 %v2474_v41, %v2473_v2  ;;  %v2665_v35 = vadd.f32 %v2664_v37, %v2474_v41  ;;  %v5109_v46 = vpop.f32.mrf.mxu0 }
 0x1e8   : > { %v2703_v11 = vmul.f32 %v2474_v41, %v2474_v41  ;;  %v3809_v7 = vpop.f32.mrf.mxu1  ;;  %v2479_v10 = vadd.f32 %v2383_v39, %v4885_v24  ;;  %v3607_v62 = vadd.f32 %v5021_v19, %v5018_v40  ;;  %v3622_v19 = vadd.f32 %v5078_v17, %v5069_v33 }
 0x1e9   : > { %v2386_v6 = vadd.f32 %v3809_v7, %v3601_v30  ;;  %3264 = vst [vmem:[%s5067_s26 + $0x10] sm:$0xff] %v3181_v38   ;;  %v2666_v21 = vadd.f32 %v2665_v35, %v2475_v14  ;;  %v2477_v18 = vadd.f32 %v2375_v13, %v4871_v44  ;;  %v5113_v27 = vpop.f32.mrf.mxu0  ;;  %v3610_v14 = vadd.f32 %v5029_v1, %v5026_v59 }
 0x1ea   : > { %v2734_v49 = vadd.f32 %v2733_v22, %v2703_v11  ;;  %v2377_v55 = vpop.f32.mrf.mxu1  ;;  %v2708_v22 = vmul.f32 %v2479_v10, %v2479_v10 }
 0x1eb   : > { %v2480_v2 = vadd.f32 %v2386_v6, %v4892_v57  ;;  %v2378_v0 = vadd.f32 %v3595_v60, %v2377_v55  ;;  %v2667_v52 = vadd.f32 %v2666_v21, %v2476_v25  ;;  %v2706_v57 = vmul.f32 %v2477_v18, %v2477_v18  ;;  %v5120_v37 = vpop.f32.mrf.mxu0 }
 0x1ec   : > { %v2735_v51 = vadd.f32 %v2734_v49, %v2704_v3  ;;  %v3812_v29 = vpop.f32.mrf.mxu1  ;;  %v3613_v25 = vadd.f32 %v5039_v56, %v5034_v9 }
 0x1ed   : > { %v3196_v47 = vpack.c.bf16 %v2480_v2, %v2479_v10  ;;  %v2478_v44 = vadd.f32 %v2378_v0, %v4878_v23  ;;  %v2668_v24 = vadd.f32 %v2667_v52, %v2477_v18  ;;  %v2399_v59 = vadd.f32 %v3812_v29, %v3610_v14  ;;  %v5125_v26 = vpop.f32.mrf.mxu0 }
 0x1ee   : > { %v2736_v4 = vadd.f32 %v2735_v51, %v2705_v53  ;;  %v2390_v43 = vpop.f32.mrf.mxu1  ;;  %v2709_v60 = vmul.f32 %v2480_v2, %v2480_v2 }
 0x1ef   : > { %3267 = vst [vmem:[%s5067_s26 + $0x28] sm:$0xff] %v3196_v47   ;;  %v3191_v54 = vpack.c.bf16 %v2478_v44, %v2477_v18  ;;  %v2707_v28 = vmul.f32 %v2478_v44, %v2478_v44  ;;  %v2669_v41 = vadd.f32 %v2668_v24, %v2478_v44  ;;  %v2391_v23 = vadd.f32 %v3604_v42, %v2390_v43  ;;  %v3636_v56 = vpop.f32.mrf.mxu0 }
 0x1f0   : > { %v2737_v1 = vadd.f32 %v2736_v4, %v2706_v57  ;;  %v3813_v58 = vpop.f32.mrf.mxu1  ;;  %v2483_v35 = vadd.f32 %v2399_v59, %v4914_v12  ;;  %v3616_v18 = vadd.f32 %v5048_v48, %v5041_v16  ;;  %v3619_v48 = vadd.f32 %v5058_v5, %v5053_v32  ;;  %v5228_v4 = vld [vmem:[#allocation5_spill] sm:$0xff] }
 0x1f1   : > { %3266 = vst [vmem:[%s5067_s26 + $0x20] sm:$0xff] %v3191_v54   ;;  %v2402_v30 = vadd.f32 %v3813_v58, %v3613_v25  ;;  %v2670_v39 = vadd.f32 %v2669_v41, %v2479_v10  ;;  %v2481_v9 = vadd.f32 %v2391_v23, %v4899_v63  ;;  %v5133_v21 = vpop.f32.mrf.mxu0  ;;  %v5229_v23 = vld [vmem:[#allocation4_spill] sm:$0xff]  ;;  %v3628_v58 = vadd.f32 %v5098_v45, %v5095_v34 }
 0x1f2   : > { %v2738_v13 = vadd.f32 %v2737_v1, %v2707_v28  ;;  %v2393_v38 = vpop.f32.mrf.mxu1  ;;  %v2712_v47 = vmul.f32 %v2483_v35, %v2483_v35  ;;  %v3634_v1 = vadd.f32 %v5120_v37, %v5113_v27  ;;  %v3631_v34 = vadd.f32 %v5109_v46, %v5103_v31 }
 0x1f3   : > { %v2484_v11 = vadd.f32 %v2402_v30, %v4920_v61  ;;  %v2394_v7 = vadd.f32 %v3607_v62, %v2393_v38  ;;  %v2671_v3 = vadd.f32 %v2670_v39, %v2480_v2  ;;  %v2710_v61 = vmul.f32 %v2481_v9, %v2481_v9  ;;  %v5140_v10 = vpop.f32.mrf.mxu0 }
 0x1f4   : > { %v2739_v6 = vadd.f32 %v2738_v13, %v2708_v22  ;;  %v3816_v40 = vpop.f32.mrf.mxu1  ;;  %v3625_v2 = vadd.f32 %v5087_v15, %v5081_v20  ;;  %v3637_v13 = vadd.f32 %v3636_v56, %v5125_v26 }
 0x1f5   : > { %v3206_v49 = vpack.c.bf16 %v2484_v11, %v2483_v35  ;;  %v2482_v63 = vadd.f32 %v2394_v7, %v4906_v36  ;;  %v2672_v12 = vadd.f32 %v2671_v3, %v2481_v9  ;;  %v2415_v33 = vadd.f32 %v3816_v40, %v3622_v19  ;;  %v5145_v29 = vpop.f32.mrf.mxu0  ;;  %v5230_v19 = vld [vmem:[#allocation6_spill] sm:$0xff] }
 0x1f6   : > { %v2740_v55 = vadd.f32 %v2739_v6, %v2709_v60  ;;  %v2406_v0 = vpop.f32.mrf.mxu1  ;;  %v2713_v54 = vmul.f32 %v2484_v11, %v2484_v11 }
 0x1f7   : > { %3269 = vst [vmem:[%s5067_s26 + $0x38] sm:$0xff] %v3206_v49   ;;  %v3201_v53 = vpack.c.bf16 %v2482_v63, %v2481_v9  ;;  %v2711_v51 = vmul.f32 %v2482_v63, %v2482_v63  ;;  %v2673_v52 = vadd.f32 %v2672_v12, %v2482_v63  ;;  %v2407_v36 = vadd.f32 %v3616_v18, %v2406_v0  ;;  %v5151_v15 = vpop.f32.mrf.mxu0  ;;  %v5231_v63 = vld [vmem:[#allocation8_spill] sm:$0xff]  ;;  %v5232_v12 = vld [vmem:[#allocation9_spill] sm:$0xff] }
 0x1f8   : > { %v2741_v17 = vadd.f32 %v2740_v55, %v2710_v61  ;;  %v3817_v16 = vpop.f32.mrf.mxu1  ;;  %v2487_v57 = vadd.f32 %v2415_v33, %v4944_v8 }
 0x1f9   : > { %3268 = vst [vmem:[%s5067_s26 + $0x30] sm:$0xff] %v3201_v53   ;;  %v2418_v14 = vadd.f32 %v3817_v16, %v3625_v2  ;;  %v2674_v44 = vadd.f32 %v2673_v52, %v2483_v35  ;;  %v2485_v20 = vadd.f32 %v2407_v36, %v4928_v50  ;;  %v3644_v32 = vpop.f32.mrf.mxu0  ;;  %v3640_v36 = vadd.f32 %v5140_v10, %v5133_v21 }
 0x1fa   : > { %v2742_v42 = vadd.f32 %v2741_v17, %v2711_v51  ;;  %v2409_v24 = vpop.f32.mrf.mxu1  ;;  %v2716_v6 = vmul.f32 %v2487_v57, %v2487_v57  ;;  %v5233_v17 = vld [vmem:[#allocation7_spill] sm:$0xff] }
 0x1fb   : > { %v2488_v43 = vadd.f32 %v2418_v14, %v5228_v4  ;;  %v2410_v25 = vadd.f32 %v3619_v48, %v2409_v24  ;;  %v2675_v59 = vadd.f32 %v2674_v44, %v2484_v11  ;;  %v2714_v8 = vmul.f32 %v2485_v20, %v2485_v20  ;;  %v3645_v22 = vpop.f32.mrf.mxu0 }
 0x1fc   : > { %v2743_v28 = vadd.f32 %v2742_v42, %v2712_v47  ;;  %v3820_v5 = vpop.f32.mrf.mxu1  ;;  %v3646_v46 = vadd.f32 %v3645_v22, %v3644_v32 }
 0x1fd   : > { %v3216_v41 = vpack.c.bf16 %v2488_v43, %v2487_v57  ;;  %v2486_v50 = vadd.f32 %v2410_v25, %v5229_v23  ;;  %v2676_v62 = vadd.f32 %v2675_v59, %v2485_v20  ;;  %v2431_v35 = vadd.f32 %v3820_v5, %v3634_v1  ;;  %v3647_v7 = vpop.f32.mrf.mxu0  ;;  %v5234_v1 = vld [vmem:[#allocation10_spill] sm:$0xff] }
 0x1fe   : > { %v2744_v30 = vadd.f32 %v2743_v28, %v2713_v54  ;;  %v2422_v39 = vpop.f32.mrf.mxu1  ;;  %v2717_v0 = vmul.f32 %v2488_v43, %v2488_v43  ;;  %v3643_v59 = vadd.f32 %v5151_v15, %v5145_v29 }
 0x1ff   : > { %3271 = vst [vmem:[%s5067_s26 + $0x48] sm:$0xff] %v3216_v41   ;;  %v3211_v9 = vpack.c.bf16 %v2486_v50, %v2485_v20  ;;  %v2715_v38 = vmul.f32 %v2486_v50, %v2486_v50  ;;  %v2677_v27 = vadd.f32 %v2676_v62, %v2486_v50  ;;  %v2423_v37 = vadd.f32 %v3628_v58, %v2422_v39  ;;  %v3648_v26 = vpop.f32.mrf.mxu0  ;;  %v5235_v58 = vld [vmem:[#allocation12_spill] sm:$0xff] }
 0x200   : > { %v2745_v11 = vadd.f32 %v2744_v30, %v2714_v8  ;;  %v3821_v60 = vpop.f32.mrf.mxu1  ;;  %v2491_v18 = vadd.f32 %v2431_v35, %v5231_v63  ;;  %v3649_v42 = vadd.f32 %v3648_v26, %v3647_v7  ;;  %v5236_v8 = vld [vmem:[#allocation13_spill] sm:$0xff] }
 0x201   : > { %3270 = vst [vmem:[%s5067_s26 + $0x40] sm:$0xff] %v3211_v9   ;;  %v2434_v45 = vadd.f32 %v3821_v60, %v3637_v13  ;;  %v2678_v3 = vadd.f32 %v2677_v27, %v2487_v57  ;;  %v2489_v49 = vadd.f32 %v2423_v37, %v5230_v19  ;;  %v3650_v51 = vpop.f32.mrf.mxu0 }
 0x202   : > { %v2746_v40 = vadd.f32 %v2745_v11, %v2715_v38  ;;  %v2425_v56 = vpop.f32.mrf.mxu1  ;;  %v2720_v10 = vmul.f32 %v2491_v18, %v2491_v18  ;;  %v5237_v11 = vld [vmem:[#allocation11_spill] sm:$0xff] }
 0x203   : > { %v2492_v61 = vadd.f32 %v2434_v45, %v5232_v12  ;;  %v2426_v55 = vadd.f32 %v3631_v34, %v2425_v56  ;;  %v2679_v53 = vadd.f32 %v2678_v3, %v2488_v43  ;;  %v2718_v48 = vmul.f32 %v2489_v49, %v2489_v49  ;;  %v3651_v47 = vpop.f32.mrf.mxu0 }
 0x204   : > { %v2747_v2 = vadd.f32 %v2746_v40, %v2716_v6  ;;  %v3824_v31 = vpop.f32.mrf.mxu1  ;;  %v3652_v15 = vadd.f32 %v3651_v47, %v3650_v51  ;;  %v5241_v47 = vld [vmem:[#allocation17_spill] sm:$0xff] }
 0x205   : > { %v3226_v33 = vpack.c.bf16 %v2492_v61, %v2491_v18  ;;  %v2490_v52 = vadd.f32 %v2426_v55, %v5233_v17  ;;  %v2680_v16 = vadd.f32 %v2679_v53, %v2489_v49  ;;  %v2447_v57 = vadd.f32 %v3824_v31, %v3646_v46  ;;  %v3653_v54 = vpop.f32.mrf.mxu0  ;;  %v5239_v17 = vld [vmem:[#allocation16_spill] sm:$0xff] }
 0x206   : > { %v2748_v14 = vadd.f32 %v2747_v2, %v2717_v0  ;;  %v2438_v44 = vpop.f32.mrf.mxu1  ;;  %v2721_v39 = vmul.f32 %v2492_v61, %v2492_v61  ;;  %v5238_v2 = vld [vmem:[#allocation14_spill] sm:$0xff] }
 0x207   : > { %3273 = vst [vmem:[%s5067_s26 + $0x58] sm:$0xff] %v3226_v33   ;;  %v3221_v20 = vpack.c.bf16 %v2490_v52, %v2489_v49  ;;  %v2719_v24 = vmul.f32 %v2490_v52, %v2490_v52  ;;  %v2681_v43 = vadd.f32 %v2680_v16, %v2490_v52  ;;  %v2439_v25 = vadd.f32 %v3640_v36, %v2438_v44  ;;  %v3654_v23 = vpop.f32.mrf.mxu0  ;;  %v5240_v52 = vld [vmem:[#allocation2_spill] sm:$0xff]  ;;  %v5242_v44 = vld [vmem:[#allocation3_spill] sm:$0xff] }
 0x208   : > { %v2749_v4 = vadd.f32 %v2748_v14, %v2718_v48  ;;  %v3825_v28 = vpop.f32.mrf.mxu1  ;;  %v2495_v62 = vadd.f32 %v2447_v57, %v5235_v58  ;;  %v3655_v12 = vadd.f32 %v3654_v23, %v3653_v54  ;;  %v1948_v36 = vadd.f32 %v5240_v52, %v5239_v17 }
 0x209   : > { %3272 = vst [vmem:[%s5067_s26 + $0x50] sm:$0xff] %v3221_v20   ;;  %v2450_v21 = vadd.f32 %v3825_v28, %v3649_v42  ;;  %v2682_v32 = vadd.f32 %v2681_v43, %v2491_v18  ;;  %v2493_v41 = vadd.f32 %v2439_v25, %v5234_v1  ;;  %v3656_v38 = vpop.f32.mrf.mxu0  ;;  %v1951_v42 = vadd.f32 %v5242_v44, %v5241_v47 }
 0x20a   : > { %v2750_v5 = vadd.f32 %v2749_v4, %v2719_v24  ;;  %v2441_v50 = vpop.f32.mrf.mxu1  ;;  %v2724_v18 = vmul.f32 %v2495_v62, %v2495_v62  ;;  %v5243_v24 = vld [vmem:[#allocation15_spill] sm:$0xff] }
 0x20b   : > { %v2496_v30 = vadd.f32 %v2450_v21, %v5236_v8  ;;  %v2442_v22 = vadd.f32 %v3643_v59, %v2441_v50  ;;  %v2683_v9 = vadd.f32 %v2682_v32, %v2492_v61  ;;  %v2722_v7 = vmul.f32 %v2493_v41, %v2493_v41  ;;  %v3657_v34 = vpop.f32.mrf.mxu0 }
 0x20c   : > { %v2751_v13 = vadd.f32 %v2750_v5, %v2720_v10  ;;  %v3828_v29 = vpop.f32.mrf.mxu1  ;;  %v3658_v40 = vadd.f32 %v3657_v34, %v3656_v38 }
 0x20d   : > { %v3236_v35 = vpack.c.bf16 %v2496_v30, %v2495_v62  ;;  %v2494_v27 = vadd.f32 %v2442_v22, %v5237_v11  ;;  %v2684_v37 = vadd.f32 %v2683_v9, %v2493_v41  ;;  %v3659_v56 = vpop.f32.mrf.mxu0  ;;  %v2725_v16 = vmul.f32 %v2496_v30, %v2496_v30 }
 0x20e   : > { %v2752_v60 = vadd.f32 %v2751_v13, %v2721_v39  ;;  %v2454_v45 = vpop.f32.mrf.mxu1  ;;  %v2463_v0 = vadd.f32 %v3828_v29, %v3658_v40 }
 0x20f   : > { %3275 = vst [vmem:[%s5067_s26 + $0x68] sm:$0xff] %v3236_v35   ;;  %v3231_v6 = vpack.c.bf16 %v2494_v27, %v2493_v41  ;;  %v2723_v3 = vmul.f32 %v2494_v27, %v2494_v27  ;;  %v2455_v19 = vadd.f32 %v3652_v15, %v2454_v45  ;;  %v2685_v26 = vadd.f32 %v2684_v37, %v2494_v27  ;;  %v3660_v51 = vpop.f32.mrf.mxu0 }
 0x210   : > { %v2753_v49 = vadd.f32 %v2752_v60, %v2722_v7  ;;  %v3829_v63 = vpop.f32.mrf.mxu1  ;;  %v3661_v46 = vadd.f32 %v3660_v51, %v3659_v56  ;;  %v2499_v4 = vadd.f32 %v2463_v0, %v1948_v36 }
 0x211   : > { %3274 = vst [vmem:[%s5067_s26 + $0x60] sm:$0xff] %v3231_v6   ;;  %v2686_v61 = vadd.f32 %v2685_v26, %v2495_v62  ;;  %v2497_v53 = vadd.f32 %v2455_v19, %v5238_v2 }
 0x212   : > { %v2754_v55 = vadd.f32 %v2753_v49, %v2723_v3  ;;  %v2457_v31 = vpop.f32.mrf.mxu1  ;;  %v2466_v20 = vadd.f32 %v3829_v63, %v3661_v46  ;;  %v2728_v1 = vmul.f32 %v2499_v4, %v2499_v4 }
 0x213   : > { %v2458_v33 = vadd.f32 %v3655_v12, %v2457_v31  ;;  %v2687_v14 = vadd.f32 %v2686_v61, %v2496_v30  ;;  %v2726_v25 = vmul.f32 %v2497_v53, %v2497_v53 }
 0x214   : > { %v2755_v48 = vadd.f32 %v2754_v55, %v2724_v18  ;;  %v2500_v28 = vadd.f32 %v2466_v20, %v1951_v42 }
 0x215   : > { %v2498_v57 = vadd.f32 %v2458_v33, %v5243_v24  ;;  %v2688_v43 = vadd.f32 %v2687_v14, %v2497_v53 }
 0x216   : > { %v2756_v54 = vadd.f32 %v2755_v48, %v2725_v16  ;;  %v3246_v5 = vpack.c.bf16 %v2500_v28, %v2499_v4  ;;  %v2729_v50 = vmul.f32 %v2500_v28, %v2500_v28 }
 0x217   : > { %v3241_v59 = vpack.c.bf16 %v2498_v57, %v2497_v53  ;;  %v2727_v21 = vmul.f32 %v2498_v57, %v2498_v57  ;;  %v2689_v32 = vadd.f32 %v2688_v43, %v2498_v57 }
 0x218   : > { %v2757_v10 = vadd.f32 %v2756_v54, %v2726_v25  ;;  %3277 = vst [vmem:[%s5067_s26 + $0x78] sm:$0xff] %v3246_v5  }
 0x219   : > { %3276 = vst [vmem:[%s5067_s26 + $0x70] sm:$0xff] %v3241_v59   ;;  %v2690_v41 = vadd.f32 %v2689_v32, %v2499_v4 }
 0x21a   : > { %v2758_v23 = vadd.f32 %v2757_v10, %v2727_v21 }
 0x21b   : > { %v2691_v58 = vadd.f32 %v2690_v41, %v2500_v28 }
 0x21c   : > { %v2759_v62 = vadd.f32 %v2758_v23, %v2728_v1 }
 0x21d   : > { %v2692_v8 = vrot.slane %v2691_v58, 4 }
 0x21e   : > { %v2760_v30 = vadd.f32 %v2759_v62, %v2729_v50 }
 0x21f   : > { %v2693_v22 = vadd.f32 %v2692_v8, %v2691_v58 }
 0x220   : > { %v2761_v39 = vrot.slane %v2760_v30, 4 }
 0x221   : > { %v2694_v13 = vrot.slane %v2693_v22, 2 }
 0x222   : > { %v2762_v9 = vadd.f32 %v2761_v39, %v2760_v30 }
 0x223   : > { %v2695_v38 = vadd.f32 %v2694_v13, %v2693_v22 }
 0x224   : > { %v2763_v29 = vrot.slane %v2762_v9, 2 }
 0x225   : > { %v2696_v15 = vrot.slane %v2695_v38, 1 }
 0x226   : > { %v2764_v35 = vadd.f32 %v2763_v29, %v2762_v9 }
 0x227   : > { %v2697_v27 = vadd.f32 %v2696_v15, %v2695_v38 }
 0x228   : > { %v2765_v11 = vrot.slane %v2764_v35, 1 }
 0x22a   : > { %v2766_v37 = vadd.f32 %v2765_v11, %v2764_v35 }
 0x22c   : > { %v2768_v7 = vsel %vm571_vm0, %v2697_v27, %v2766_v37 }
 0x22d   : > { %2769 = vst [vmem:[%s235_s28] sm:$0x3] %v2768_v7 }
 0x22e PF: > { %s16_s18 = sadd.s32 1, %s3935_s18  }
 0x22f   : > { %p13_p4 = scmp.ge.s32.totalorder %s16_s18, 4  }
 0x231   :  { %15 = sbr.rel (!%p13_p4) target bundleno = 1 (0x1), region = 80 }

// kernel: basic_block_forward.3
= control target key start
LH: loop header
LB: loop body
LE: loop exit
PB: predicated region body
PF: predicated region fallthrough
CT: control target
= control target key end

     0   :  { %s3775_s12 = smov 0   ;;  %s4936_s0 = inlined_call_operand.vmem [shape: bf16[2,16,16,128], index: 0, kind: input, shape index: {}]   ;;  %s4937_s1 = inlined_call_operand.vmem [shape: bf16[3,384,128], index: 1, kind: input, shape index: {}]   ;;  %s4938_s2 = inlined_call_operand.vmem [shape: bf16[2,16,16,128], index: 2, kind: output, shape index: {0}]   ;;  %s4939_s3 = inlined_call_operand.vmem [shape: f32[2,2,128], index: 3, kind: output, shape index: {1}]  }
   0x1 LB: > { %s2724_s13 = sadd.s32 4294967295, %s3752_s12   ;;  %p2728_p0 = scmp.ge.s32.totalorder %s3752_s12, 1  ;;  %s3752_s12 = sphi %s3775_s12, %s14_s12  }
   0x2   : > { %p140_p1 = scmp.lt.s32.totalorder %s3752_s12, 3 }
   0x4   : > { %p141_p2 = pnand %p2728_p0, %p140_p1 }
   0x6   : > { %144 = sbr.rel (%p141_p2) target bundleno = 550 (0x226), region = 28 }
   0xb   : > { %v3658_v0 = vld [vmem:[%s4937_s1 + $0x138] sm:$0xff]   ;;  %v3660_v2 = vld [vmem:[%s4937_s1 + $0x130] sm:$0xff]   ;;  %p168_p3 = scmp.lt.s32.totalorder %s2724_s13, 1  ;;  %v3662_v4 = vld [vmem:[%s4937_s1 + $0x128] sm:$0xff]   ;;  %vm439_vm0 = vcmask 1040384   ;;  %vm725_vm4 = vcmask 1046528  }
   0xc   : > { %v3659_v1 = vld [vmem:[%s4937_s1 + $0xf8] sm:$0xff]   ;;  %3081 = vmatprep.subr.bf16.mxu0 %v3658_v0  ;;  %3633 = vmatprep.subr.bf16.mxu1 %v3658_v0  ;;  %v3661_v3 = vld [vmem:[%s4937_s1 + $0xf0] sm:$0xff]   ;;  %v3663_v5 = vld [vmem:[%s4937_s1 + $0xe8] sm:$0xff]   ;;  %vm440_vm1 = vsmask.f32 256 }
   0xd   : > { %3082 = vmatpush3.bf16.msra.mxu0 %v3659_v1  ;;  %3641 = vmatpush3.bf16.msra.mxu1 %v3659_v1  ;;  %s4987_s13 = smov (!%p168_p3, %s2724_s13), 1  ;;  %v3664_v6 = vld [vmem:[%s4937_s1 + $0x120] sm:$0xff]   ;;  %v3666_v8 = vld [vmem:[%s4937_s1 + $0x118] sm:$0xff]   ;;  %v3668_v10 = vld [vmem:[%s4937_s1 + $0x110] sm:$0xff]   ;;  %vm474_vm3 = vsmask.f32 7424 }
   0xe   : > { %3083 = vmatprep.subr.bf16.mxu0 %v3660_v2  ;;  %3634 = vmatprep.subr.bf16.mxu1 %v3660_v2  ;;  %s2952_s28 = sshll.u32 %s4987_s13, 7  ;;  %v3665_v7 = vld [vmem:[%s4937_s1 + $0xe0] sm:$0xff]   ;;  %v3667_v9 = vld [vmem:[%s4937_s1 + $0xd8] sm:$0xff]   ;;  %v3669_v15 = vld [vmem:[%s4937_s1 + $0xd0] sm:$0xff]  }
   0xf   : > { %s3818_s8 = scalar_lea.vmem %s4936_s0, %s2952_s28  ;;  %v3670_v16 = vld [vmem:[%s4937_s1 + $0x108] sm:$0xff]   ;;  %vm3835_vm2 = vmand %vm439_vm0, %vm440_vm1  ;;  %v3672_v28 = vld [vmem:[%s4937_s1 + $0x100] sm:$0xff]   ;;  %s4811_s21 = scalar_lea.vmem %s4938_s2, %s2952_s28 }
  0x10   : > { %v3674_v11 = vld [vmem:[%s3818_s8] sm:$0xff]   ;;  %v3671_v21 = vld [vmem:[%s4937_s1 + $0xc8] sm:$0xff]   ;;  %v3676_v45 = vld [vmem:[%s4937_s1 + $0x178] sm:$0xff]   ;;  %s2733_s28 = sshll.u32 %s4987_s13, 1 }
  0x11   : > { %3084 = vmatpush3.bf16.msra.mxu0 %v3661_v3  ;;  %3642 = vmatpush3.bf16.msra.mxu1 %v3661_v3  ;;  %v296_v12 = vshrl.u32 %v3674_v11, 16  ;;  %v299_v13 = vshll.u32 %v3674_v11, 16  ;;  %v3675_v14 = vld [vmem:[%s3818_s8 + $0x60] sm:$0xff]   ;;  %v3679_v25 = vld [vmem:[%s3818_s8 + $0x8] sm:$0xff]   ;;  %v3677_v53 = vld [vmem:[%s4937_s1 + $0xb8] sm:$0xff]   ;;  %s181_s24 = scalar_lea.vmem %s4939_s3, %s2733_s28 }
  0x12   : > { %3085 = vmatprep.subr.bf16.mxu0 %v3662_v4  ;;  %3635 = vmatprep.subr.bf16.mxu1 %v3662_v4  ;;  %v380_v19 = vshrl.u32 %v3675_v14, 16  ;;  %v383_v20 = vshll.u32 %v3675_v14, 16  ;;  %v3680_v27 = vld [vmem:[%s3818_s8 + $0x68] sm:$0xff]   ;;  %v303_v32 = vshrl.u32 %v3679_v25, 16  ;;  %v3673_v33 = vld [vmem:[%s4937_s1 + $0xc0] sm:$0xff]   ;;  %v306_v39 = vshll.u32 %v3679_v25, 16 }
  0x13   : > { %v298_v17 = vrot.slane %v296_v12, 7  ;;  %v387_v40 = vshrl.u32 %v3680_v27, 16  ;;  %v390_v49 = vshll.u32 %v3680_v27, 16  ;;  %v3684_v62 = vld [vmem:[%s3818_s8 + $0x10] sm:$0xff]  }
  0x14   : > { %v382_v24 = vrot.slane %v380_v19, 7  ;;  %v305_v38 = vrot.slane %v303_v32, 7  ;;  %v3685_v63 = vld [vmem:[%s3818_s8 + $0x70] sm:$0xff]   ;;  %v313_v11 = vshll.u32 %v3684_v62, 16  ;;  %v3682_v32 = vld [vmem:[%s4937_s1 + $0x160] sm:$0xff]  }
  0x15   : > { %3086 = vmatpush3.bf16.msra.mxu0 %v3663_v5  ;;  %3643 = vmatpush3.bf16.msra.mxu1 %v3663_v5  ;;  %v301_v22 = vor.u32 %v299_v13, %v298_v17  ;;  %v3844_v23 = vsel %vm3835_vm2, %v298_v17, 0  ;;  %v389_v48 = vrot.slane %v387_v40, 7  ;;  %v3683_v3 = vld [vmem:[%s4937_s1 + $0xb0] sm:$0xff]   ;;  %v394_v12 = vshrl.u32 %v3685_v63, 16 }
  0x16   : > { %3087 = vmatprep.subr.bf16.mxu0 %v3664_v6  ;;  %3636 = vmatprep.subr.bf16.mxu1 %v3664_v6  ;;  %v491_v26 = vshll.u32 %v3844_v23, 16  ;;  %v385_v30 = vor.u32 %v383_v20, %v382_v24  ;;  %v3858_v31 = vsel %vm3835_vm2, %v382_v24, 0  ;;  %v308_v46 = vor.u32 %v306_v39, %v305_v38  ;;  %v3678_v5 = vld [vmem:[%s4937_s1 + $0x170] sm:$0xff]  }
  0x17   : > { %v3854_v29 = vsel %vm3835_vm2, 0, %v301_v22  ;;  %v635_v36 = vshll.u32 %v3858_v31, 16  ;;  %v3877_v47 = vsel %vm3835_vm2, %v305_v38, 0  ;;  %v392_v56 = vor.u32 %v390_v49, %v389_v48  ;;  %v3688_v22 = vld [vmem:[%s3818_s8 + $0x18] sm:$0xff]  }
  0x18   : > { %v484_v34 = vshrl.u32 %v3854_v29, 16  ;;  %v486_v35 = vshll.u32 %v3854_v29, 16  ;;  %v3868_v37 = vsel %vm3835_vm2, 0, %v385_v30  ;;  %v493_v42 = vrot.slane %v491_v26, 1 }
  0x19   : > { %3088 = vmatpush3.bf16.msra.mxu0 %v3665_v7  ;;  %3644 = vmatpush3.bf16.msra.mxu1 %v3665_v7  ;;  %v628_v43 = vshrl.u32 %v3868_v37, 16  ;;  %v630_v44 = vshll.u32 %v3868_v37, 16  ;;  %v637_v52 = vrot.slane %v635_v36, 1  ;;  %v503_v54 = vshll.u32 %v3877_v47, 16  ;;  %v3691_v36 = vld [vmem:[%s4937_s1 + $0xa8] sm:$0xff]  }
  0x1a   : > { %3089 = vmatprep.subr.bf16.mxu0 %v3666_v8  ;;  %3637 = vmatprep.subr.bf16.mxu1 %v3666_v8  ;;  %v488_v41 = vrot.slane %v486_v35, 1  ;;  %v3885_v55 = vsel %vm3835_vm2, 0, %v308_v46  ;;  %v3889_v57 = vsel %vm3835_vm2, %v389_v48, 0  ;;  %v3901_v1 = vsel %vm3835_vm2, 0, %v392_v56 }
  0x1b   : > { %v632_v51 = vrot.slane %v630_v44, 1  ;;  %v496_v60 = vshrl.u32 %v3885_v55, 16  ;;  %v498_v61 = vshll.u32 %v3885_v55, 16  ;;  %v505_v0 = vrot.slane %v503_v54, 1 }
  0x1c   : > { %v489_v50 = vor.u32 %v488_v41, %v484_v34  ;;  %v647_v2 = vshll.u32 %v3889_v57, 16  ;;  %v640_v7 = vshrl.u32 %v3901_v1, 16  ;;  %v642_v8 = vshll.u32 %v3901_v1, 16 }
  0x1d   : > { %3090 = vmatpush3.bf16.msra.mxu0 %v3667_v9  ;;  %3645 = vmatpush3.bf16.msra.mxu1 %v3667_v9  ;;  %v633_v59 = vor.u32 %v632_v51, %v628_v43  ;;  %v500_v6 = vrot.slane %v498_v61, 1  ;;  %v396_v19 = vrot.slane %v394_v12, 7  ;;  %v317_v35 = vshrl.u32 %v3688_v22, 16  ;;  %v3686_v61 = vld [vmem:[%s4937_s1 + $0x158] sm:$0xff]   ;;  %v3696_v12 = vld [vmem:[%s4937_s1 + $0xa0] sm:$0xff]  }
  0x1e   : > { %3091 = vmatprep.subr.bf16.mxu0 %v3668_v10  ;;  %3638 = vmatprep.subr.bf16.mxu1 %v3668_v10  ;;  %v3892_v58 = vsel %vm474_vm3, %v489_v50, %v493_v42  ;;  %v649_v9 = vrot.slane %v647_v2, 1  ;;  %v310_v10 = vshrl.u32 %v3684_v62, 16  ;;  %v644_v14 = vrot.slane %v642_v8, 1  ;;  %v3693_v2 = vld [vmem:[%s3818_s8 + $0x20] sm:$0xff]   ;;  %v3687_v8 = vld [vmem:[%s4937_s1 + $0x150] sm:$0xff]  }
  0x1f   : > { %1066 = vmatprep.mubr.bf16.mxu0 %v3892_v58  ;;  %v3908_v4 = vsel %vm474_vm3, %v633_v59, %v637_v52  ;;  %v501_v13 = vor.u32 %v500_v6, %v496_v60  ;;  %v3932_v27 = vsel %vm3835_vm2, %v396_v19, 0  ;;  %v320_v40 = vshll.u32 %v3688_v22, 16 }
  0x20   : > { %1162 = vmatprep.mubr.bf16.mxu1 %v3908_v4  ;;  %v312_v17 = vrot.slane %v310_v10, 7  ;;  %v659_v34 = vshll.u32 %v3932_v27, 16  ;;  %v319_v49 = vrot.slane %v317_v35, 7  ;;  %v728_v6 = vrot.slane %v3854_v29, 1 }
  0x21   : > { %3092 = vmatpush3.bf16.msra.mxu0 %v3669_v15  ;;  %3646 = vmatpush3.bf16.msra.mxu1 %v3669_v15  ;;  %v3681_v15 = vld [vmem:[%s4937_s1 + $0x168] sm:$0xff]   ;;  %v3922_v20 = vsel %vm474_vm3, %v501_v13, %v505_v0 }
  0x22   : > { %3093 = vmatprep.subr.bf16.mxu0 %v3670_v16  ;;  %3639 = vmatprep.subr.bf16.mxu1 %v3670_v16  ;;  %v397_v16 = vshll.u32 %v3685_v63, 16  ;;  %v315_v24 = vor.u32 %v313_v11, %v312_v17  ;;  %v3928_v25 = vsel %vm3835_vm2, %v312_v17, 0  ;;  %v661_v48 = vrot.slane %v659_v34, 1  ;;  %v3697_v17 = vld [vmem:[%s3818_s8 + $0x28] sm:$0xff]  }
  0x23   : > { %v322_v54 = vor.u32 %v320_v40, %v319_v49  ;;  %v3963_v56 = vsel %vm3835_vm2, %v319_v49, 0  ;;  %v334_v34 = vshll.u32 %v3697_v17, 16  ;;  %v729_v40 = vrot.slane %v3844_v23, 1 }
  0x24   : > { %v399_v26 = vor.u32 %v397_v16, %v396_v19  ;;  %v3949_v38 = vsel %vm3835_vm2, 0, %v315_v24  ;;  %v527_v62 = vshll.u32 %v3963_v56, 16  ;;  %v324_v16 = vshrl.u32 %v3693_v2, 16 }
  0x25   : > { %3094 = vmatpush3.bf16.msra.mxu0 %v3671_v21  ;;  %3647 = vmatpush3.bf16.msra.mxu1 %v3671_v21  ;;  %v645_v21 = vor.u32 %v644_v14, %v640_v7  ;;  %v508_v42 = vshrl.u32 %v3949_v38, 16  ;;  %v510_v43 = vshll.u32 %v3949_v38, 16  ;;  %v327_v24 = vshll.u32 %v3693_v2, 16 }
  0x26   : > { %3095 = vmatprep.subr.bf16.mxu0 %v3672_v28  ;;  %3640 = vmatprep.subr.bf16.mxu1 %v3672_v28  ;;  %v3689_v28 = vld [vmem:[%s3818_s8 + $0x78] sm:$0xff]   ;;  %v3953_v39 = vsel %vm3835_vm2, 0, %v399_v26  ;;  %v529_v11 = vrot.slane %v527_v62, 1  ;;  %v326_v26 = vrot.slane %v324_v16, 7 }
  0x27   : > { %v3936_v30 = vsel %vm474_vm3, %v645_v21, %v649_v9  ;;  %v401_v41 = vshrl.u32 %v3689_v28, 16  ;;  %v654_v46 = vshll.u32 %v3953_v39, 16  ;;  %v512_v51 = vrot.slane %v510_v43, 1 }
  0x28   : > { %v404_v52 = vshll.u32 %v3689_v28, 16  ;;  %v331_v28 = vshrl.u32 %v3697_v17, 16  ;;  %v329_v35 = vor.u32 %v327_v24, %v326_v26 }
  0x29   : > { %3096 = vmatpush3.bf16.msra.mxu0 %v3673_v33  ;;  %3648 = vmatpush3.bf16.msra.mxu1 %v3673_v33  ;;  %v515_v33 = vshll.u32 %v3928_v25, 16  ;;  %v403_v50 = vrot.slane %v401_v41, 7  ;;  %v513_v60 = vor.u32 %v512_v51, %v508_v42 }
  0x2a   : > { %3489 = vmatprep.subr.bf16.mxu1 %v3676_v45  ;;  %3537 = vmatprep.subr.bf16.mxu0 %v3677_v53  ;;  %v333_v41 = vrot.slane %v331_v28, 7  ;;  %v3704_v28 = vld [vmem:[%s3818_s8 + $0x38] sm:$0xff]  }
  0x2b   : > { %v517_v44 = vrot.slane %v515_v33, 1  ;;  %v3967_v59 = vsel %vm3835_vm2, %v403_v50, 0  ;;  %v406_v63 = vor.u32 %v404_v52, %v403_v50  ;;  %v3700_v52 = vld [vmem:[%s3818_s8 + $0x30] sm:$0xff]  }
  0x2c   : > { %1067 = vmatmul.mubr.bf16.vlgmr.msra.gmra.mxu0 %v3854_v29  ;;  %1163 = vmatmul.mubr.bf16.vlgmr.msra.gmra.mxu1 %v3868_v37  ;;  %v671_v0 = vshll.u32 %v3967_v59, 16  ;;  %v4024_v23 = vsel %vm3835_vm2, %v333_v41, 0 }
  0x2d   : > { %3538 = vmatpush3.bf16.msra.mxu0 %v3677_v53  ;;  %3490 = vmatpush3.bf16.msra.mxu1 %v3676_v45  ;;  %v652_v45 = vshrl.u32 %v3953_v39, 16  ;;  %v656_v53 = vrot.slane %v654_v46, 1  ;;  %v3981_v7 = vsel %vm474_vm3, %v513_v60, %v517_v44  ;;  %v3997_v14 = vsel %vm3835_vm2, 0, %v406_v63  ;;  %v3690_v44 = vld [vmem:[%s4937_s1 + $0x148] sm:$0xff]  }
  0x2e   : > { %3539 = vmatprep.subr.bf16.mxu0 %v3683_v3  ;;  %3491 = vmatprep.subr.bf16.mxu1 %v3678_v5  ;;  %v664_v21 = vshrl.u32 %v3997_v14, 16  ;;  %v666_v22 = vshll.u32 %v3997_v14, 16  ;;  %v4020_v46 = vsel %vm3835_vm2, 0, %v329_v35  ;;  %v4037_v60 = vsel %vm725_vm4, %v728_v6, %v729_v40 }
  0x2f   : > { %1074 = vmatprep.mubr.bf16.mxu0 %v3922_v20  ;;  %1170 = vmatprep.mubr.bf16.mxu1 %v3936_v30  ;;  %v532_v50 = vshrl.u32 %v4020_v46, 16  ;;  %v534_v51 = vshll.u32 %v4020_v46, 16  ;;  %v551_v62 = vshll.u32 %v4024_v23, 16  ;;  %v731_v6 = vrot.slane %v3885_v55, 1 }
  0x30   : > { %v668_v33 = vrot.slane %v666_v22, 1  ;;  %v345_v35 = vshrl.u32 %v3704_v28, 16  ;;  %v348_v40 = vshll.u32 %v3704_v28, 16 }
  0x31   : > { %3540 = vmatpush3.bf16.msra.mxu0 %v3683_v3  ;;  %3492 = vmatpush3.bf16.msra.mxu1 %v3678_v5  ;;  %v657_v3 = vor.u32 %v656_v53, %v652_v45  ;;  %v3977_v5 = vsel %vm3835_vm2, 0, %v322_v54  ;;  %v3692_v53 = vld [vmem:[%s4937_s1 + $0x140] sm:$0xff]   ;;  %v536_v63 = vrot.slane %v534_v51, 1  ;;  %v553_v17 = vrot.slane %v551_v62, 1  ;;  %v3707_v62 = vld [vmem:[%s4937_s1 + $0x90] sm:$0xff]  }
  0x32   : > { %3493 = vmatprep.subr.bf16.mxu1 %v3681_v15  ;;  %3541 = vmatprep.subr.bf16.mxu0 %v3691_v36  ;;  %v520_v9 = vshrl.u32 %v3977_v5, 16  ;;  %v522_v10 = vshll.u32 %v3977_v5, 16  ;;  %v669_v43 = vor.u32 %v668_v33, %v664_v21  ;;  %v737_v33 = vrot.slane %v3977_v5, 1 }
  0x33   : > { %v3993_v13 = vsel %vm474_vm3, %v657_v3, %v661_v48  ;;  %v336_v48 = vor.u32 %v334_v34, %v333_v41  ;;  %v338_v3 = vshrl.u32 %v3700_v52, 16  ;;  %v738_v51 = vrot.slane %v3963_v56, 1  ;;  %v3701_v56 = vld [vmem:[%s4937_s1 + $0x68] sm:$0xff]  }
  0x34   : > { %1075 = vmatmul.mubr.bf16.gmra.mxu0 %v3885_v55  ;;  %1171 = vmatmul.mubr.bf16.gmra.mxu1 %v3901_v1  ;;  %4945 = vst [vmem:[#allocation2_spill] sm:$0xff] %v3993_v13  ;;  %v524_v19 = vrot.slane %v522_v10, 1  ;;  %v537_v10 = vor.u32 %v536_v63, %v532_v50 }
  0x35   : > { %3542 = vmatpush3.bf16.msra.mxu0 %v3691_v36  ;;  %3494 = vmatpush3.bf16.msra.mxu1 %v3681_v15  ;;  %v673_v15 = vrot.slane %v671_v0, 1  ;;  %v4007_v36 = vsel %vm3835_vm2, %v326_v26, 0  ;;  %v340_v16 = vrot.slane %v338_v3, 7 }
  0x36   : > { %3495 = vmatprep.subr.bf16.mxu1 %v3682_v32  ;;  %1082 = vmatprep.mubr.bf16.mxu0 %v3981_v7  ;;  %v539_v45 = vshll.u32 %v4007_v36, 16 }
  0x37   : > { %1178 = vmatprep.mubr.bf16.mxu1 %v3993_v13  ;;  %3543 = vmatprep.subr.bf16.mxu0 %v3696_v12  ;;  %v4027_v49 = vsel %vm474_vm3, %v669_v43, %v673_v15  ;;  %v734_v15 = vrot.slane %v3949_v38, 1  ;;  %v4064_v26 = vsel %vm3835_vm2, %v340_v16, 0  ;;  %v3698_v43 = vld [vmem:[%s4937_s1 + $0x70] sm:$0xff]  }
  0x38   : > { %4946 = vst [vmem:[#allocation3_spill] sm:$0xff] %v4027_v49  ;;  %v541_v54 = vrot.slane %v539_v45, 1 }
  0x39   : > { %3496 = vmatpush3.bf16.msra.mxu1 %v3682_v32  ;;  %v525_v32 = vor.u32 %v524_v19, %v520_v9  ;;  %3544 = vmatpush3.bf16.msra.mxu0 %v3696_v12  ;;  %v341_v9 = vshll.u32 %v3700_v52, 16  ;;  %v735_v19 = vrot.slane %v3928_v25, 1  ;;  %v3695_v25 = vld [vmem:[%s4937_s1 + $0x38] sm:$0xff]   ;;  %v347_v52 = vrot.slane %v345_v35, 7 }
  0x3a   : > { %3497 = vmatprep.subr.bf16.mxu1 %v3686_v61  ;;  %v4060_v21 = vsel %vm474_vm3, %v537_v10, %v541_v54  ;;  %v3709_v10 = vld [vmem:[%s3818_s8 + $0x48] sm:$0xff]  }
  0x3b   : > { %v4011_v42 = vsel %vm474_vm3, %v525_v32, %v529_v11  ;;  %v3694_v11 = vld [vmem:[%s4937_s1 + $0x78] sm:$0xff]   ;;  %v343_v24 = vor.u32 %v341_v9, %v340_v16  ;;  %v4089_v50 = vsel %vm725_vm4, %v734_v15, %v735_v19  ;;  %v350_v63 = vor.u32 %v348_v40, %v347_v52 }
  0x3c   : > { %1083 = vmatmul.mubr.bf16.gmra.mxu0 %v3949_v38  ;;  %1179 = vmatmul.mubr.bf16.gmra.mxu1 %v3953_v39  ;;  %v741_v9 = vrot.slane %v4007_v36, 1  ;;  %v362_v35 = vshll.u32 %v3709_v10, 16  ;;  %v4127_v40 = vsel %vm725_vm4, %v737_v33, %v738_v51  ;;  %v747_v51 = vrot.slane %v4064_v26, 1 }
  0x3d   : > { %3498 = vmatpush3.bf16.msra.mxu1 %v3686_v61  ;;  %1090 = vmatprep.mubr.bf16.mxu0 %v4011_v42  ;;  %v4041_v61 = vsel %vm3835_vm2, 0, %v336_v48  ;;  %v4077_v34 = vsel %vm3835_vm2, 0, %v343_v24  ;;  %v563_v48 = vshll.u32 %v4064_v26, 16 }
  0x3e   : > { %3499 = vmatprep.subr.bf16.mxu1 %v3687_v8  ;;  %1186 = vmatprep.mubr.bf16.mxu1 %v4027_v49  ;;  %v544_v0 = vshrl.u32 %v4041_v61, 16  ;;  %v546_v2 = vshll.u32 %v4041_v61, 16  ;;  %v558_v45 = vshll.u32 %v4077_v34, 16  ;;  %v746_v33 = vrot.slane %v4077_v34, 1  ;;  %v3716_v49 = vld [vmem:[%s4937_s1 + $0x88] sm:$0xff]  }
  0x40   : > { %v548_v12 = vrot.slane %v546_v2, 1  ;;  %v560_v54 = vrot.slane %v558_v45, 1  ;;  %v3708_v2 = vld [vmem:[%s3818_s8 + $0x40] sm:$0xff]  }
  0x41   : > { %3500 = vmatpush3.bf16.msra.mxu1 %v3687_v8  ;;  %v732_v8 = vrot.slane %v3877_v47, 1  ;;  %v3703_v47 = vld [vmem:[%s4937_s1 + $0x98] sm:$0xff]   ;;  %v352_v15 = vshrl.u32 %v3708_v2, 16  ;;  %v355_v16 = vshll.u32 %v3708_v2, 16 }
  0x42   : > { %3501 = vmatprep.subr.bf16.mxu1 %v3690_v44  ;;  %v549_v22 = vor.u32 %v548_v12, %v544_v0  ;;  %3545 = vmatprep.subr.bf16.mxu0 %v3703_v47  ;;  %v4106_v0 = vsel %vm3835_vm2, %v347_v52, 0  ;;  %v4116_v12 = vsel %vm3835_vm2, 0, %v350_v63 }
  0x43   : > { %v4069_v32 = vsel %vm725_vm4, %v731_v6, %v732_v8  ;;  %3546 = vmatpush3.bf16.msra.mxu0 %v3703_v47  ;;  %v565_v8 = vrot.slane %v563_v48, 1  ;;  %v740_v6 = vrot.slane %v4020_v46, 1  ;;  %v744_v47 = vrot.slane %v4024_v23, 1  ;;  %v3705_v48 = vld [vmem:[%s4937_s1 + $0x60] sm:$0xff]  }
  0x44   : > { %1091 = vmatmul.mubr.bf16.gmra.mxu0 %v3977_v5  ;;  %1187 = vmatmul.mubr.bf16.gmra.mxu1 %v3997_v14  ;;  %v4080_v41 = vsel %vm474_vm3, %v549_v22, %v553_v17  ;;  %v3702_v17 = vld [vmem:[%s4937_s1 + $0x28] sm:$0xff]   ;;  %v570_v19 = vshll.u32 %v4116_v12, 16  ;;  %v575_v36 = vshll.u32 %v4106_v0, 16  ;;  %v3712_v22 = vld [vmem:[%s3818_s8 + $0x50] sm:$0xff]   ;;  %v568_v24 = vshrl.u32 %v4116_v12, 16 }
  0x45   : > { %3502 = vmatpush3.bf16.msra.mxu1 %v3690_v44  ;;  %3505 = vmatprep.mubr.bf16.mxu1 %v4037_v60  ;;  %v556_v44 = vshrl.u32 %v4077_v34, 16  ;;  %v354_v28 = vrot.slane %v352_v15, 7  ;;  %v4133_v45 = vsel %vm725_vm4, %v740_v6, %v741_v9  ;;  %v3706_v6 = vld [vmem:[%s4937_s1 + $0x20] sm:$0xff]  }
  0x46   : > { %3503 = vmatprep.subr.bf16.mxu1 %v3692_v53  ;;  %1098 = vmatprep.mubr.bf16.mxu0 %v4060_v21 }
  0x47   : > { %v561_v3 = vor.u32 %v560_v54, %v556_v44  ;;  %3547 = vmatprep.subr.bf16.mxu0 %v3707_v62  ;;  %v366_v44 = vshrl.u32 %v3712_v22, 16  ;;  %v357_v52 = vor.u32 %v355_v16, %v354_v28  ;;  %v3710_v16 = vld [vmem:[%s4937_s1 + $0x58] sm:$0xff]  }
  0x48   : > { %3548 = vmatpush3.bf16.msra.mxu0 %v3707_v62  ;;  %v4144_v62 = vsel %vm3835_vm2, %v354_v28, 0 }
  0x49   : > { %3504 = vmatpush3.bf16.msra.mxu1 %v3692_v53  ;;  %v3699_v53 = vld [vmem:[%s4937_s1 + $0x30] sm:$0xff]   ;;  %v4130_v23 = vsel %vm474_vm3, %v561_v3, %v565_v8  ;;  %v368_v2 = vrot.slane %v366_v44, 7  ;;  %v369_v3 = vshll.u32 %v3712_v22, 16  ;;  %v577_v8 = vrot.slane %v575_v36, 1  ;;  %3549 = vmatprep.subr.bf16.mxu0 %v3716_v49 }
  0x4a   : > { %3217 = vmatprep.subr.bf16.mxu1 %v3694_v11  ;;  %v743_v11 = vrot.slane %v4041_v61, 1  ;;  %v749_v36 = vrot.slane %v4116_v12, 1  ;;  %v587_v22 = vshll.u32 %v4144_v62, 16 }
  0x4c   : > { %1099 = vmatmul.mubr.bf16.gmra.mxu0 %v4020_v46  ;;  %3506 = vmatmul.mubr.bf16.vlgmr.msra.gmra.mxu1 %v4069_v32 }
  0x4d   : > { %1106 = vmatprep.mubr.bf16.mxu0 %v4080_v41  ;;  %3218 = vmatpush3.bf16.msra.mxu1 %v3695_v25  ;;  %v359_v25 = vshrl.u32 %v3709_v10, 16 }
  0x4e   : > { %3509 = vmatprep.mubr.bf16.mxu1 %v4089_v50  ;;  %3219 = vmatprep.subr.bf16.mxu1 %v3698_v43  ;;  %v572_v43 = vrot.slane %v570_v19, 1  ;;  %v3713_v19 = vld [vmem:[%s3818_s8 + $0x58] sm:$0xff]  }
  0x4f   : > { %v361_v54 = vrot.slane %v359_v25, 7  ;;  %3550 = vmatpush3.bf16.msra.mxu0 %v3716_v49 }
  0x50   : > { %v573_v26 = vor.u32 %v572_v43, %v568_v24  ;;  %v3711_v24 = vld [vmem:[%s4937_s1 + $0x18] sm:$0xff]  }
  0x51   : > { %3220 = vmatpush3.bf16.msra.mxu1 %v3699_v53  ;;  %v364_v63 = vor.u32 %v362_v35, %v361_v54  ;;  %v4159_v10 = vsel %vm3835_vm2, %v361_v54, 0  ;;  %v4178_v35 = vsel %vm725_vm4, %v743_v11, %v744_v47  ;;  %v4186_v53 = vsel %vm3835_vm2, %v368_v2, 0 }
  0x52   : > { %3221 = vmatprep.subr.bf16.mxu1 %v3701_v56  ;;  %v4150_v56 = vsel %vm3835_vm2, 0, %v357_v52  ;;  %v4182_v52 = vsel %vm474_vm3, %v573_v26, %v577_v8  ;;  %v4192_v11 = vsel %vm725_vm4, %v746_v33, %v747_v51  ;;  %v373_v47 = vshrl.u32 %v3713_v19, 16  ;;  %v3714_v26 = vld [vmem:[%s4937_s1 + $0x50] sm:$0xff]  }
  0x53   : > { %v582_v9 = vshll.u32 %v4150_v56, 16  ;;  %v4163_v15 = vsel %vm3835_vm2, 0, %v364_v63  ;;  %v580_v43 = vshrl.u32 %v4150_v56, 16  ;;  %v611_v8 = vshll.u32 %v4186_v53, 16 }
  0x54   : > { %1107 = vmatmul.mubr.bf16.gmra.mxu0 %v4041_v61  ;;  %3510 = vmatmul.mubr.bf16.gmra.mxu1 %v4127_v40  ;;  %v592_v28 = vshrl.u32 %v4163_v15, 16  ;;  %v594_v25 = vshll.u32 %v4163_v15, 16  ;;  %v589_v33 = vrot.slane %v587_v22, 1  ;;  %v375_v51 = vrot.slane %v373_v47, 7  ;;  %v3715_v22 = vld [vmem:[%s4937_s1 + $0x10] sm:$0xff]  }
  0x55   : > { %1114 = vmatprep.mubr.bf16.mxu0 %v4130_v23  ;;  %3513 = vmatprep.mubr.bf16.mxu1 %v4133_v45  ;;  %v584_v44 = vrot.slane %v582_v9, 1  ;;  %v613_v13 = vrot.slane %v611_v8, 1 }
  0x56   : > { %3222 = vmatpush3.bf16.msra.mxu1 %v3702_v17  ;;  %v599_v17 = vshll.u32 %v4159_v10, 16  ;;  %v596_v54 = vrot.slane %v594_v25, 1 }
  0x57   : > { %3223 = vmatprep.subr.bf16.mxu1 %v3705_v48  ;;  %v371_v48 = vor.u32 %v369_v3, %v368_v2  ;;  %v376_v3 = vshll.u32 %v3713_v19, 16  ;;  %v753_v2 = vrot.slane %v4144_v62, 1  ;;  %v3719_v62 = vld [vmem:[%s4937_s1 + $0x80] sm:$0xff]   ;;  %v585_v19 = vor.u32 %v584_v44, %v580_v43  ;;  %v3717_v43 = vld [vmem:[%s4937_s1 + $0x48] sm:$0xff]  }
  0x58   : > { %v601_v63 = vrot.slane %v599_v17, 1  ;;  %3551 = vmatprep.subr.bf16.mxu0 %v3719_v62 }
  0x59   : > { %v4202_v9 = vsel %vm3835_vm2, 0, %v371_v48  ;;  %v378_v48 = vor.u32 %v376_v3, %v375_v51  ;;  %v4947_v3 = vrot.slane %v4106_v0, 1  ;;  %v4234_v49 = vsel %vm474_vm3, %v585_v19, %v589_v33  ;;  %3552 = vmatpush3.bf16.msra.mxu0 %v3719_v62  ;;  %v3720_v33 = vld [vmem:[%s4937_s1 + $0x40] sm:$0xff]  }
  0x5a   : > { %3224 = vmatpush3.bf16.msra.mxu1 %v3706_v6  ;;  %v597_v6 = vor.u32 %v596_v54, %v592_v28  ;;  %v606_v17 = vshll.u32 %v4202_v9, 16  ;;  %v752_v28 = vrot.slane %v4150_v56, 1  ;;  %v469_v54 = vsel %vm3835_vm2, %v375_v51, 0  ;;  %v3721_v62 = vld [vmem:[%s4937_s1] sm:$0xff]  }
  0x5b   : > { %3225 = vmatprep.subr.bf16.mxu1 %v3710_v16  ;;  %v604_v16 = vshrl.u32 %v4202_v9, 16  ;;  %v4226_v44 = vsel %vm3835_vm2, 0, %v378_v48  ;;  %v755_v0 = vrot.slane %v4163_v15, 1 }
  0x5c   : > { %1115 = vmatmul.mubr.bf16.gmra.mxu0 %v4077_v34  ;;  %3514 = vmatmul.mubr.bf16.gmra.mxu1 %v4178_v35  ;;  %v4214_v25 = vsel %vm474_vm3, %v597_v6, %v601_v63  ;;  %v608_v47 = vrot.slane %v606_v17, 1  ;;  %v4231_v6 = vsel %vm725_vm4, %v749_v36, %v4947_v3  ;;  %v616_v8 = vshrl.u32 %v4226_v44, 16  ;;  %v3723_v17 = vld [vmem:[%s4937_s1 + $0x1f8] sm:$0xff]  }
  0x5d   : > { %1122 = vmatprep.mubr.bf16.mxu0 %v4182_v52  ;;  %3517 = vmatprep.mubr.bf16.mxu1 %v4192_v11  ;;  %v618_v18 = vshll.u32 %v4226_v44, 16  ;;  %v4242_v51 = vsel %vm725_vm4, %v752_v28, %v753_v2  ;;  %v756_v36 = vrot.slane %v4159_v10, 1  ;;  %v758_v28 = vrot.slane %v4202_v9, 1 }
  0x5e   : > { %3226 = vmatpush3.bf16.msra.mxu1 %v3711_v24  ;;  %v623_v24 = vshll.u32 %v469_v54, 16  ;;  %v609_v63 = vor.u32 %v608_v47, %v604_v16  ;;  %3353 = vmatprep.subr.bf16.mxu0 %v3723_v17  ;;  %v765_v3 = vrot.slane %v3858_v31, 1  ;;  %v770_v31 = vrot.slane %v3953_v39, 1 }
  0x5f   : > { %3227 = vmatprep.subr.bf16.mxu1 %v3714_v26  ;;  %v3718_v26 = vld [vmem:[%s4937_s1 + $0x8] sm:$0xff]   ;;  %v620_v2 = vrot.slane %v618_v18, 1  ;;  %v4271_v47 = vsel %vm725_vm4, %v755_v0, %v756_v36  ;;  %v768_v18 = vrot.slane %v3889_v57, 1  ;;  %v771_v0 = vrot.slane %v3932_v27, 1 }
  0x60   : > { %v4247_v16 = vsel %vm474_vm3, %v609_v63, %v613_v13  ;;  %v625_v19 = vrot.slane %v623_v24, 1  ;;  %v759_v13 = vrot.slane %v4186_v53, 1  ;;  %v762_v24 = vrot.slane %v469_v54, 1 }
  0x61   : > { %v621_v10 = vor.u32 %v620_v2, %v616_v8  ;;  %v764_v63 = vrot.slane %v3868_v37, 1  ;;  %v767_v54 = vrot.slane %v3901_v1, 1  ;;  %v773_v57 = vrot.slane %v3997_v14, 1 }
  0x62   : > { %3228 = vmatpush3.bf16.msra.mxu1 %v3715_v22  ;;  %v3722_v22 = vld [vmem:[%s4937_s1 + $0x238] sm:$0xff]   ;;  %v4274_v53 = vsel %vm725_vm4, %v758_v28, %v759_v13  ;;  %v774_v17 = vrot.slane %v3967_v59, 1  ;;  %v3754_v2 = vmov 0   ;;  %v3725_v59 = vld [vmem:[%s4937_s1 + $0x1f0] sm:$0xff]   ;;  %v3728_v28 = vld [vmem:[%s4937_s1 + $0x1e8] sm:$0xff]  }
  0x63   : > { %3229 = vmatprep.subr.bf16.mxu1 %v3717_v43  ;;  %v4268_v48 = vsel %vm474_vm3, %v621_v10, %v625_v19  ;;  %v761_v43 = vrot.slane %v4226_v44, 1  ;;  %v4287_v8 = vsel %vm725_vm4, %v764_v63, %v765_v3  ;;  %v4298_v36 = vsel %vm725_vm4, %v767_v54, %v768_v18  ;;  %v3724_v13 = vld [vmem:[%s4937_s1 + $0x1b8] sm:$0xff]   ;;  %v3727_v10 = vld [vmem:[%s4937_s1 + $0x230] sm:$0xff]  }
  0x64   : > { %1123 = vmatmul.mubr.bf16.gmra.mxu0 %v4116_v12  ;;  %3518 = vmatmul.mubr.bf16.gmra.mxu1 %v4231_v6  ;;  %v4310_v27 = vrot.slane %v3754_v2, 1  ;;  %v4313_v19 = vsel %vm725_vm4, %v773_v57, %v774_v17  ;;  %v3733_v63 = vld [vmem:[%s4937_s1 + $0x1d8] sm:$0xff]   ;;  %v3735_v54 = vld [vmem:[%s4937_s1 + $0x1d0] sm:$0xff]   ;;  %v3744_v57 = vld [vmem:[%s4937_s1 + $0x208] sm:$0xff]  }
  0x65   : > { %1130 = vmatprep.mubr.bf16.mxu0 %v4234_v49  ;;  %3521 = vmatprep.mubr.bf16.mxu1 %v4242_v51  ;;  %v3734_v3 = vld [vmem:[%s4937_s1 + $0x198] sm:$0xff]   ;;  %v3743_v18 = vld [vmem:[%s4937_s1 + $0x210] sm:$0xff]   ;;  %v3739_v17 = vld [vmem:[%s4937_s1 + $0x188] sm:$0xff]  }
  0x66   : > { %3230 = vmatpush3.bf16.msra.mxu1 %v3718_v26  ;;  %v4284_v26 = vsel %vm725_vm4, %v761_v43, %v762_v24  ;;  %v3737_v43 = vld [vmem:[%s4937_s1 + $0x220] sm:$0xff]  }
  0x67   : > { %3231 = vmatprep.subr.bf16.mxu1 %v3720_v33  ;;  %v4301_v33 = vsel %vm725_vm4, %v770_v31, %v771_v0  ;;  %v3731_v24 = vld [vmem:[%s4937_s1 + $0x1a0] sm:$0xff]   ;;  %v3736_v31 = vld [vmem:[%s4937_s1 + $0x190] sm:$0xff]   ;;  %v3738_v0 = vld [vmem:[%s4937_s1 + $0x1c8] sm:$0xff]  }
  0x6a   : > { %3232 = vmatpush3.bf16.msra.mxu1 %v3721_v62  ;;  %v3726_v62 = vld [vmem:[%s4937_s1 + $0x1b0] sm:$0xff]  }
  0x6b   : > { %3585 = vmatprep.subr.bf16.mxu1 %v3722_v22 }
  0x6c   : > { %1131 = vmatmul.mubr.bf16.gmra.mxu0 %v4150_v56  ;;  %3522 = vmatmul.mubr.bf16.gmra.mxu1 %v4271_v47 }
  0x6d   : > { %1138 = vmatprep.mubr.bf16.mxu0 %v4214_v25  ;;  %3525 = vmatprep.mubr.bf16.mxu1 %v4274_v53 }
  0x74   : > { %1139 = vmatmul.mubr.bf16.gmra.mxu0 %v4163_v15  ;;  %3526 = vmatmul.mubr.bf16.gmra.mxu1 %v4284_v26 }
  0x75   : > { %1146 = vmatprep.mubr.bf16.mxu0 %v4247_v16  ;;  %3529 = vmatprep.mubr.bf16.mxu1 %v4287_v8 }
  0x7c   : > { %1147 = vmatmul.mubr.bf16.gmra.mxu0 %v4202_v9  ;;  %3530 = vmatmul.mubr.bf16.gmra.mxu1 %v4298_v36 }
  0x7d   : > { %1154 = vmatprep.mubr.bf16.mxu0 %v4268_v48  ;;  %3533 = vmatprep.mubr.bf16.mxu1 %v4301_v33 }
  0x84   : > { %1155 = vmatmul.mubr.bf16.gmra.mxu0 %v4226_v44  ;;  %3534 = vmatmul.mubr.bf16.gmra.mxu1 %v4313_v19 }
  0x85   : > { %3553 = vmatprep.mubr.bf16.mxu0 %v4310_v27  ;;  %1532 = vmatprep.mubr.bf16.mxu1 %v4310_v27 }
  0x8c   : > { %3554 = vmatmul.mubr.bf16.vlgmr.msra.gmra.mxu0 %v4037_v60  ;;  %1533 = vmatmul.mubr.bf16.vlgmr.msra.gmra.mxu1 %v3754_v2  ;;  %v3732_v60 = vld [vmem:[%s4937_s1 + $0x228] sm:$0xff]  }
  0x8d   : > { %3354 = vmatpush3.bf16.msra.mxu0 %v3724_v13  ;;  %3586 = vmatpush3.bf16.msra.mxu1 %v3722_v22  ;;  %v3729_v22 = vld [vmem:[%s4937_s1 + $0x1a8] sm:$0xff]   ;;  %v3740_v13 = vld [vmem:[%s4937_s1 + $0x1c0] sm:$0xff]  }
  0x8e   : > { %1540 = vmatprep.mubr.bf16.mxu1 %v3892_v58  ;;  %3557 = vmatprep.mubr.bf16.mxu0 %v4069_v32  ;;  %v3730_v58 = vld [vmem:[%s4937_s1 + $0x1e0] sm:$0xff]  }
  0x8f   : > { %3355 = vmatprep.subr.bf16.mxu0 %v3725_v59  ;;  %3587 = vmatprep.subr.bf16.mxu1 %v3727_v10  ;;  %v3745_v59 = vld [vmem:[%s4937_s1 + $0x200] sm:$0xff]  }
  0x91   : > { %3356 = vmatpush3.bf16.msra.mxu0 %v3726_v62  ;;  %3588 = vmatpush3.bf16.msra.mxu1 %v3727_v10  ;;  %v3741_v10 = vld [vmem:[%s4937_s1 + $0x180] sm:$0xff]  }
  0x92   : > { %3357 = vmatprep.subr.bf16.mxu0 %v3728_v28  ;;  %3589 = vmatprep.subr.bf16.mxu1 %v3732_v60 }
  0x94   : > { %3558 = vmatmul.mubr.bf16.gmra.mxu0 %v4089_v50  ;;  %1541 = vmatmul.mubr.bf16.gmra.mxu1 %v3854_v29  ;;  %v3742_v29 = vld [vmem:[%s4937_s1 + $0x218] sm:$0xff]  }
  0x95   : > { %3561 = vmatprep.mubr.bf16.mxu0 %v4127_v40  ;;  %1548 = vmatprep.mubr.bf16.mxu1 %v3922_v20 }
  0x96   : > { %3358 = vmatpush3.bf16.msra.mxu0 %v3729_v22  ;;  %3590 = vmatpush3.bf16.msra.mxu1 %v3732_v60 }
  0x97   : > { %3359 = vmatprep.subr.bf16.mxu0 %v3730_v58  ;;  %3591 = vmatprep.subr.bf16.mxu1 %v3737_v43 }
  0x9a   : > { %3360 = vmatpush3.bf16.msra.mxu0 %v3731_v24  ;;  %3592 = vmatpush3.bf16.msra.mxu1 %v3737_v43 }
  0x9b   : > { %3361 = vmatprep.subr.bf16.mxu0 %v3733_v63  ;;  %3593 = vmatprep.subr.bf16.mxu1 %v3742_v29 }
  0x9c   : > { %3562 = vmatmul.mubr.bf16.gmra.mxu0 %v4133_v45  ;;  %1549 = vmatmul.mubr.bf16.gmra.mxu1 %v3885_v55 }
  0x9d   : > { %3565 = vmatprep.mubr.bf16.mxu0 %v4178_v35  ;;  %1556 = vmatprep.mubr.bf16.mxu1 %v3981_v7 }
  0x9e   : > { %3362 = vmatpush3.bf16.msra.mxu0 %v3734_v3  ;;  %3594 = vmatpush3.bf16.msra.mxu1 %v3742_v29 }
  0x9f   : > { %3363 = vmatprep.subr.bf16.mxu0 %v3735_v54  ;;  %3595 = vmatprep.subr.bf16.mxu1 %v3743_v18 }
  0xa2   : > { %3364 = vmatpush3.bf16.msra.mxu0 %v3736_v31  ;;  %3596 = vmatpush3.bf16.msra.mxu1 %v3743_v18 }
  0xa3   : > { %3365 = vmatprep.subr.bf16.mxu0 %v3738_v0  ;;  %3597 = vmatprep.subr.bf16.mxu1 %v3744_v57 }
  0xa4   : > { %3566 = vmatmul.mubr.bf16.gmra.mxu0 %v4192_v11  ;;  %1557 = vmatmul.mubr.bf16.gmra.mxu1 %v3949_v38 }
  0xa5   : > { %3569 = vmatprep.mubr.bf16.mxu0 %v4231_v6  ;;  %1564 = vmatprep.mubr.bf16.mxu1 %v4011_v42 }
  0xa6   : > { %3366 = vmatpush3.bf16.msra.mxu0 %v3739_v17  ;;  %3598 = vmatpush3.bf16.msra.mxu1 %v3744_v57  ;;  %v4948_v57 = vld [vmem:[#allocation2_spill] sm:$0xff] }
  0xa7   : > { %3367 = vmatprep.subr.bf16.mxu0 %v3740_v13  ;;  %3599 = vmatprep.subr.bf16.mxu1 %v3745_v59 }
  0xaa   : > { %3368 = vmatpush3.bf16.msra.mxu0 %v3741_v10  ;;  %3600 = vmatpush3.bf16.msra.mxu1 %v3745_v59 }
  0xac   : > { %3570 = vmatmul.mubr.bf16.gmra.mxu0 %v4242_v51  ;;  %1565 = vmatmul.mubr.bf16.gmra.mxu1 %v3977_v5 }
  0xad   : > { %3573 = vmatprep.mubr.bf16.mxu0 %v4271_v47  ;;  %1572 = vmatprep.mubr.bf16.mxu1 %v4060_v21 }
  0xb4   : > { %3574 = vmatmul.mubr.bf16.gmra.mxu0 %v4274_v53  ;;  %1573 = vmatmul.mubr.bf16.gmra.mxu1 %v4020_v46 }
  0xb5   : > { %3577 = vmatprep.mubr.bf16.mxu0 %v4284_v26  ;;  %1580 = vmatprep.mubr.bf16.mxu1 %v4080_v41 }
  0xbc   : > { %3578 = vmatmul.mubr.bf16.gmra.mxu0 %v4287_v8  ;;  %1581 = vmatmul.mubr.bf16.gmra.mxu1 %v4041_v61 }
  0xbd   : > { %3581 = vmatprep.mubr.bf16.mxu0 %v4298_v36  ;;  %1588 = vmatprep.mubr.bf16.mxu1 %v4130_v23 }
  0xc4   : > { %3582 = vmatmul.mubr.bf16.gmra.mxu0 %v4301_v33  ;;  %1589 = vmatmul.mubr.bf16.gmra.mxu1 %v4077_v34 }
  0xc5   : > { %2047 = vmatprep.mubr.bf16.mxu0 %v3922_v20  ;;  %1596 = vmatprep.mubr.bf16.mxu1 %v4182_v52 }
  0xcc   : > { %2048 = vmatmul.mubr.bf16.vlgmr.msra.gmra.mxu0 %v3885_v55  ;;  %1597 = vmatmul.mubr.bf16.gmra.mxu1 %v4116_v12 }
  0xcd   : > { %2055 = vmatprep.mubr.bf16.mxu0 %v3981_v7  ;;  %1604 = vmatprep.mubr.bf16.mxu1 %v4234_v49 }
  0xd4   : > { %2056 = vmatmul.mubr.bf16.gmra.mxu0 %v3949_v38  ;;  %1605 = vmatmul.mubr.bf16.gmra.mxu1 %v4150_v56 }
  0xd5   : > { %2063 = vmatprep.mubr.bf16.mxu0 %v4011_v42  ;;  %1612 = vmatprep.mubr.bf16.mxu1 %v4214_v25 }
  0xdc   : > { %2064 = vmatmul.mubr.bf16.gmra.mxu0 %v3977_v5  ;;  %1613 = vmatmul.mubr.bf16.gmra.mxu1 %v4163_v15 }
  0xdd   : > { %2071 = vmatprep.mubr.bf16.mxu0 %v4060_v21  ;;  %1620 = vmatprep.mubr.bf16.mxu1 %v4247_v16 }
  0xe4   : > { %2072 = vmatmul.mubr.bf16.gmra.mxu0 %v4020_v46  ;;  %1621 = vmatmul.mubr.bf16.gmra.mxu1 %v4202_v9 }
  0xe5   : > { %2079 = vmatprep.mubr.bf16.mxu0 %v4080_v41  ;;  %1628 = vmatprep.mubr.bf16.mxu1 %v4268_v48 }
  0xec   : > { %v3097_v55 = vpop.f32.mrf.mxu0  ;;  %2080 = vmatmul.mubr.bf16.gmra.mxu0 %v4041_v61  ;;  %v3169_v20 = vpop.f32.mrf.mxu1  ;;  %1629 = vmatmul.mubr.bf16.gmra.mxu1 %v4226_v44 }
  0xed   : > { %2087 = vmatprep.mubr.bf16.mxu0 %v4130_v23  ;;  %1636 = vmatprep.mubr.bf16.mxu1 %v3908_v4 }
  0xee   : > { %v3098_v38 = vpop.f32.mrf.mxu0  ;;  %v3170_v7 = vpop.f32.mrf.mxu1 }
  0xef   : > { %v4437_v5 = vadd.f32 %v3098_v38, %v3097_v55  ;;  %v4439_v42 = vadd.f32 %v3170_v7, %v3169_v20 }
  0xf0   : > { %v3100_v46 = vpop.f32.mrf.mxu0  ;;  %v3172_v21 = vpop.f32.mrf.mxu1 }
  0xf2   : > { %v3101_v41 = vpop.f32.mrf.mxu0  ;;  %v3173_v28 = vpop.f32.mrf.mxu1 }
  0xf3   : > { %v4441_v62 = vadd.f32 %v3101_v41, %v3100_v46  ;;  %v4443_v61 = vadd.f32 %v3173_v28, %v3172_v21 }
  0xf4   : > { %v3103_v60 = vpop.f32.mrf.mxu0  ;;  %2088 = vmatmul.mubr.bf16.gmra.mxu0 %v4077_v34  ;;  %v3175_v23 = vpop.f32.mrf.mxu1  ;;  %1637 = vmatmul.mubr.bf16.gmra.mxu1 %v3868_v37 }
  0xf5   : > { %2095 = vmatprep.mubr.bf16.mxu0 %v4182_v52  ;;  %1644 = vmatprep.mubr.bf16.mxu1 %v3936_v30 }
  0xf6   : > { %v3104_v22 = vpop.f32.mrf.mxu0  ;;  %v3176_v43 = vpop.f32.mrf.mxu1 }
  0xf7   : > { %v3105_v58 = vadd.f32 %v3104_v22, %v3103_v60  ;;  %v4449_v24 = vadd.f32 %v3176_v43, %v3175_v23 }
  0xf8   : > { %v3106_v63 = vpop.f32.mrf.mxu0  ;;  %v3178_v29 = vpop.f32.mrf.mxu1 }
  0xfa   : > { %v3107_v3 = vpop.f32.mrf.mxu0  ;;  %v3179_v18 = vpop.f32.mrf.mxu1 }
  0xfb   : > { %v3108_v54 = vadd.f32 %v3107_v3, %v3106_v63  ;;  %v4451_v31 = vadd.f32 %v3179_v18, %v3178_v29 }
  0xfc   : > { %v3109_v34 = vpop.f32.mrf.mxu0  ;;  %2096 = vmatmul.mubr.bf16.gmra.mxu0 %v4116_v12  ;;  %v3181_v0 = vpop.f32.mrf.mxu1  ;;  %1645 = vmatmul.mubr.bf16.gmra.mxu1 %v3901_v1 }
  0xfd   : > { %2103 = vmatprep.mubr.bf16.mxu0 %v4234_v49  ;;  %1652 = vmatprep.mubr.bf16.mxu1 %v4948_v57 }
  0xfe   : > { %v3110_v52 = vpop.f32.mrf.mxu0  ;;  %v3182_v13 = vpop.f32.mrf.mxu1 }
  0xff   : > { %v3111_v17 = vadd.f32 %v3110_v52, %v3109_v34  ;;  %v4457_v59 = vadd.f32 %v3182_v13, %v3181_v0 }
 0x100   : > { %v3112_v10 = vpop.f32.mrf.mxu0  ;;  %v3184_v55 = vpop.f32.mrf.mxu1 }
 0x102   : > { %v3113_v20 = vpop.f32.mrf.mxu0  ;;  %v3185_v7 = vpop.f32.mrf.mxu1 }
 0x103   : > { %v3114_v38 = vadd.f32 %v3113_v20, %v3112_v10  ;;  %v4459_v46 = vadd.f32 %v3185_v7, %v3184_v55 }
 0x104   : > { %v3115_v12 = vpop.f32.mrf.mxu0  ;;  %2104 = vmatmul.mubr.bf16.gmra.mxu0 %v4150_v56  ;;  %v3187_v21 = vpop.f32.mrf.mxu1  ;;  %1653 = vmatmul.mubr.bf16.gmra.mxu1 %v3953_v39 }
 0x105   : > { %2111 = vmatprep.mubr.bf16.mxu0 %v4214_v25  ;;  %3601 = vmatprep.mubr.bf16.mxu1 %v4069_v32 }
 0x106   : > { %v3116_v49 = vpop.f32.mrf.mxu0  ;;  %v3188_v28 = vpop.f32.mrf.mxu1 }
 0x107   : > { %v3117_v41 = vadd.f32 %v3116_v49, %v3115_v12  ;;  %v4465_v60 = vadd.f32 %v3188_v28, %v3187_v21 }
 0x108   : > { %v3118_v23 = vpop.f32.mrf.mxu0  ;;  %v3190_v22 = vpop.f32.mrf.mxu1 }
 0x10a   : > { %v3119_v43 = vpop.f32.mrf.mxu0  ;;  %v3191_v29 = vpop.f32.mrf.mxu1 }
 0x10b   : > { %v3120_v63 = vadd.f32 %v3119_v43, %v3118_v23  ;;  %v4467_v3 = vadd.f32 %v3191_v29, %v3190_v22 }
 0x10c   : > { %v3121_v56 = vpop.f32.mrf.mxu0  ;;  %2112 = vmatmul.mubr.bf16.gmra.mxu0 %v4163_v15  ;;  %v3507_v18 = vpop.f32.mrf.mxu1  ;;  %3602 = vmatmul.mubr.bf16.vlgmr.msra.gmra.mxu1 %v4089_v50 }
 0x10d   : > { %2119 = vmatprep.mubr.bf16.mxu0 %v4247_v16  ;;  %v4472_v32 = vadd.f32 %v3507_v18, %v3105_v58  ;;  %3605 = vmatprep.mubr.bf16.mxu1 %v4127_v40 }
 0x10e   : > { %v3122_v25 = vpop.f32.mrf.mxu0  ;;  %v1229_v0 = vpop.f32.mrf.mxu1 }
 0x10f   : > { %v3123_v34 = vadd.f32 %v3122_v25, %v3121_v56  ;;  %v4476_v52 = vadd.f32 %v4437_v5, %v1229_v0 }
 0x110   : > { %v3124_v13 = vpop.f32.mrf.mxu0  ;;  %v3508_v10 = vpop.f32.mrf.mxu1 }
 0x111   : > { %v4478_v55 = vadd.f32 %v3508_v10, %v3108_v54 }
 0x112   : > { %v3125_v15 = vpop.f32.mrf.mxu0  ;;  %v1232_v7 = vpop.f32.mrf.mxu1 }
 0x113   : > { %v3126_v20 = vadd.f32 %v3125_v15, %v3124_v13  ;;  %v4481_v50 = vadd.f32 %v4441_v62, %v1232_v7 }
 0x114   : > { %v3127_v16 = vpop.f32.mrf.mxu0  ;;  %2120 = vmatmul.mubr.bf16.gmra.mxu0 %v4202_v9  ;;  %v3511_v58 = vpop.f32.mrf.mxu1  ;;  %3606 = vmatmul.mubr.bf16.gmra.mxu1 %v4133_v45 }
 0x115   : > { %2127 = vmatprep.mubr.bf16.mxu0 %v4268_v48  ;;  %v4486_v40 = vadd.f32 %v3511_v58, %v3117_v41  ;;  %3609 = vmatprep.mubr.bf16.mxu1 %v4178_v35 }
 0x116   : > { %v3128_v5 = vpop.f32.mrf.mxu0  ;;  %v1245_v12 = vpop.f32.mrf.mxu1 }
 0x117   : > { %v3129_v54 = vadd.f32 %v3128_v5, %v3127_v16  ;;  %v4489_v21 = vadd.f32 %v3111_v17, %v1245_v12 }
 0x118   : > { %v3130_v49 = vpop.f32.mrf.mxu0  ;;  %v3512_v62 = vpop.f32.mrf.mxu1 }
 0x119   : > { %v4491_v28 = vadd.f32 %v3512_v62, %v3120_v63 }
 0x11a   : > { %v3131_v23 = vpop.f32.mrf.mxu0  ;;  %v1248_v22 = vpop.f32.mrf.mxu1 }
 0x11b   : > { %v3132_v9 = vadd.f32 %v3131_v23, %v3130_v49  ;;  %v4493_v43 = vadd.f32 %v3114_v38, %v1248_v22 }
 0x11c   : > { %v3133_v45 = vpop.f32.mrf.mxu0  ;;  %2128 = vmatmul.mubr.bf16.gmra.mxu0 %v4226_v44  ;;  %v3515_v48 = vpop.f32.mrf.mxu1  ;;  %3610 = vmatmul.mubr.bf16.gmra.mxu1 %v4192_v11 }
 0x11d   : > { %2135 = vmatprep.mubr.bf16.mxu0 %v3908_v4  ;;  %v4498_v35 = vadd.f32 %v3515_v48, %v3129_v54  ;;  %3613 = vmatprep.mubr.bf16.mxu1 %v4231_v6 }
 0x11e   : > { %v3134_v17 = vpop.f32.mrf.mxu0  ;;  %v1261_v63 = vpop.f32.mrf.mxu1 }
 0x11f   : > { %v3135_v41 = vadd.f32 %v3134_v17, %v3133_v45  ;;  %v4501_v29 = vadd.f32 %v3123_v34, %v1261_v63 }
 0x120   : > { %v3136_v56 = vpop.f32.mrf.mxu0  ;;  %v3516_v38 = vpop.f32.mrf.mxu1 }
 0x121   : > { %v4503_v18 = vadd.f32 %v3516_v38, %v3132_v9 }
 0x122   : > { %v3137_v25 = vpop.f32.mrf.mxu0  ;;  %v1264_v0 = vpop.f32.mrf.mxu1 }
 0x123   : > { %v3138_v44 = vadd.f32 %v3137_v25, %v3136_v56  ;;  %v4505_v13 = vadd.f32 %v3126_v20, %v1264_v0 }
 0x124   : > { %v3139_v11 = vpop.f32.mrf.mxu0  ;;  %2136 = vmatmul.mubr.bf16.gmra.mxu0 %v3868_v37  ;;  %v3519_v4 = vpop.f32.mrf.mxu1  ;;  %3614 = vmatmul.mubr.bf16.gmra.mxu1 %v4242_v51 }
 0x125   : > { %2143 = vmatprep.mubr.bf16.mxu0 %v3936_v30  ;;  %3617 = vmatprep.mubr.bf16.mxu1 %v4271_v47 }
 0x126   : > { %v3140_v6 = vpop.f32.mrf.mxu0  ;;  %v1277_v10 = vpop.f32.mrf.mxu1 }
 0x127   : > { %v3141_v34 = vadd.f32 %v3140_v6, %v3139_v11  ;;  %v4511_v15 = vadd.f32 %v3135_v41, %v1277_v10 }
 0x128   : > { %v3142_v7 = vpop.f32.mrf.mxu0  ;;  %v3520_v20 = vpop.f32.mrf.mxu1 }
 0x129   : > { %v4513_v16 = vadd.f32 %v3519_v4, %v3141_v34 }
 0x12a   : > { %v3143_v58 = vpop.f32.mrf.mxu0  ;;  %v1280_v54 = vpop.f32.mrf.mxu1 }
 0x12b   : > { %v3144_v5 = vadd.f32 %v3143_v58, %v3142_v7  ;;  %v4515_v37 = vadd.f32 %v3138_v44, %v1280_v54 }
 0x12c   : > { %v3145_v12 = vpop.f32.mrf.mxu0  ;;  %2144 = vmatmul.mubr.bf16.gmra.mxu0 %v3901_v1  ;;  %v3523_v51 = vpop.f32.mrf.mxu1  ;;  %3618 = vmatmul.mubr.bf16.gmra.mxu1 %v4274_v53 }
 0x12d   : > { %v4518_v30 = vadd.f32 %v3520_v20, %v3144_v5  ;;  %2151 = vmatprep.mubr.bf16.mxu0 %v4948_v57  ;;  %3621 = vmatprep.mubr.bf16.mxu1 %v4284_v26  ;;  %v4949_v57 = vld [vmem:[#allocation3_spill] sm:$0xff] }
 0x12e   : > { %v3146_v47 = vpop.f32.mrf.mxu0  ;;  %v1293_v62 = vpop.f32.mrf.mxu1 }
 0x12f   : > { %v3147_v49 = vadd.f32 %v3146_v47, %v3145_v12 }
 0x130   : > { %v3148_v23 = vpop.f32.mrf.mxu0  ;;  %v3524_v22 = vpop.f32.mrf.mxu1 }
 0x131   : > { %v4523_v9 = vadd.f32 %v3147_v49, %v1293_v62 }
 0x132   : > { %v3149_v45 = vpop.f32.mrf.mxu0  ;;  %v1296_v17 = vpop.f32.mrf.mxu1 }
 0x133   : > { %v3150_v48 = vadd.f32 %v3149_v45, %v3148_v23 }
 0x134   : > { %v3151_v1 = vpop.f32.mrf.mxu0  ;;  %2152 = vmatmul.mubr.bf16.gmra.mxu0 %v3953_v39  ;;  %v3527_v53 = vpop.f32.mrf.mxu1  ;;  %3622 = vmatmul.mubr.bf16.gmra.mxu1 %v4287_v8 }
 0x135   : > { %v4526_v41 = vadd.f32 %v3150_v48, %v1296_v17  ;;  %2159 = vmatprep.mubr.bf16.mxu0 %v4949_v57  ;;  %3625 = vmatprep.mubr.bf16.mxu1 %v4298_v36 }
 0x136   : > { %v3152_v26 = vpop.f32.mrf.mxu0  ;;  %v1309_v56 = vpop.f32.mrf.mxu1 }
 0x137   : > { %v3153_v63 = vadd.f32 %v3152_v26, %v3151_v1 }
 0x138   : > { %v3154_v38 = vpop.f32.mrf.mxu0  ;;  %v3528_v44 = vpop.f32.mrf.mxu1 }
 0x139   : > { %v4531_v25 = vadd.f32 %v3523_v51, %v3153_v63 }
 0x13a   : > { %v3155_v0 = vpop.f32.mrf.mxu0  ;;  %v1312_v4 = vpop.f32.mrf.mxu1 }
 0x13b   : > { %v3156_v11 = vadd.f32 %v3155_v0, %v3154_v38 }
 0x13c   : > { %v3157_v39 = vpop.f32.mrf.mxu0  ;;  %2160 = vmatmul.mubr.bf16.gmra.mxu0 %v3997_v14  ;;  %v3531_v8 = vpop.f32.mrf.mxu1  ;;  %3626 = vmatmul.mubr.bf16.gmra.mxu1 %v4301_v33 }
 0x13d   : > { %v4534_v6 = vadd.f32 %v3524_v22, %v3156_v11  ;;  %2167 = vmatprep.mubr.bf16.mxu0 %v4310_v27  ;;  %v4539_v36 = vadd.f32 %v3531_v8, %v4449_v24  ;;  %3629 = vmatprep.mubr.bf16.mxu1 %v4313_v19 }
 0x13e   : > { %v3158_v34 = vpop.f32.mrf.mxu0  ;;  %v1325_v7 = vpop.f32.mrf.mxu1 }
 0x13f   : > { %v3159_v10 = vadd.f32 %v3158_v34, %v3157_v39  ;;  %v4543_v20 = vadd.f32 %v4439_v42, %v1325_v7 }
 0x140   : > { %v3160_v58 = vpop.f32.mrf.mxu0  ;;  %v3532_v5 = vpop.f32.mrf.mxu1 }
 0x141   : > { %v4545_v14 = vadd.f32 %v3159_v10, %v1309_v56  ;;  %v4548_v54 = vadd.f32 %v3532_v5, %v4451_v31 }
 0x142   : > { %v3161_v33 = vpop.f32.mrf.mxu0  ;;  %v1328_v51 = vpop.f32.mrf.mxu1 }
 0x143   : > { %v3162_v12 = vadd.f32 %v3161_v33, %v3160_v58  ;;  %v4551_v24 = vadd.f32 %v4443_v61, %v1328_v51 }
 0x144   : > { %v3163_v47 = vpop.f32.mrf.mxu0  ;;  %2168 = vmatmul.mubr.bf16.gmra.mxu0 %v3754_v2  ;;  %v3535_v42 = vpop.f32.mrf.mxu1  ;;  %3630 = vmatmul.mubr.bf16.gmra.mxu1 %v4310_v27 }
 0x145   : > { %v4554_v19 = vadd.f32 %v3162_v12, %v1312_v4  ;;  %v4558_v49 = vadd.f32 %v3535_v42, %v4465_v60 }
 0x146   : > { %v3164_v62 = vpop.f32.mrf.mxu0  ;;  %v1341_v23 = vpop.f32.mrf.mxu1 }
 0x147   : > { %v3165_v31 = vadd.f32 %v3164_v62, %v3163_v47  ;;  %v4561_v22 = vadd.f32 %v4457_v59, %v1341_v23 }
 0x148   : > { %v3166_v45 = vpop.f32.mrf.mxu0  ;;  %v3536_v48 = vpop.f32.mrf.mxu1 }
 0x149   : > { %v4563_v61 = vadd.f32 %v3527_v53, %v3165_v31  ;;  %v4566_v2 = vadd.f32 %v3536_v48, %v4467_v3 }
 0x14a   : > { %v3167_v17 = vpop.f32.mrf.mxu0  ;;  %v1344_v57 = vpop.f32.mrf.mxu1 }
 0x14b   : > { %4950 = vst [vmem:[#allocation2_spill] sm:$0xff] %v4566_v2  ;;  %v3168_v1 = vadd.f32 %v3167_v17, %v3166_v45  ;;  %v4569_v27 = vadd.f32 %v4459_v46, %v1344_v57 }
 0x14c   : > { %v3555_v60 = vpop.f32.mrf.mxu0  ;;  %v3233_v63 = vpop.f32.mrf.mxu1 }
 0x14d   : > { %v4571_v26 = vadd.f32 %v3528_v44, %v3168_v1 }
 0x14e   : > { %v1695_v56 = vpop.f32.mrf.mxu0  ;;  %v3234_v59 = vpop.f32.mrf.mxu1 }
 0x14f   : > { %v3235_v38 = vadd.f32 %v3234_v59, %v3233_v63 }
 0x150   : > { %v3556_v0 = vpop.f32.mrf.mxu0  ;;  %v3236_v53 = vpop.f32.mrf.mxu1 }
 0x151   : > { %v1535_v11 = vadd.f32 %v3235_v38, %v4476_v52 }
 0x152   : > { %v1698_v4 = vpop.f32.mrf.mxu0  ;;  %v3237_v3 = vpop.f32.mrf.mxu1 }
 0x153   : > { %v4574_v39 = vadd.f32 %v1695_v56, %v1535_v11  ;;  %v3238_v8 = vadd.f32 %v3237_v3, %v3236_v53 }
 0x154   : > { %v3559_v34 = vpop.f32.mrf.mxu0  ;;  %v3239_v10 = vpop.f32.mrf.mxu1 }
 0x155   : > { %v1538_v46 = vadd.f32 %v3238_v8, %v4481_v50 }
 0x156   : > { %v1711_v7 = vpop.f32.mrf.mxu0  ;;  %v3240_v44 = vpop.f32.mrf.mxu1 }
 0x157   : > { %v4577_v58 = vadd.f32 %v1698_v4, %v1538_v46  ;;  %v3241_v5 = vadd.f32 %v3240_v44, %v3239_v10 }
 0x158   : > { %v3560_v33 = vpop.f32.mrf.mxu0  ;;  %v3242_v12 = vpop.f32.mrf.mxu1 }
 0x159   : > { %v1543_v51 = vadd.f32 %v3241_v5, %v4472_v32 }
 0x15a   : > { %v1714_v47 = vpop.f32.mrf.mxu0  ;;  %v3243_v52 = vpop.f32.mrf.mxu1 }
 0x15b   : > { %v3244_v42 = vadd.f32 %v3243_v52, %v3242_v12  ;;  %v4580_v31 = vadd.f32 %v3555_v60, %v1543_v51 }
 0x15c   : > { %v3563_v62 = vpop.f32.mrf.mxu0  ;;  %v3245_v23 = vpop.f32.mrf.mxu1 }
 0x15d   : > { %v1546_v45 = vadd.f32 %v3244_v42, %v4478_v55 }
 0x15e   : > { %v1727_v48 = vpop.f32.mrf.mxu0  ;;  %v3246_v50 = vpop.f32.mrf.mxu1 }
 0x15f   : > { %v3247_v17 = vadd.f32 %v3246_v50, %v3245_v23  ;;  %v4583_v57 = vadd.f32 %v3556_v0, %v1546_v45 }
 0x160   : > { %v3564_v1 = vpop.f32.mrf.mxu0  ;;  %v3248_v63 = vpop.f32.mrf.mxu1 }
 0x161   : > { %v1551_v56 = vadd.f32 %v3247_v17, %v4489_v21 }
 0x162   : > { %v1730_v59 = vpop.f32.mrf.mxu0  ;;  %v3249_v32 = vpop.f32.mrf.mxu1 }
 0x163   : > { %v3250_v38 = vadd.f32 %v3249_v32, %v3248_v63  ;;  %v4588_v11 = vadd.f32 %v1711_v7, %v1551_v56 }
 0x164   : > { %v4586_v53 = vpop.f32.mrf.mxu0  ;;  %v3251_v60 = vpop.f32.mrf.mxu1 }
 0x165   : > { %v1554_v4 = vadd.f32 %v3250_v38, %v4493_v43 }
 0x166   : > { %v1743_v55 = vpop.f32.mrf.mxu0  ;;  %v3252_v3 = vpop.f32.mrf.mxu1 }
 0x167   : > { %v3253_v8 = vadd.f32 %v3252_v3, %v3251_v60  ;;  %v4593_v0 = vadd.f32 %v1714_v47, %v1554_v4 }
 0x168   : > { %v4591_v10 = vpop.f32.mrf.mxu0  ;;  %v3254_v46 = vpop.f32.mrf.mxu1 }
 0x169   : > { %v1559_v21 = vadd.f32 %v3253_v8, %v4486_v40 }
 0x16a   : > { %v1746_v44 = vpop.f32.mrf.mxu0  ;;  %v3255_v5 = vpop.f32.mrf.mxu1 }
 0x16b   : > { %v3256_v12 = vadd.f32 %v3255_v5, %v3254_v46  ;;  %v4598_v7 = vadd.f32 %v3559_v34, %v1559_v21 }
 0x16c   : > { %v4596_v51 = vpop.f32.mrf.mxu0  ;;  %v3257_v52 = vpop.f32.mrf.mxu1 }
 0x16d   : > { %v1562_v43 = vadd.f32 %v3256_v12, %v4491_v28 }
 0x16e   : > { %v4601_v42 = vpop.f32.mrf.mxu0  ;;  %v3258_v23 = vpop.f32.mrf.mxu1 }
 0x16f   : > { %v3259_v45 = vadd.f32 %v3258_v23, %v3257_v52  ;;  %v4605_v47 = vadd.f32 %v3560_v33, %v1562_v43 }
 0x170   : > { %v4603_v50 = vpop.f32.mrf.mxu0  ;;  %v3260_v17 = vpop.f32.mrf.mxu1 }
 0x171   : > { %v1567_v40 = vadd.f32 %v3259_v45, %v4501_v29 }
 0x172   : > { %v4608_v63 = vpop.f32.mrf.mxu0  ;;  %v3261_v56 = vpop.f32.mrf.mxu1 }
 0x173   : > { %v3262_v32 = vadd.f32 %v3261_v56, %v3260_v17  ;;  %v4612_v38 = vadd.f32 %v1727_v48, %v1567_v40 }
 0x174   : > { %v4610_v34 = vpop.f32.mrf.mxu0  ;;  %v3263_v28 = vpop.f32.mrf.mxu1 }
 0x175   : > { %v1570_v60 = vadd.f32 %v3262_v32, %v4505_v13 }
 0x176   : > { %v4615_v4 = vpop.f32.mrf.mxu0  ;;  %v3264_v3 = vpop.f32.mrf.mxu1 }
 0x177   : > { %v3265_v8 = vadd.f32 %v3264_v3, %v3263_v28  ;;  %v4619_v46 = vadd.f32 %v1730_v59, %v1570_v60 }
 0x178   : > { %v4617_v33 = vpop.f32.mrf.mxu0  ;;  %v3266_v29 = vpop.f32.mrf.mxu1 }
 0x179   : > { %v1575_v21 = vadd.f32 %v3265_v8, %v4498_v35 }
 0x17a   : > { %v4622_v5 = vpop.f32.mrf.mxu0  ;;  %v3267_v12 = vpop.f32.mrf.mxu1 }
 0x17b   : > { %v3268_v52 = vadd.f32 %v3267_v12, %v3266_v29  ;;  %v4626_v43 = vadd.f32 %v3563_v62, %v1575_v21 }
 0x17c   : > { %v4624_v48 = vpop.f32.mrf.mxu0  ;;  %v3269_v13 = vpop.f32.mrf.mxu1 }
 0x17d   : > { %v1578_v23 = vadd.f32 %v3268_v52, %v4503_v18 }
 0x17e   : > { %v4629_v45 = vpop.f32.mrf.mxu0  ;;  %v3270_v17 = vpop.f32.mrf.mxu1 }
 0x17f   : > { %v3271_v40 = vadd.f32 %v3270_v17, %v3269_v13  ;;  %v4633_v56 = vadd.f32 %v3564_v1, %v1578_v23 }
 0x180   : > { %v4631_v59 = vpop.f32.mrf.mxu0  ;;  %v3272_v35 = vpop.f32.mrf.mxu1 }
 0x181   : > { %v1583_v32 = vadd.f32 %v3271_v40, %v4511_v15 }
 0x182   : > { %v4636_v28 = vpop.f32.mrf.mxu0  ;;  %v3273_v60 = vpop.f32.mrf.mxu1 }
 0x183   : > { %v3274_v3 = vadd.f32 %v3273_v60, %v3272_v35  ;;  %v4640_v8 = vadd.f32 %v1743_v55, %v1583_v32 }
 0x184   : > { %v4638_v62 = vpop.f32.mrf.mxu0  ;;  %v3275_v18 = vpop.f32.mrf.mxu1 }
 0x185   : > { %4951 = vst [vmem:[#allocation3_spill] sm:$0xff] %v4638_v62  ;;  %v1586_v29 = vadd.f32 %v3274_v3, %v4515_v37 }
 0x186   : > { %v4643_v21 = vpop.f32.mrf.mxu0  ;;  %v3276_v12 = vpop.f32.mrf.mxu1 }
 0x187   : > { %v3277_v52 = vadd.f32 %v3276_v12, %v3275_v18  ;;  %v4647_v13 = vadd.f32 %v1746_v44, %v1586_v29 }
 0x188   : > { %v4645_v1 = vpop.f32.mrf.mxu0  ;;  %v3278_v15 = vpop.f32.mrf.mxu1 }
 0x189   : > { %4952 = vst [vmem:[#allocation4_spill] sm:$0xff] %v4645_v1  ;;  %v1591_v23 = vadd.f32 %v3277_v52, %v4513_v16 }
 0x18a   : > { %v4650_v17 = vpop.f32.mrf.mxu0  ;;  %v3279_v40 = vpop.f32.mrf.mxu1 }
 0x18b   : > { %v3280_v35 = vadd.f32 %v3279_v40, %v3278_v15  ;;  %v4653_v32 = vadd.f32 %v4586_v53, %v1591_v23 }
 0x18c   : > { %v3369_v55 = vpop.f32.mrf.mxu0  ;;  %v3281_v37 = vpop.f32.mrf.mxu1 }
 0x18d   : > { %v1594_v60 = vadd.f32 %v3280_v35, %v4518_v30 }
 0x18e   : > { %v3370_v3 = vpop.f32.mrf.mxu0  ;;  %v3282_v18 = vpop.f32.mrf.mxu1 }
 0x18f   : > { %v4656_v12 = vadd.f32 %v3370_v3, %v3369_v55  ;;  %v3283_v44 = vadd.f32 %v3282_v18, %v3281_v37  ;;  %v4661_v16 = vadd.f32 %v4591_v10, %v1594_v60 }
 0x190   : > { %v4658_v29 = vpop.f32.mrf.mxu0  ;;  %v3284_v52 = vpop.f32.mrf.mxu1 }
 0x191   : > { %v1599_v15 = vadd.f32 %v3283_v44, %v4523_v9 }
 0x192   : > { %v4664_v40 = vpop.f32.mrf.mxu0  ;;  %v3285_v53 = vpop.f32.mrf.mxu1 }
 0x193   : > { %v3286_v23 = vadd.f32 %v3285_v53, %v3284_v52  ;;  %v4669_v30 = vadd.f32 %v4601_v42, %v1599_v15 }
 0x194   : > { %v4666_v1 = vpop.f32.mrf.mxu0  ;;  %v3287_v35 = vpop.f32.mrf.mxu1 }
 0x195   : > { %v1602_v55 = vadd.f32 %v3286_v23, %v4526_v41 }
 0x196   : > { %v4672_v37 = vpop.f32.mrf.mxu0  ;;  %v3288_v3 = vpop.f32.mrf.mxu1 }
 0x197   : > { %v3289_v10 = vadd.f32 %v3288_v3, %v3287_v35  ;;  %v4677_v9 = vadd.f32 %v4608_v63, %v1602_v55 }
 0x198   : > { %v4674_v60 = vpop.f32.mrf.mxu0  ;;  %v3290_v18 = vpop.f32.mrf.mxu1 }
 0x199   : > { %4953 = vst [vmem:[#allocation5_spill] sm:$0xff] %v4677_v9  ;;  %v1607_v44 = vadd.f32 %v3289_v10, %v4531_v25 }
 0x19a   : > { %v4680_v52 = vpop.f32.mrf.mxu0  ;;  %v3291_v53 = vpop.f32.mrf.mxu1 }
 0x19b   : > { %v3292_v42 = vadd.f32 %v3291_v53, %v3290_v18  ;;  %v4685_v41 = vadd.f32 %v4596_v51, %v1607_v44 }
 0x19c   : > { %v4682_v15 = vpop.f32.mrf.mxu0  ;;  %v3293_v23 = vpop.f32.mrf.mxu1 }
 0x19d   : > { %v1610_v35 = vadd.f32 %v3292_v42, %v4534_v6 }
 0x19e   : > { %v4688_v3 = vpop.f32.mrf.mxu0  ;;  %v3294_v62 = vpop.f32.mrf.mxu1 }
 0x19f   : > { %v3295_v63 = vadd.f32 %v3294_v62, %v3293_v23  ;;  %v4693_v25 = vadd.f32 %v4603_v50, %v1610_v35 }
 0x1a0   : > { %v4690_v55 = vpop.f32.mrf.mxu0  ;;  %v3296_v10 = vpop.f32.mrf.mxu1 }
 0x1a1   : > { %4954 = vst [vmem:[#allocation6_spill] sm:$0xff] %v4693_v25  ;;  %v1615_v18 = vadd.f32 %v3295_v63, %v4545_v14 }
 0x1a2   : > { %v4696_v53 = vpop.f32.mrf.mxu0  ;;  %v3297_v2 = vpop.f32.mrf.mxu1 }
 0x1a3   : > { %v3298_v51 = vadd.f32 %v3297_v2, %v3296_v10  ;;  %v4701_v6 = vadd.f32 %v4615_v4, %v1615_v18 }
 0x1a4   : > { %v4698_v44 = vpop.f32.mrf.mxu0  ;;  %v3299_v42 = vpop.f32.mrf.mxu1 }
 0x1a5   : > { %4955 = vst [vmem:[#allocation7_spill] sm:$0xff] %v4701_v6  ;;  %v1618_v62 = vadd.f32 %v3298_v51, %v4554_v19 }
 0x1a6   : > { %v4704_v23 = vpop.f32.mrf.mxu0  ;;  %v3300_v9 = vpop.f32.mrf.mxu1 }
 0x1a7   : > { %v3301_v50 = vadd.f32 %v3300_v9, %v3299_v42  ;;  %v4709_v14 = vadd.f32 %v4622_v5, %v1618_v62 }
 0x1a8   : > { %v4706_v35 = vpop.f32.mrf.mxu0  ;;  %v3302_v63 = vpop.f32.mrf.mxu1 }
 0x1a9   : > { %4956 = vst [vmem:[#allocation8_spill] sm:$0xff] %v4709_v14  ;;  %v1623_v2 = vadd.f32 %v3301_v50, %v4563_v61 }
 0x1aa   : > { %v4712_v10 = vpop.f32.mrf.mxu0  ;;  %v3303_v25 = vpop.f32.mrf.mxu1 }
 0x1ab   : > { %v3304_v4 = vadd.f32 %v3303_v25, %v3302_v63  ;;  %v4717_v19 = vadd.f32 %v4610_v34, %v1623_v2 }
 0x1ac   : > { %v4714_v18 = vpop.f32.mrf.mxu0  ;;  %v3305_v51 = vpop.f32.mrf.mxu1 }
 0x1ad   : > { %4957 = vst [vmem:[#allocation9_spill] sm:$0xff] %v4717_v19  ;;  %v1626_v9 = vadd.f32 %v3304_v4, %v4571_v26 }
 0x1ae   : > { %v4720_v42 = vpop.f32.mrf.mxu0  ;;  %v3306_v6 = vpop.f32.mrf.mxu1 }
 0x1af   : > { %v3307_v5 = vadd.f32 %v3306_v6, %v3305_v51  ;;  %v4725_v61 = vadd.f32 %v4617_v33, %v1626_v9 }
 0x1b0   : > { %v4722_v62 = vpop.f32.mrf.mxu0  ;;  %v3308_v50 = vpop.f32.mrf.mxu1 }
 0x1b1   : > { %4958 = vst [vmem:[#allocation10_spill] sm:$0xff] %v4725_v61  ;;  %v1631_v25 = vadd.f32 %v3307_v5, %v4543_v20 }
 0x1b2   : > { %v4728_v63 = vpop.f32.mrf.mxu0  ;;  %v3309_v14 = vpop.f32.mrf.mxu1 }
 0x1b3   : > { %v3310_v34 = vadd.f32 %v3309_v14, %v3308_v50  ;;  %v4733_v26 = vadd.f32 %v4629_v45, %v1631_v25 }
 0x1b4   : > { %v4730_v2 = vpop.f32.mrf.mxu0  ;;  %v3311_v4 = vpop.f32.mrf.mxu1 }
 0x1b5   : > { %4959 = vst [vmem:[#allocation11_spill] sm:$0xff] %v4733_v26  ;;  %v1634_v6 = vadd.f32 %v3310_v34, %v4551_v24 }
 0x1b6   : > { %v4736_v51 = vpop.f32.mrf.mxu0  ;;  %v3312_v19 = vpop.f32.mrf.mxu1 }
 0x1b7   : > { %v3313_v33 = vadd.f32 %v3312_v19, %v3311_v4  ;;  %v4741_v20 = vadd.f32 %v4636_v28, %v1634_v6 }
 0x1b8   : > { %v4738_v9 = vpop.f32.mrf.mxu0  ;;  %v3314_v5 = vpop.f32.mrf.mxu1 }
 0x1b9   : > { %4960 = vst [vmem:[#allocation12_spill] sm:$0xff] %v4741_v20  ;;  %v1639_v14 = vadd.f32 %v3313_v33, %v4539_v36 }
 0x1ba   : > { %v4744_v50 = vpop.f32.mrf.mxu0  ;;  %v3315_v61 = vpop.f32.mrf.mxu1 }
 0x1bb   : > { %v3316_v45 = vadd.f32 %v3315_v61, %v3314_v5  ;;  %v4749_v24 = vadd.f32 %v4624_v48, %v1639_v14 }
 0x1bc   : > { %v4746_v25 = vpop.f32.mrf.mxu0  ;;  %v3317_v34 = vpop.f32.mrf.mxu1 }
 0x1bd   : > { %4961 = vst [vmem:[#allocation13_spill] sm:$0xff] %v4749_v24  ;;  %v1642_v19 = vadd.f32 %v3316_v45, %v4548_v54 }
 0x1be   : > { %v4752_v4 = vpop.f32.mrf.mxu0  ;;  %v3318_v26 = vpop.f32.mrf.mxu1 }
 0x1bf   : > { %v3319_v28 = vadd.f32 %v3318_v26, %v3317_v34  ;;  %v4757_v36 = vadd.f32 %v4631_v59, %v1642_v19 }
 0x1c0   : > { %v4754_v6 = vpop.f32.mrf.mxu0  ;;  %v3320_v33 = vpop.f32.mrf.mxu1 }
 0x1c1   : > { %4962 = vst [vmem:[#allocation14_spill] sm:$0xff] %v4757_v36  ;;  %v1647_v61 = vadd.f32 %v3319_v28, %v4561_v22 }
 0x1c2   : > { %v4760_v5 = vpop.f32.mrf.mxu0  ;;  %v3321_v20 = vpop.f32.mrf.mxu1 }
 0x1c3   : > { %v3322_v48 = vadd.f32 %v3321_v20, %v3320_v33  ;;  %v4765_v54 = vadd.f32 %v4643_v21, %v1647_v61 }
 0x1c4   : > { %v4762_v14 = vpop.f32.mrf.mxu0  ;;  %v3323_v45 = vpop.f32.mrf.mxu1 }
 0x1c5   : > { %4963 = vst [vmem:[#allocation15_spill] sm:$0xff] %v4765_v54  ;;  %v1650_v26 = vadd.f32 %v3322_v48, %v4569_v27 }
 0x1c6   : > { %v4768_v34 = vpop.f32.mrf.mxu0  ;;  %v3324_v24 = vpop.f32.mrf.mxu1 }
 0x1c7   : > { %v3325_v59 = vadd.f32 %v3324_v24, %v3323_v45  ;;  %v4773_v22 = vadd.f32 %v4650_v17, %v1650_v26  ;;  %v3377_v24 = vadd.f32 %v4672_v37, %v4666_v1  ;;  %v3380_v17 = vadd.f32 %v4680_v52, %v4674_v60 }
 0x1c8   : > { %v4770_v19 = vpop.f32.mrf.mxu0  ;;  %v4775_v28 = vpop.f32.mrf.mxu1 }
 0x1c9   : > { %4964 = vst [vmem:[#allocation16_spill] sm:$0xff] %v4773_v22  ;;  %4965 = vst [vmem:[#allocation17_spill] sm:$0xff] %v4775_v28  ;;  %v4778_v20 = vadd.f32 %v3325_v59, %v4558_v49 }
 0x1ca   : > { %v4780_v33 = vpop.f32.mrf.mxu0  ;;  %v4782_v21 = vpop.f32.mrf.mxu1 }
 0x1cb   : > { %4966 = vst [vmem:[#allocation18_spill] sm:$0xff] %v4778_v20  ;;  %4967 = vst [vmem:[#allocation19_spill] sm:$0xff] %v4782_v21  ;;  %v3374_v20 = vadd.f32 %v4664_v40, %v4658_v29 }
 0x1cc   : > { %v4784_v61 = vpop.f32.mrf.mxu0  ;;  %v3603_v27 = vpop.f32.mrf.mxu1 }
 0x1cd   : > { %v2219_v26 = vadd.f32 %v3603_v27, %v3377_v24 }
 0x1ce   : > { %v4788_v48 = vpop.f32.mrf.mxu0  ;;  %v2210_v45 = vpop.f32.mrf.mxu1 }
 0x1cf   : > { %v2211_v49 = vadd.f32 %v4656_v12, %v2210_v45  ;;  %v2339_v21 = vadd.f32 %v2219_v26, %v4580_v31  ;;  %v3389_v12 = vadd.f32 %v4704_v23, %v4698_v44  ;;  %v3392_v44 = vadd.f32 %v4712_v10, %v4706_v35 }
 0x1d0   : > { %v4793_v59 = vpop.f32.mrf.mxu0  ;;  %v3604_v22 = vpop.f32.mrf.mxu1 }
 0x1d1   : > { %v2337_v54 = vadd.f32 %v2211_v49, %v4574_v39  ;;  %v2222_v36 = vadd.f32 %v3604_v22, %v3380_v17  ;;  %v2568_v49 = vmul.f32 %v2339_v21, %v2339_v21 }
 0x1d2   : > { %v4798_v1 = vpop.f32.mrf.mxu0  ;;  %v2213_v37 = vpop.f32.mrf.mxu1 }
 0x1d3   : > { %v2340_v28 = vadd.f32 %v2222_v36, %v4583_v57  ;;  %v2214_v60 = vadd.f32 %v3374_v20, %v2213_v37  ;;  %v3383_v57 = vadd.f32 %v4688_v3, %v4682_v15  ;;  %v2566_v22 = vmul.f32 %v2337_v54, %v2337_v54 }
 0x1d4   : > { %v4802_v52 = vpop.f32.mrf.mxu0  ;;  %v3607_v39 = vpop.f32.mrf.mxu1 }
 0x1d5   : > { %v2994_v29 = vpack.c.bf16 %v2340_v28, %v2339_v21  ;;  %v2338_v40 = vadd.f32 %v2214_v60, %v4577_v58  ;;  %v2235_v23 = vadd.f32 %v3607_v39, %v3389_v12  ;;  %v3386_v58 = vadd.f32 %v4696_v53, %v4690_v55 }
 0x1d6   : > { %v4814_v31 = vpop.f32.mrf.mxu0  ;;  %v2226_v36 = vpop.f32.mrf.mxu1  ;;  %v2569_v10 = vmul.f32 %v2340_v28, %v2340_v28 }
 0x1d7   : > { %3066 = vst [vmem:[%s4811_s21 + $0x8] sm:$0xff] %v2994_v29   ;;  %v2989_v20 = vpack.c.bf16 %v2338_v40, %v2337_v54  ;;  %v2529_v27 = vadd.f32 %v2338_v40, %v2337_v54  ;;  %v2567_v24 = vmul.f32 %v2338_v40, %v2338_v40  ;;  %v2227_v17 = vadd.f32 %v3383_v57, %v2226_v36 }
 0x1d8   : > { %v4821_v45 = vpop.f32.mrf.mxu0  ;;  %v3608_v26 = vpop.f32.mrf.mxu1  ;;  %v2343_v60 = vadd.f32 %v2235_v23, %v4598_v7  ;;  %v3401_v57 = vadd.f32 %v4736_v51, %v4730_v2 }
 0x1d9   : > { %2990 = vst [vmem:[%s4811_s21] sm:$0xff] %v2989_v20   ;;  %v2530_v15 = vadd.f32 %v2529_v27, %v2339_v21  ;;  %v2598_v3 = vadd.f32 %v2567_v24, %v2566_v22  ;;  %v2238_v37 = vadd.f32 %v3608_v26, %v3392_v44  ;;  %v2341_v54 = vadd.f32 %v2227_v17, %v4588_v11 }
 0x1da   : > { %v4826_v35 = vpop.f32.mrf.mxu0  ;;  %v2229_v12 = vpop.f32.mrf.mxu1  ;;  %v3395_v21 = vadd.f32 %v4720_v42, %v4714_v18  ;;  %v3404_v20 = vadd.f32 %v4744_v50, %v4738_v9  ;;  %v3398_v26 = vadd.f32 %v4728_v63, %v4722_v62 }
 0x1db   : > { %v2599_v39 = vadd.f32 %v2598_v3, %v2568_v49  ;;  %v2531_v29 = vadd.f32 %v2530_v15, %v2340_v28  ;;  %v2344_v55 = vadd.f32 %v2238_v37, %v4605_v47  ;;  %v2230_v53 = vadd.f32 %v3386_v58, %v2229_v12 }
 0x1dc   : > { %v4831_v40 = vpop.f32.mrf.mxu0  ;;  %v3611_v44 = vpop.f32.mrf.mxu1  ;;  %v2570_v7 = vmul.f32 %v2341_v54, %v2341_v54  ;;  %v2572_v15 = vmul.f32 %v2343_v60, %v2343_v60 }
 0x1dd   : > { %v2532_v36 = vadd.f32 %v2531_v29, %v2341_v54  ;;  %v2600_v23 = vadd.f32 %v2599_v39, %v2569_v10  ;;  %v3004_v11 = vpack.c.bf16 %v2344_v55, %v2343_v60  ;;  %v2342_v28 = vadd.f32 %v2230_v53, %v4593_v0 }
 0x1de   : > { %v4837_v22 = vpop.f32.mrf.mxu0  ;;  %v2242_v47 = vpop.f32.mrf.mxu1  ;;  %v2251_v18 = vadd.f32 %v3611_v44, %v3401_v57  ;;  %v2573_v29 = vmul.f32 %v2344_v55, %v2344_v55 }
 0x1df   : > { %v2601_v27 = vadd.f32 %v2600_v23, %v2570_v7  ;;  %3068 = vst [vmem:[%s4811_s21 + $0x18] sm:$0xff] %v3004_v11   ;;  %v2243_v42 = vadd.f32 %v3395_v21, %v2242_v47  ;;  %v2999_v2 = vpack.c.bf16 %v2342_v28, %v2341_v54  ;;  %v2533_v51 = vadd.f32 %v2532_v36, %v2342_v28 }
 0x1e0   : > { %v4843_v24 = vpop.f32.mrf.mxu0  ;;  %v2571_v58 = vmul.f32 %v2342_v28, %v2342_v28  ;;  %v3612_v17 = vpop.f32.mrf.mxu1  ;;  %v2347_v10 = vadd.f32 %v2251_v18, %v4626_v43  ;;  %v3407_v21 = vadd.f32 %v4752_v4, %v4746_v25 }
 0x1e1   : > { %v2254_v49 = vadd.f32 %v3612_v17, %v3404_v20  ;;  %3067 = vst [vmem:[%s4811_s21 + $0x10] sm:$0xff] %v2999_v2   ;;  %v2534_v3 = vadd.f32 %v2533_v51, %v2343_v60  ;;  %v2345_v50 = vadd.f32 %v2243_v42, %v4612_v38  ;;  %v3413_v60 = vadd.f32 %v4768_v34, %v4762_v14 }
 0x1e2   : > { %v4847_v0 = vpop.f32.mrf.mxu0  ;;  %v2602_v9 = vadd.f32 %v2601_v27, %v2571_v58  ;;  %v2245_v37 = vpop.f32.mrf.mxu1 }
 0x1e3   : > { %v2348_v54 = vadd.f32 %v2254_v49, %v4633_v56  ;;  %v2246_v12 = vadd.f32 %v3398_v26, %v2245_v37  ;;  %v2535_v63 = vadd.f32 %v2534_v3, %v2344_v55  ;;  %v3416_v56 = vadd.f32 %v4780_v33, %v4770_v19 }
 0x1e4   : > { %v4853_v39 = vpop.f32.mrf.mxu0  ;;  %v2603_v62 = vadd.f32 %v2602_v9, %v2572_v15  ;;  %v3615_v53 = vpop.f32.mrf.mxu1  ;;  %v2574_v36 = vmul.f32 %v2345_v50, %v2345_v50  ;;  %v2576_v19 = vmul.f32 %v2347_v10, %v2347_v10  ;;  %v3419_v3 = vadd.f32 %v4788_v48, %v4784_v61 }
 0x1e5   : > { %v3014_v38 = vpack.c.bf16 %v2348_v54, %v2347_v10  ;;  %v2346_v57 = vadd.f32 %v2246_v12, %v4619_v46  ;;  %v2536_v44 = vadd.f32 %v2535_v63, %v2345_v50  ;;  %v2267_v25 = vadd.f32 %v3615_v53, %v3413_v60 }
 0x1e6   : > { %v4860_v43 = vpop.f32.mrf.mxu0  ;;  %v2604_v7 = vadd.f32 %v2603_v62, %v2573_v29  ;;  %v2258_v55 = vpop.f32.mrf.mxu1  ;;  %v3410_v46 = vadd.f32 %v4760_v5, %v4754_v6  ;;  %v2577_v49 = vmul.f32 %v2348_v54, %v2348_v54  ;;  %v3425_v9 = vadd.f32 %v4814_v31, %v4802_v52 }
 0x1e7   : > { %3070 = vst [vmem:[%s4811_s21 + $0x28] sm:$0xff] %v3014_v38   ;;  %v3009_v23 = vpack.c.bf16 %v2346_v57, %v2345_v50  ;;  %v2575_v11 = vmul.f32 %v2346_v57, %v2346_v57  ;;  %v2259_v4 = vadd.f32 %v3407_v21, %v2258_v55  ;;  %v2537_v34 = vadd.f32 %v2536_v44, %v2346_v57 }
 0x1e8   : > { %v3438_v28 = vpop.f32.mrf.mxu0  ;;  %v2605_v14 = vadd.f32 %v2604_v7, %v2574_v36  ;;  %v3616_v47 = vpop.f32.mrf.mxu1  ;;  %v2351_v51 = vadd.f32 %v2267_v25, %v4653_v32  ;;  %v3422_v53 = vadd.f32 %v4798_v1, %v4793_v59  ;;  %v4968_v36 = vld [vmem:[#allocation6_spill] sm:$0xff] }
 0x1e9   : > { %3069 = vst [vmem:[%s4811_s21 + $0x20] sm:$0xff] %v3009_v23   ;;  %v2270_v20 = vadd.f32 %v3616_v47, %v3416_v56  ;;  %v2538_v33 = vadd.f32 %v2537_v34, %v2347_v10  ;;  %v2349_v42 = vadd.f32 %v2259_v4, %v4640_v8  ;;  %v3431_v4 = vadd.f32 %v4837_v22, %v4831_v40 }
 0x1ea   : > { %v3439_v27 = vpop.f32.mrf.mxu0  ;;  %v2606_v18 = vadd.f32 %v2605_v14, %v2575_v11  ;;  %v2261_v2 = vpop.f32.mrf.mxu1  ;;  %v3437_v14 = vadd.f32 %v4860_v43, %v4853_v39  ;;  %v3434_v39 = vadd.f32 %v4847_v0, %v4843_v24 }
 0x1eb   : > { %v2352_v58 = vadd.f32 %v2270_v20, %v4661_v16  ;;  %v2262_v17 = vadd.f32 %v3410_v46, %v2261_v2  ;;  %v2539_v6 = vadd.f32 %v2538_v33, %v2348_v54  ;;  %v3428_v16 = vadd.f32 %v4826_v35, %v4821_v45 }
 0x1ec   : > { %v4871_v26 = vpop.f32.mrf.mxu0  ;;  %v2607_v15 = vadd.f32 %v2606_v18, %v2576_v19  ;;  %v3619_v5 = vpop.f32.mrf.mxu1  ;;  %v2578_v10 = vmul.f32 %v2349_v42, %v2349_v42  ;;  %v2580_v35 = vmul.f32 %v2351_v51, %v2351_v51 }
 0x1ed   : > { %v3024_v8 = vpack.c.bf16 %v2352_v58, %v2351_v51  ;;  %v2350_v50 = vadd.f32 %v2262_v17, %v4647_v13  ;;  %v2540_v37 = vadd.f32 %v2539_v6, %v2349_v42  ;;  %v2283_v61 = vadd.f32 %v3619_v5, %v3425_v9  ;;  %v4970_v5 = vld [vmem:[#allocation7_spill] sm:$0xff] }
 0x1ee   : > { %v4878_v32 = vpop.f32.mrf.mxu0  ;;  %v2608_v12 = vadd.f32 %v2607_v15, %v2577_v49  ;;  %v2274_v54 = vpop.f32.mrf.mxu1  ;;  %v2581_v11 = vmul.f32 %v2352_v58, %v2352_v58 }
 0x1ef   : > { %3072 = vst [vmem:[%s4811_s21 + $0x38] sm:$0xff] %v3024_v8   ;;  %v3019_v29 = vpack.c.bf16 %v2350_v50, %v2349_v42  ;;  %v2579_v62 = vmul.f32 %v2350_v50, %v2350_v50  ;;  %v2275_v48 = vadd.f32 %v3419_v3, %v2274_v54  ;;  %v2541_v31 = vadd.f32 %v2540_v37, %v2350_v50  ;;  %v4971_v8 = vld [vmem:[#allocation9_spill] sm:$0xff] }
 0x1f0   : > { %v4883_v63 = vpop.f32.mrf.mxu0  ;;  %v2609_v52 = vadd.f32 %v2608_v12, %v2578_v10  ;;  %v3620_v13 = vpop.f32.mrf.mxu1  ;;  %v2355_v44 = vadd.f32 %v2283_v61, %v4685_v41  ;;  %v3440_v41 = vadd.f32 %v3439_v27, %v3438_v28  ;;  %v3443_v0 = vadd.f32 %v4878_v32, %v4871_v26 }
 0x1f1   : > { %3071 = vst [vmem:[%s4811_s21 + $0x30] sm:$0xff] %v3019_v29   ;;  %v2286_v21 = vadd.f32 %v3620_v13, %v3428_v16  ;;  %v2542_v60 = vadd.f32 %v2541_v31, %v2351_v51  ;;  %v2353_v57 = vadd.f32 %v2275_v48, %v4669_v30  ;;  %v4969_v30 = vld [vmem:[#allocation5_spill] sm:$0xff]  ;;  %v4972_v16 = vld [vmem:[#allocation10_spill] sm:$0xff] }
 0x1f2   : > { %v4888_v45 = vpop.f32.mrf.mxu0  ;;  %v2610_v38 = vadd.f32 %v2609_v52, %v2579_v62  ;;  %v2277_v56 = vpop.f32.mrf.mxu1  ;;  %v2584_v28 = vmul.f32 %v2355_v44, %v2355_v44  ;;  %v4973_v52 = vld [vmem:[#allocation8_spill] sm:$0xff] }
 0x1f3   : > { %v2356_v7 = vadd.f32 %v2286_v21, %v4968_v36  ;;  %v2278_v55 = vadd.f32 %v3422_v53, %v2277_v56  ;;  %v2543_v59 = vadd.f32 %v2542_v60, %v2352_v58  ;;  %v2582_v19 = vmul.f32 %v2353_v57, %v2353_v57 }
 0x1f4   : > { %v3447_v23 = vpop.f32.mrf.mxu0  ;;  %v2611_v25 = vadd.f32 %v2610_v38, %v2580_v35  ;;  %v3623_v1 = vpop.f32.mrf.mxu1  ;;  %v3446_v32 = vadd.f32 %v4888_v45, %v4883_v63 }
 0x1f5   : > { %v3034_v34 = vpack.c.bf16 %v2356_v7, %v2355_v44  ;;  %v2354_v47 = vadd.f32 %v2278_v55, %v4969_v30  ;;  %v2544_v20 = vadd.f32 %v2543_v59, %v2353_v57  ;;  %v2299_v51 = vadd.f32 %v3623_v1, %v3437_v14  ;;  %v4974_v14 = vld [vmem:[#allocation11_spill] sm:$0xff] }
 0x1f6   : > { %v3448_v46 = vpop.f32.mrf.mxu0  ;;  %v2612_v33 = vadd.f32 %v2611_v25, %v2581_v11  ;;  %v2290_v18 = vpop.f32.mrf.mxu1  ;;  %v2585_v54 = vmul.f32 %v2356_v7, %v2356_v7 }
 0x1f7   : > { %3074 = vst [vmem:[%s4811_s21 + $0x48] sm:$0xff] %v3034_v34   ;;  %v3029_v42 = vpack.c.bf16 %v2354_v47, %v2353_v57  ;;  %v2583_v2 = vmul.f32 %v2354_v47, %v2354_v47  ;;  %v2291_v58 = vadd.f32 %v3431_v4, %v2290_v18  ;;  %v2545_v22 = vadd.f32 %v2544_v20, %v2354_v47  ;;  %v4975_v47 = vld [vmem:[#allocation17_spill] sm:$0xff] }
 0x1f8   : > { %v3450_v17 = vpop.f32.mrf.mxu0  ;;  %v2613_v40 = vadd.f32 %v2612_v33, %v2582_v19  ;;  %v3624_v49 = vpop.f32.mrf.mxu1  ;;  %v2359_v50 = vadd.f32 %v2299_v51, %v4971_v8  ;;  %v3449_v61 = vadd.f32 %v3448_v46, %v3447_v23  ;;  %v4976_v46 = vld [vmem:[#allocation19_spill] sm:$0xff]  ;;  %v4977_v20 = vld [vmem:[#allocation13_spill] sm:$0xff]  ;;  %v4978_v33 = vld [vmem:[#allocation14_spill] sm:$0xff] }
 0x1f9   : > { %3073 = vst [vmem:[%s4811_s21 + $0x40] sm:$0xff] %v3029_v42   ;;  %v2302_v43 = vadd.f32 %v3624_v49, %v3440_v41  ;;  %v2546_v27 = vadd.f32 %v2545_v22, %v2355_v44  ;;  %v2357_v3 = vadd.f32 %v2291_v58, %v4970_v5  ;;  %v3328_v41 = vadd.f32 %v4976_v46, %v4975_v47  ;;  %v4979_v22 = vld [vmem:[#allocation12_spill] sm:$0xff]  ;;  %v4980_v5 = vld [vmem:[#allocation2_spill] sm:$0xff] }
 0x1fa   : > { %v3451_v15 = vpop.f32.mrf.mxu0  ;;  %v2614_v6 = vadd.f32 %v2613_v40, %v2583_v2  ;;  %v2293_v9 = vpop.f32.mrf.mxu1  ;;  %v2588_v59 = vmul.f32 %v2359_v50, %v2359_v50 }
 0x1fb   : > { %v2360_v37 = vadd.f32 %v2302_v43, %v4972_v16  ;;  %v2294_v10 = vadd.f32 %v3434_v39, %v2293_v9  ;;  %v2547_v62 = vadd.f32 %v2546_v27, %v2356_v7  ;;  %v2586_v21 = vmul.f32 %v2357_v3, %v2357_v3 }
 0x1fc   : > { %v3453_v12 = vpop.f32.mrf.mxu0  ;;  %v2615_v29 = vadd.f32 %v2614_v6, %v2584_v28  ;;  %v3627_v24 = vpop.f32.mrf.mxu1  ;;  %v3452_v60 = vadd.f32 %v3451_v15, %v3450_v17 }
 0x1fd   : > { %v3044_v48 = vpack.c.bf16 %v2360_v37, %v2359_v50  ;;  %v2358_v31 = vadd.f32 %v2294_v10, %v4973_v52  ;;  %v2548_v53 = vadd.f32 %v2547_v62, %v2357_v3  ;;  %v2315_v44 = vadd.f32 %v3627_v24, %v3449_v61 }
 0x1fe   : > { %v3454_v13 = vpop.f32.mrf.mxu0  ;;  %v2616_v35 = vadd.f32 %v2615_v29, %v2585_v54  ;;  %v2306_v38 = vpop.f32.mrf.mxu1  ;;  %v2589_v63 = vmul.f32 %v2360_v37, %v2360_v37 }
 0x1ff   : > { %3076 = vst [vmem:[%s4811_s21 + $0x58] sm:$0xff] %v3044_v48   ;;  %v3039_v57 = vpack.c.bf16 %v2358_v31, %v2357_v3  ;;  %v2587_v56 = vmul.f32 %v2358_v31, %v2358_v31  ;;  %v2307_v36 = vadd.f32 %v3443_v0, %v2306_v38  ;;  %v2549_v11 = vadd.f32 %v2548_v53, %v2358_v31  ;;  %v4981_v48 = vld [vmem:[#allocation15_spill] sm:$0xff]  ;;  %v4982_v53 = vld [vmem:[#allocation18_spill] sm:$0xff] }
 0x200   : > { %v3456_v7 = vpop.f32.mrf.mxu0  ;;  %v2617_v55 = vadd.f32 %v2616_v35, %v2586_v21  ;;  %v3628_v26 = vpop.f32.mrf.mxu1  ;;  %v2363_v19 = vadd.f32 %v2315_v44, %v4977_v20  ;;  %v3455_v17 = vadd.f32 %v3454_v13, %v3453_v12  ;;  %v1658_v3 = vadd.f32 %v3328_v41, %v4980_v5  ;;  %v4983_v21 = vld [vmem:[#allocation3_spill] sm:$0xff] }
 0x201   : > { %3075 = vst [vmem:[%s4811_s21 + $0x50] sm:$0xff] %v3039_v57   ;;  %v2318_v23 = vadd.f32 %v3628_v26, %v3452_v60  ;;  %v2550_v1 = vadd.f32 %v2549_v11, %v2359_v50  ;;  %v2361_v34 = vadd.f32 %v2307_v36, %v4974_v14  ;;  %v1816_v35 = vadd.f32 %v4983_v21, %v4982_v53  ;;  %v4984_v60 = vld [vmem:[#allocation4_spill] sm:$0xff] }
 0x202   : > { %v3457_v25 = vpop.f32.mrf.mxu0  ;;  %v2618_v4 = vadd.f32 %v2617_v55, %v2587_v56  ;;  %v2309_v30 = vpop.f32.mrf.mxu1  ;;  %v2592_v54 = vmul.f32 %v2363_v19, %v2363_v19  ;;  %v1819_v38 = vadd.f32 %v4984_v60, %v1658_v3  ;;  %v4985_v11 = vld [vmem:[#allocation16_spill] sm:$0xff] }
 0x203   : > { %v2364_v18 = vadd.f32 %v2318_v23, %v4978_v33  ;;  %v2310_v42 = vadd.f32 %v3446_v32, %v2309_v30  ;;  %v2551_v51 = vadd.f32 %v2550_v1, %v2360_v37  ;;  %v2590_v15 = vmul.f32 %v2361_v34, %v2361_v34 }
 0x204   : > { %v3459_v2 = vpop.f32.mrf.mxu0  ;;  %v2619_v45 = vadd.f32 %v2618_v4, %v2588_v59  ;;  %v3631_v58 = vpop.f32.mrf.mxu1  ;;  %v3458_v29 = vadd.f32 %v3457_v25, %v3456_v7 }
 0x205   : > { %v3054_v40 = vpack.c.bf16 %v2364_v18, %v2363_v19  ;;  %v2362_v49 = vadd.f32 %v2310_v42, %v4979_v22  ;;  %v2552_v43 = vadd.f32 %v2551_v51, %v2361_v34  ;;  %v2593_v56 = vmul.f32 %v2364_v18, %v2364_v18 }
 0x206   : > { %v3460_v39 = vpop.f32.mrf.mxu0  ;;  %v2620_v28 = vadd.f32 %v2619_v45, %v2589_v63  ;;  %v2322_v6 = vpop.f32.mrf.mxu1 }
 0x207   : > { %v3461_v27 = vadd.f32 %v3460_v39, %v3459_v2  ;;  %3078 = vst [vmem:[%s4811_s21 + $0x68] sm:$0xff] %v3054_v40   ;;  %v3049_v9 = vpack.c.bf16 %v2362_v49, %v2361_v34  ;;  %v2591_v8 = vmul.f32 %v2362_v49, %v2362_v49  ;;  %v2323_v50 = vadd.f32 %v3455_v17, %v2322_v6 }
 0x208   : > { %v3462_v16 = vpop.f32.mrf.mxu0  ;;  %v2621_v37 = vadd.f32 %v2620_v28, %v2590_v15  ;;  %v2553_v10 = vadd.f32 %v2552_v43, %v2362_v49  ;;  %v3632_v12 = vpop.f32.mrf.mxu1 }
 0x209   : > { %3077 = vst [vmem:[%s4811_s21 + $0x60] sm:$0xff] %v3049_v9   ;;  %v2331_v62 = vadd.f32 %v3631_v58, %v3461_v27  ;;  %v2365_v52 = vadd.f32 %v2323_v50, %v4981_v48 }
 0x20a   : > { %v3463_v24 = vpop.f32.mrf.mxu0  ;;  %v2554_v0 = vadd.f32 %v2553_v10, %v2363_v19  ;;  %v2622_v61 = vadd.f32 %v2621_v37, %v2591_v8  ;;  %v2325_v13 = vpop.f32.mrf.mxu1 }
 0x20b   : > { %v3464_v31 = vadd.f32 %v3463_v24, %v3462_v16  ;;  %v2326_v57 = vadd.f32 %v3458_v29, %v2325_v13  ;;  %v2367_v55 = vadd.f32 %v2331_v62, %v1816_v35  ;;  %v2594_v23 = vmul.f32 %v2365_v52, %v2365_v52 }
 0x20c   : > { %v2623_v44 = vadd.f32 %v2622_v61, %v2592_v54  ;;  %v2555_v36 = vadd.f32 %v2554_v0, %v2364_v18 }
 0x20d   : > { %v2334_v7 = vadd.f32 %v3632_v12, %v3464_v31  ;;  %v2366_v26 = vadd.f32 %v2326_v57, %v4985_v11  ;;  %v2596_v47 = vmul.f32 %v2367_v55, %v2367_v55 }
 0x20e   : > { %v2556_v32 = vadd.f32 %v2555_v36, %v2365_v52  ;;  %v2624_v25 = vadd.f32 %v2623_v44, %v2593_v56 }
 0x20f   : > { %v2368_v59 = vadd.f32 %v2334_v7, %v1819_v38  ;;  %v3059_v1 = vpack.c.bf16 %v2366_v26, %v2365_v52  ;;  %v2595_v4 = vmul.f32 %v2366_v26, %v2366_v26 }
 0x210   : > { %v2625_v14 = vadd.f32 %v2624_v25, %v2594_v23  ;;  %v2557_v30 = vadd.f32 %v2556_v32, %v2366_v26 }
 0x211   : > { %v3064_v34 = vpack.c.bf16 %v2368_v59, %v2367_v55  ;;  %3079 = vst [vmem:[%s4811_s21 + $0x70] sm:$0xff] %v3059_v1   ;;  %v2597_v20 = vmul.f32 %v2368_v59, %v2368_v59 }
 0x212   : > { %v2558_v46 = vadd.f32 %v2557_v30, %v2367_v55  ;;  %v2626_v41 = vadd.f32 %v2625_v14, %v2595_v4 }
 0x213   : > { %3080 = vst [vmem:[%s4811_s21 + $0x78] sm:$0xff] %v3064_v34  }
 0x214   : > { %v2559_v19 = vadd.f32 %v2558_v46, %v2368_v59  ;;  %v2627_v33 = vadd.f32 %v2626_v41, %v2596_v47 }
 0x216   : > { %v2560_v18 = vrot.slane %v2559_v19, 4  ;;  %v2628_v42 = vadd.f32 %v2627_v33, %v2597_v20 }
 0x218   : > { %v2561_v2 = vadd.f32 %v2560_v18, %v2559_v19  ;;  %v2629_v63 = vrot.slane %v2628_v42, 4 }
 0x21a   : > { %v2562_v45 = vrot.slane %v2561_v2, 2  ;;  %v2630_v51 = vadd.f32 %v2629_v63, %v2628_v42 }
 0x21c   : > { %v2563_v58 = vadd.f32 %v2562_v45, %v2561_v2  ;;  %v2631_v17 = vrot.slane %v2630_v51, 2 }
 0x21e   : > { %v2564_v40 = vrot.slane %v2563_v58, 1  ;;  %v2632_v22 = vadd.f32 %v2631_v17, %v2630_v51 }
 0x220   : > { %v2633_v49 = vrot.slane %v2632_v22, 1  ;;  %v2565_v39 = vadd.f32 %v2564_v40, %v2563_v58 }
 0x222   : > { %v2634_v43 = vadd.f32 %v2633_v49, %v2632_v22 }
 0x224   : > { %v2636_v15 = vsel %vm439_vm0, %v2565_v39, %v2634_v43 }
 0x225   : > { %2637 = vst [vmem:[%s181_s24] sm:$0x3] %v2636_v15 }
 0x226 PF: > { %s14_s12 = sadd.s32 1, %s3752_s12  }
 0x227   : > { %p11_p4 = scmp.ge.s32.totalorder %s14_s12, 4  }
 0x229   :  { %13 = sbr.rel (!%p11_p4) target bundleno = 1 (0x1), region = 72 }

</bundles_post_ra>
